<compile_context>
chip_gen: v7x
topology: tpu7x:2x2x1
jax: 0.10.0
libtpu: 0.0.40
codegen_flags: <defaults>
</compile_context>

<pallas_src>
import functools

import jax
import jax.numpy as jnp
from jax.experimental import pallas as pl
from jax.experimental.pallas import tpu as pltpu

EMB_DIM = 100
NUM_LAYER = 5
NUM_REPS = NUM_LAYER + 1            # JK='multilayer' -> input emb + 5 layers
CAT_DIM = NUM_REPS * EMB_DIM        # 600
FC1_OUT, FC2_OUT, FC3_OUT = 300, 200, 100
FC3_PAD = 128                       # lane-dense output width (sliced to 100 outside)

NCORES = 2                          # node-stream split across TensorCores (v7x)
H_BUFFERS = 3                       # pipeline depth for the streamed h tiles
H_STREAM_VMEM_BUDGET = 30 * 1024 * 1024   # VMEM bytes for h-stream buffers (v7x-safe)
VMEM_LIMIT = 48 * 1024 * 1024


def _round_up(x, m):
    return ((x + m - 1) // m) * m


def _cdiv(a, b):
    return -(-a // b)


def _pool_kernel(batch_ref, h_ref, psum_ref, pcnt_ref, *,
                 n_nodes, tile_n, steps_per_core, g_pad, needs_mask):
    """Segment-sum pooling of one (tile_n, 600) h tile into this core's partials.

    batch_ref : (1, tile_n) int32   graph id per node
    h_ref     : (tile_n, 600)       node embeddings (cast to bf16 per-tile in-kernel)
    psum_ref  : (g_pad, 600) f32    per-core un-normalized pooled sums (output block,
                                    resident across the inner reduction axis)
    pcnt_ref  : (g_pad, 1)   f32    per-core per-graph node counts
    """
    step = pl.program_id(1)

    @pl.when(step == 0)
    def _init():
        psum_ref[...] = jnp.zeros_like(psum_ref)
        pcnt_ref[...] = jnp.zeros_like(pcnt_ref)

    # Logical (unclamped) node offset of this tile.  The index_maps clamp the DMA to
    # the last real tile, so phantom / partial tiles are neutralized by masking here.
    node_off = (pl.program_id(0) * steps_per_core + step) * tile_n

    h = h_ref[...]
    if h.dtype != jnp.bfloat16:
        h = h.astype(jnp.bfloat16)          # per-tile cast: no wrapper-side HBM pass

    batch = batch_ref[...]                                            # (1, tile_n)
    gid = jax.lax.broadcasted_iota(jnp.int32, (g_pad, tile_n), 0)
    onehot = gid == batch                                             # (g_pad, tile_n)
    if needs_mask:
        lane = jax.lax.broadcasted_iota(jnp.int32, (1, tile_n), 1)
        onehot = jnp.logical_and(onehot, (node_off + lane) < n_nodes)
        row = jax.lax.broadcasted_iota(jnp.int32, (tile_n, 1), 0)
        h = jnp.where((node_off + row) < n_nodes, h, 0)   # kill stale-VMEM junk rows
    onehot = onehot.astype(jnp.bfloat16)    # built directly in bf16 for the MXU

    # Counts via a ones-vector matmul (exact integers in f32 accumulation).
    ones = jnp.ones((tile_n, 1), jnp.bfloat16)
    pcnt_ref[...] += jnp.dot(onehot, ones, preferred_element_type=jnp.float32)
    psum_ref[...] += jnp.dot(onehot, h, preferred_element_type=jnp.float32)


def _finalize_kernel(psum_ref, pcnt_ref, w1_ref, b1_ref, w2_ref, b2_ref,
                     w3_ref, b3_ref, out_ref, *, g_pad):
    """Combine per-core partials, exact mean divide, and the fused 3-layer MLP."""
    pooled_sum = psum_ref[0:g_pad, :]
    cnt = pcnt_ref[0:g_pad, :]
    for c in range(1, NCORES):
        pooled_sum = pooled_sum + psum_ref[c * g_pad:(c + 1) * g_pad, :]
        cnt = cnt + pcnt_ref[c * g_pad:(c + 1) * g_pad, :]
    # Exact divide (review: no approx reciprocal); empty graphs -> 0 (PyG scatter-mean).
    pooled = pooled_sum / jnp.maximum(cnt, 1.0)                       # (g_pad, 600) f32

    x = jnp.dot(pooled.astype(w1_ref.dtype), w1_ref[...],
                preferred_element_type=jnp.float32)
    x = jnp.maximum(x + b1_ref[...], 0.0)                             # relu(fc1)
    x = jnp.dot(x.astype(w2_ref.dtype), w2_ref[...],
                preferred_element_type=jnp.float32)
    x = jnp.maximum(x + b2_ref[...], 0.0)                             # relu(fc2)
    x = jnp.dot(x.astype(w3_ref.dtype), w3_ref[...],
                preferred_element_type=jnp.float32)
    out_ref[...] = x + b3_ref[...]                                    # fc3 (no relu)


@functools.partial(jax.jit, static_argnames=("num_graphs", "node_tile"))
def drug_mlp_forward(h_cat, batch_ids, params, *, num_graphs, node_tile=8192):
    """h_cat: (N, 600) float (bf16 or f32), batch_ids: (N,) int -> (num_graphs, 100) f32."""
    n_nodes, cat_dim = h_cat.shape
    assert cat_dim == CAT_DIM, cat_dim
    w1, b1, w2, b2, w3, b3 = params

    g_pad = max(8, _round_up(num_graphs, 8))

    # Node tile: as large as the v7x-safe VMEM budget for H_BUFFERS-deep buffers allows.
    itemsize = jnp.dtype(h_cat.dtype).itemsize
    tile_cap = max(128, (H_STREAM_VMEM_BUDGET
                         // (H_BUFFERS * CAT_DIM * itemsize)) // 128 * 128)
    tile_n = max(128, min(node_tile, tile_cap, _round_up(n_nodes, 128)))
    total_tiles = _cdiv(n_nodes, tile_n)            # real tiles covering the nodes
    steps_per_core = _cdiv(total_tiles, NCORES)     # logical tiles per core
    needs_mask = (NCORES * steps_per_core * tile_n) != n_nodes
    h_buffers = min(H_BUFFERS, max(2, steps_per_core))

    batch_2d = batch_ids.astype(jnp.int32).reshape(1, n_nodes)

    def h_map(c, i):    # clamp phantom steps onto the last real tile (masked in-kernel)
        return (jnp.minimum(c * steps_per_core + i, total_tiles - 1), 0)

    def b_map(c, i):
        return (0, jnp.minimum(c * steps_per_core + i, total_tiles - 1))

    pool_cost = pl.CostEstimate(
        flops=2 * g_pad * NCORES * steps_per_core * tile_n * (CAT_DIM + 1),
        transcendentals=0,
        bytes_accessed=(n_nodes * CAT_DIM * itemsize + n_nodes * 4
                        + NCORES * g_pad * (CAT_DIM + 1) * 4),
    )

    # ---- Stage 1: per-core segment-sum pooling over the streamed h tiles. ----
    psum, pcnt = pl.pallas_call(
        functools.partial(_pool_kernel, n_nodes=n_nodes, tile_n=tile_n,
                          steps_per_core=steps_per_core, g_pad=g_pad,
                          needs_mask=needs_mask),
        out_shape=(jax.ShapeDtypeStruct((NCORES * g_pad, CAT_DIM), jnp.float32),
                   jax.ShapeDtypeStruct((NCORES * g_pad, 1), jnp.float32)),
        grid_spec=pltpu.PrefetchScalarGridSpec(
            num_scalar_prefetch=0,
            grid=(NCORES, steps_per_core),
            in_specs=[
                pl.BlockSpec((1, tile_n), b_map,
                             pipeline_mode=pl.Buffered(h_buffers)),
                pl.BlockSpec((tile_n, CAT_DIM), h_map,
                             pipeline_mode=pl.Buffered(h_buffers)),
            ],
            out_specs=[
                pl.BlockSpec((g_pad, CAT_DIM), lambda c, i: (c, 0)),
                pl.BlockSpec((g_pad, 1), lambda c, i: (c, 0)),
            ],
        ),
        compiler_params=pltpu.CompilerParams(
            dimension_semantics=("parallel", "arbitrary"),
            vmem_limit_bytes=VMEM_LIMIT,
        ),
        cost_estimate=pool_cost,
    )(batch_2d, h_cat)

    # ---- Stage 2: combine partials + exact mean + fused MLP (tiny, single step). ----
    w1b = w1.astype(jnp.bfloat16)
    w2b = w2.astype(jnp.bfloat16)
    w3b = jnp.pad(w3, ((0, 0), (0, FC3_PAD - FC3_OUT))).astype(jnp.bfloat16)
    b3p = jnp.pad(b3, ((0, 0), (0, FC3_PAD - FC3_OUT)))

    const = lambda i: (0, 0)
    out_pad = pl.pallas_call(
        functools.partial(_finalize_kernel, g_pad=g_pad),
        out_shape=jax.ShapeDtypeStruct((g_pad, FC3_PAD), jnp.float32),
        grid_spec=pltpu.PrefetchScalarGridSpec(
            num_scalar_prefetch=0,
            grid=(1,),
            in_specs=[
                pl.BlockSpec((NCORES * g_pad, CAT_DIM), const),   # partial sums
                pl.BlockSpec((NCORES * g_pad, 1), const),         # partial counts
                pl.BlockSpec((CAT_DIM, FC1_OUT), const),          # w1
                pl.BlockSpec((1, FC1_OUT), const),                # b1
                pl.BlockSpec((FC1_OUT, FC2_OUT), const),          # w2
                pl.BlockSpec((1, FC2_OUT), const),                # b2
                pl.BlockSpec((FC2_OUT, FC3_PAD), const),          # w3 (lane-padded)
                pl.BlockSpec((1, FC3_PAD), const),                # b3 (lane-padded)
            ],
            out_specs=pl.BlockSpec((g_pad, FC3_PAD), const),
        ),
        compiler_params=pltpu.CompilerParams(
            dimension_semantics=("arbitrary",),
        ),
    )(psum, pcnt, w1b, b1, w2b, b2, w3b, b3p)

    return out_pad[:num_graphs, :FC3_OUT]


def init_linear(key, fan_in, fan_out):
    """Deterministic init mirroring nn.Linear's uniform(-1/sqrt(in), 1/sqrt(in))."""
    kw, kb = jax.random.split(key)
    bound = 1.0 / jnp.sqrt(jnp.float32(fan_in))
    w = jax.random.uniform(kw, (fan_in, fan_out), jnp.float32, -bound, bound)
    b = jax.random.uniform(kb, (1, fan_out), jnp.float32, -bound, bound)
    return w, b


def gnn_node_stub(x, edge_index, key):
    """Deterministic stand-in for GNN_node (JK='multilayer').

    # TODO(synk): real GAT message passing (GNN_node) is external to the provided
    # module source and is not reproduced here.
    Emits the concatenated (N, 600) embedding directly in bf16 so the dominant h
    stream enters the pooling kernel with no wrapper-side pad/cast pass.
    """
    del edge_index
    h_list = []
    h = x
    for i in range(NUM_REPS):
        k = jax.random.fold_in(key, i)
        w, b = init_linear(k, h.shape[1], EMB_DIM)
        h = jnp.maximum(h @ w + b, 0.0)
        h_list.append(h)
    return jnp.concatenate(h_list, axis=1).astype(jnp.bfloat16)


if __name__ == "__main__":
    key = jax.random.PRNGKey(0)
    k_x, k_gnn, k1, k2, k3 = jax.random.split(key, 5)

    # Small synthetic graph batch: 1000 nodes across 4 graphs.
    n_nodes, n_graphs, n_edges = 1000, 4, 2000
    sizes = (300, 250, 280, 170)
    assert sum(sizes) == n_nodes
    x = jax.random.normal(k_x, (n_nodes, EMB_DIM), jnp.float32)
    edge_index = jax.random.randint(k_gnn, (2, n_edges), 0, n_nodes)   # unused by stub
    batch = jnp.concatenate([jnp.full((s,), g, jnp.int32) for g, s in enumerate(sizes)])

    # Plain-JAX glue: multilayer node embeddings, already concatenated, in bf16.
    h_cat = gnn_node_stub(x, edge_index, k_gnn)                        # (N, 600) bf16

    # MLP parameters (deterministic).
    w1, b1 = init_linear(k1, CAT_DIM, FC1_OUT)
    w2, b2 = init_linear(k2, FC1_OUT, FC2_OUT)
    w3, b3 = init_linear(k3, FC2_OUT, FC3_OUT)
    params = (w1, b1, w2, b2, w3, b3)

    # Reference mirroring the kernel arithmetic: exact f32 segment mean of the bf16
    # embeddings, bf16 matmul operands with f32 accumulation.
    h_f32 = h_cat.astype(jnp.float32)
    seg_sum = jax.ops.segment_sum(h_f32, batch, num_segments=n_graphs)
    seg_cnt = jax.ops.segment_sum(jnp.ones((n_nodes,), jnp.float32), batch,
                                  num_segments=n_graphs)
    pooled = seg_sum / jnp.maximum(seg_cnt[:, None], 1.0)
    r = jnp.dot(pooled.astype(jnp.bfloat16), w1.astype(jnp.bfloat16),
                preferred_element_type=jnp.float32) + b1
    r = jnp.maximum(r, 0.0)
    r = jnp.dot(r.astype(jnp.bfloat16), w2.astype(jnp.bfloat16),
                preferred_element_type=jnp.float32) + b2
    r = jnp.maximum(r, 0.0)
    ref = jnp.dot(r.astype(jnp.bfloat16), w3.astype(jnp.bfloat16),
                  preferred_element_type=jnp.float32) + b3

    # 1) Default (large-tile) configuration.
    out = drug_mlp_forward(h_cat, batch, params, num_graphs=n_graphs)
    out = jax.block_until_ready(out)
    assert out.shape == (n_graphs, FC3_OUT)
    assert jnp.allclose(out, ref, atol=1e-2, rtol=1e-2), float(jnp.max(jnp.abs(out - ref)))

    # 2) Coverage check of the multi-tile / partial-tile / phantom-step reduction path
    #    (small node_tile only to exercise the loop; not a performance setting).
    out2 = drug_mlp_forward(h_cat, batch, params, num_graphs=n_graphs, node_tile=384)
    out2 = jax.block_until_ready(out2)
    assert jnp.allclose(out2, ref, atol=1e-2, rtol=1e-2), float(jnp.max(jnp.abs(out2 - ref)))

    print("KERNEL_OK")
</pallas_src>

<mosaic_0001>
module attributes {stable_mosaic.version = 11 : i64} {
  func.func @_pool_kernel(%arg0: i32, %arg1: i32, %arg2: memref<1x1024xi32, #tpu.memory_space<vmem>>, %arg3: memref<1024x600xbf16, #tpu.memory_space<vmem>>, %arg4: memref<8x600xf32, #tpu.memory_space<vmem>>, %arg5: memref<8x1xf32, #tpu.memory_space<vmem>>) attributes {dimension_semantics = [#tpu.dimension_semantics<parallel>, #tpu.dimension_semantics<arbitrary>], iteration_bounds = array<i64: 2, 1>, scalar_prefetch = 0 : i64, scratch_operands = 0 : i64, tpu.core_type = #tpu.core_type<tc>, window_params = [{pipeline_mode = #tpu.pipeline_mode<double_buffered>, transform_indices = @transform_0, window_bounds = array<i64: 1, 1024>}, {pipeline_mode = #tpu.pipeline_mode<double_buffered>, transform_indices = @transform_1, window_bounds = array<i64: 1024, 600>}, {transform_indices = @transform_2, window_bounds = array<i64: 8, 600>}, {transform_indices = @transform_3, window_bounds = array<i64: 8, 1>}]} {
    %c0_i32 = arith.constant 0 : i32
    %0 = arith.cmpi eq, %arg1, %c0_i32 : i32
    %1 = arith.extui %0 : i1 to i32
    %c0_i32_0 = arith.constant 0 : i32
    %2 = arith.cmpi ne, %1, %c0_i32_0 : i32
    scf.if %2 {
      %cst_16 = arith.constant 0.000000e+00 : f32
      %40 = vector.broadcast %cst_16 : f32 to vector<8x600xf32>
      %c0_17 = arith.constant 0 : index
      %c0_18 = arith.constant 0 : index
      %41 = vector.load %arg4[%c0_17, %c0_18] : memref<8x600xf32, #tpu.memory_space<vmem>>, vector<8x600xf32>
      tpu.vector_store %arg4[%c0_17, %c0_18], %40 {strides = array<i32>} : memref<8x600xf32, #tpu.memory_space<vmem>>, vector<8x600xf32>,
      %cst_19 = arith.constant 0.000000e+00 : f32
      %42 = vector.broadcast %cst_19 : f32 to vector<8x1xf32>
      %c0_20 = arith.constant 0 : index
      %c0_21 = arith.constant 0 : index
      %43 = vector.load %arg5[%c0_20, %c0_21] : memref<8x1xf32, #tpu.memory_space<vmem>>, vector<8x1xf32>
      tpu.vector_store %arg5[%c0_20, %c0_21], %42 {strides = array<i32>} : memref<8x1xf32, #tpu.memory_space<vmem>>, vector<8x1xf32>,
    } else {
    }
    %c1_i32 = arith.constant 1 : i32
    %3 = arith.muli %arg0, %c1_i32 : i32
    %4 = arith.addi %3, %arg1 : i32
    %c1024_i32 = arith.constant 1024 : i32
    %5 = arith.muli %4, %c1024_i32 : i32
    %c0 = arith.constant 0 : index
    %c0_1 = arith.constant 0 : index
    %6 = vector.load %arg3[%c0, %c0_1] : memref<1024x600xbf16, #tpu.memory_space<vmem>>, vector<1024x600xbf16>
    %c0_2 = arith.constant 0 : index
    %c0_3 = arith.constant 0 : index
    %7 = vector.load %arg2[%c0_2, %c0_3] : memref<1x1024xi32, #tpu.memory_space<vmem>>, vector<1x1024xi32>
    %8 = tpu.iota {dimensions = array<i32: 0>} : vector<8x1024xi32>
    %9 = vector.broadcast %7 : vector<1x1024xi32> to vector<8x1024xi32>
    %10 = arith.cmpi eq, %8, %9 : vector<8x1024xi32>
    %11 = tpu.iota {dimensions = array<i32: 1>} : vector<1x1024xi32>
    %12 = vector.broadcast %5 : i32 to vector<1x1024xi32>
    %13 = arith.addi %12, %11 : vector<1x1024xi32>
    %c1000_i32 = arith.constant 1000 : i32
    %14 = vector.broadcast %c1000_i32 : i32 to vector<1x1024xi32>
    %15 = arith.cmpi slt, %13, %14 : vector<1x1024xi32>
    %16 = vector.broadcast %15 : vector<1x1024xi1> to vector<8x1024xi1>
    %17 = arith.andi %10, %16 : vector<8x1024xi1>
    %18 = tpu.iota {dimensions = array<i32: 0>} : vector<1024x1xi32>
    %19 = vector.broadcast %5 : i32 to vector<1024x1xi32>
    %20 = arith.addi %19, %18 : vector<1024x1xi32>
    %c1000_i32_4 = arith.constant 1000 : i32
    %21 = vector.broadcast %c1000_i32_4 : i32 to vector<1024x1xi32>
    %22 = arith.cmpi slt, %20, %21 : vector<1024x1xi32>
    %c0_i32_5 = arith.constant 0 : i32
    %23 = arith.sitofp %c0_i32_5 : i32 to bf16
    %24 = vector.shape_cast %22 : vector<1024x1xi1> to vector<1024x1xi1>
    %25 = vector.broadcast %24 : vector<1024x1xi1> to vector<1024x600xi1>
    %26 = vector.broadcast %23 : bf16 to vector<1024x600xbf16>
    %27 = arith.select %25, %6, %26 : vector<1024x600xi1>, vector<1024x600xbf16>
    %28 = arith.extui %17 : vector<8x1024xi1> to vector<8x1024xi32>
    %29 = arith.sitofp %28 : vector<8x1024xi32> to vector<8x1024xf32>
    %30 = arith.truncf %29 : vector<8x1024xf32> to vector<8x1024xbf16>
    %cst = arith.constant 1.000000e+00 : bf16
    %31 = vector.broadcast %cst : bf16 to vector<1024x1xbf16>
    %c0_6 = arith.constant 0 : index
    %c0_7 = arith.constant 0 : index
    %32 = vector.load %arg5[%c0_6, %c0_7] : memref<8x1xf32, #tpu.memory_space<vmem>>, vector<8x1xf32>
    %cst_8 = arith.constant dense<0.000000e+00> : vector<8x1xf32>
    %33 = tpu.matmul %30, %31, %cst_8 {dimension_numbers = #tpu.dot_dimension_numbers<[1], [0], [0], [1], [0, 0, 1, 1], [], []>} : vector<8x1024xbf16>, vector<1024x1xbf16>, vector<8x1xf32> -> vector<8x1xf32>
    %34 = arith.addf %32, %33 : vector<8x1xf32>
    %c0_9 = arith.constant 0 : index
    %c0_10 = arith.constant 0 : index
    %35 = vector.load %arg5[%c0_9, %c0_10] : memref<8x1xf32, #tpu.memory_space<vmem>>, vector<8x1xf32>
    tpu.vector_store %arg5[%c0_9, %c0_10], %34 {strides = array<i32>} : memref<8x1xf32, #tpu.memory_space<vmem>>, vector<8x1xf32>,
    %c0_11 = arith.constant 0 : index
    %c0_12 = arith.constant 0 : index
    %36 = vector.load %arg4[%c0_11, %c0_12] : memref<8x600xf32, #tpu.memory_space<vmem>>, vector<8x600xf32>
    %cst_13 = arith.constant dense<0.000000e+00> : vector<8x600xf32>
    %37 = tpu.matmul %30, %27, %cst_13 {dimension_numbers = #tpu.dot_dimension_numbers<[1], [0], [0], [1], [0, 0, 1, 1], [], []>} : vector<8x1024xbf16>, vector<1024x600xbf16>, vector<8x600xf32> -> vector<8x600xf32>
    %38 = arith.addf %36, %37 : vector<8x600xf32>
    %c0_14 = arith.constant 0 : index
    %c0_15 = arith.constant 0 : index
    %39 = vector.load %arg4[%c0_14, %c0_15] : memref<8x600xf32, #tpu.memory_space<vmem>>, vector<8x600xf32>
    tpu.vector_store %arg4[%c0_14, %c0_15], %38 {strides = array<i32>} : memref<8x600xf32, #tpu.memory_space<vmem>>, vector<8x600xf32>,
    return
  }
  func.func @transform_0(%arg0: i32, %arg1: i32) -> (i32, i32) {
    %c1_i32 = arith.constant 1 : i32
    %0 = arith.muli %arg0, %c1_i32 : i32
    %1 = arith.addi %0, %arg1 : i32
    %c0_i32 = arith.constant 0 : i32
    %2 = arith.minsi %1, %c0_i32 : i32
    %c0_i32_0 = arith.constant 0 : i32
    %c0_i32_1 = arith.constant 0 : i32
    return %c0_i32_0, %2 : i32, i32
  }
  func.func @transform_1(%arg0: i32, %arg1: i32) -> (i32, i32) {
    %c1_i32 = arith.constant 1 : i32
    %0 = arith.muli %arg0, %c1_i32 : i32
    %1 = arith.addi %0, %arg1 : i32
    %c0_i32 = arith.constant 0 : i32
    %2 = arith.minsi %1, %c0_i32 : i32
    %c0_i32_0 = arith.constant 0 : i32
    %c0_i32_1 = arith.constant 0 : i32
    return %2, %c0_i32_0 : i32, i32
  }
  func.func @transform_2(%arg0: i32, %arg1: i32) -> (i32, i32) {
    %c0_i32 = arith.constant 0 : i32
    %c0_i32_0 = arith.constant 0 : i32
    return %arg0, %c0_i32 : i32, i32
  }
  func.func @transform_3(%arg0: i32, %arg1: i32) -> (i32, i32) {
    %c0_i32 = arith.constant 0 : i32
    %c0_i32_0 = arith.constant 0 : i32
    return %arg0, %c0_i32 : i32, i32
  }
}

module attributes {stable_mosaic.version = 11 : i64} {
  func.func @_finalize_kernel(%arg0: i32, %arg1: memref<16x600xf32, #tpu.memory_space<vmem>>, %arg2: memref<16x1xf32, #tpu.memory_space<vmem>>, %arg3: memref<600x300xbf16, #tpu.memory_space<vmem>>, %arg4: memref<1x300xf32, #tpu.memory_space<vmem>>, %arg5: memref<300x200xbf16, #tpu.memory_space<vmem>>, %arg6: memref<1x200xf32, #tpu.memory_space<vmem>>, %arg7: memref<200x128xbf16, #tpu.memory_space<vmem>>, %arg8: memref<1x128xf32, #tpu.memory_space<vmem>>, %arg9: memref<8x128xf32, #tpu.memory_space<vmem>>) attributes {dimension_semantics = [#tpu.dimension_semantics<arbitrary>], iteration_bounds = array<i64: 1>, scalar_prefetch = 0 : i64, scratch_operands = 0 : i64, tpu.core_type = #tpu.core_type<tc>, window_params = [{pipeline_mode = #tpu.pipeline_mode<synchronous>, transform_indices = @transform_0, window_bounds = array<i64: 16, 600>}, {pipeline_mode = #tpu.pipeline_mode<synchronous>, transform_indices = @transform_1, window_bounds = array<i64: 16, 1>}, {pipeline_mode = #tpu.pipeline_mode<synchronous>, transform_indices = @transform_2, window_bounds = array<i64: 600, 300>}, {pipeline_mode = #tpu.pipeline_mode<synchronous>, transform_indices = @transform_3, window_bounds = array<i64: 1, 300>}, {pipeline_mode = #tpu.pipeline_mode<synchronous>, transform_indices = @transform_4, window_bounds = array<i64: 300, 200>}, {pipeline_mode = #tpu.pipeline_mode<synchronous>, transform_indices = @transform_5, window_bounds = array<i64: 1, 200>}, {pipeline_mode = #tpu.pipeline_mode<synchronous>, transform_indices = @transform_6, window_bounds = array<i64: 200, 128>}, {pipeline_mode = #tpu.pipeline_mode<synchronous>, transform_indices = @transform_7, window_bounds = array<i64: 1, 128>}, {pipeline_mode = #tpu.pipeline_mode<synchronous>, transform_indices = @transform_8, window_bounds = array<i64: 8, 128>}]} {
    %c0 = arith.constant 0 : index
    %c0_0 = arith.constant 0 : index
    %0 = vector.load %arg1[%c0, %c0_0] : memref<16x600xf32, #tpu.memory_space<vmem>>, vector<8x600xf32>
    %c0_1 = arith.constant 0 : index
    %c0_2 = arith.constant 0 : index
    %1 = vector.load %arg2[%c0_1, %c0_2] : memref<16x1xf32, #tpu.memory_space<vmem>>, vector<8x1xf32>
    %c8 = arith.constant 8 : index
    %c0_3 = arith.constant 0 : index
    %2 = vector.load %arg1[%c8, %c0_3] : memref<16x600xf32, #tpu.memory_space<vmem>>, vector<8x600xf32>
    %3 = arith.addf %0, %2 : vector<8x600xf32>
    %c8_4 = arith.constant 8 : index
    %c0_5 = arith.constant 0 : index
    %4 = vector.load %arg2[%c8_4, %c0_5] : memref<16x1xf32, #tpu.memory_space<vmem>>, vector<8x1xf32>
    %5 = arith.addf %1, %4 : vector<8x1xf32>
    %cst = arith.constant 1.000000e+00 : f32
    %6 = vector.broadcast %cst : f32 to vector<8x1xf32>
    %7 = arith.maximumf %5, %6 : vector<8x1xf32>
    %8 = vector.broadcast %7 : vector<8x1xf32> to vector<8x600xf32>
    %9 = arith.divf %3, %8 : vector<8x600xf32>
    %10 = arith.truncf %9 : vector<8x600xf32> to vector<8x600xbf16>
    %c0_6 = arith.constant 0 : index
    %c0_7 = arith.constant 0 : index
    %11 = vector.load %arg3[%c0_6, %c0_7] : memref<600x300xbf16, #tpu.memory_space<vmem>>, vector<600x300xbf16>
    %cst_8 = arith.constant dense<0.000000e+00> : vector<8x300xf32>
    %12 = tpu.matmul %10, %11, %cst_8 {dimension_numbers = #tpu.dot_dimension_numbers<[1], [0], [0], [1], [0, 0, 1, 1], [], []>} : vector<8x600xbf16>, vector<600x300xbf16>, vector<8x300xf32> -> vector<8x300xf32>
    %c0_9 = arith.constant 0 : index
    %c0_10 = arith.constant 0 : index
    %13 = vector.load %arg4[%c0_9, %c0_10] : memref<1x300xf32, #tpu.memory_space<vmem>>, vector<1x300xf32>
    %14 = vector.broadcast %13 : vector<1x300xf32> to vector<8x300xf32>
    %15 = arith.addf %12, %14 : vector<8x300xf32>
    %cst_11 = arith.constant 0.000000e+00 : f32
    %16 = vector.broadcast %cst_11 : f32 to vector<8x300xf32>
    %17 = arith.maximumf %15, %16 : vector<8x300xf32>
    %18 = arith.truncf %17 : vector<8x300xf32> to vector<8x300xbf16>
    %c0_12 = arith.constant 0 : index
    %c0_13 = arith.constant 0 : index
    %19 = vector.load %arg5[%c0_12, %c0_13] : memref<300x200xbf16, #tpu.memory_space<vmem>>, vector<300x200xbf16>
    %cst_14 = arith.constant dense<0.000000e+00> : vector<8x200xf32>
    %20 = tpu.matmul %18, %19, %cst_14 {dimension_numbers = #tpu.dot_dimension_numbers<[1], [0], [0], [1], [0, 0, 1, 1], [], []>} : vector<8x300xbf16>, vector<300x200xbf16>, vector<8x200xf32> -> vector<8x200xf32>
    %c0_15 = arith.constant 0 : index
    %c0_16 = arith.constant 0 : index
    %21 = vector.load %arg6[%c0_15, %c0_16] : memref<1x200xf32, #tpu.memory_space<vmem>>, vector<1x200xf32>
    %22 = vector.broadcast %21 : vector<1x200xf32> to vector<8x200xf32>
    %23 = arith.addf %20, %22 : vector<8x200xf32>
    %cst_17 = arith.constant 0.000000e+00 : f32
    %24 = vector.broadcast %cst_17 : f32 to vector<8x200xf32>
    %25 = arith.maximumf %23, %24 : vector<8x200xf32>
    %26 = arith.truncf %25 : vector<8x200xf32> to vector<8x200xbf16>
    %c0_18 = arith.constant 0 : index
    %c0_19 = arith.constant 0 : index
    %27 = vector.load %arg7[%c0_18, %c0_19] : memref<200x128xbf16, #tpu.memory_space<vmem>>, vector<200x128xbf16>
    %cst_20 = arith.constant dense<0.000000e+00> : vector<8x128xf32>
    %28 = tpu.matmul %26, %27, %cst_20 {dimension_numbers = #tpu.dot_dimension_numbers<[1], [0], [0], [1], [0, 0, 1, 1], [], []>} : vector<8x200xbf16>, vector<200x128xbf16>, vector<8x128xf32> -> vector<8x128xf32>
    %c0_21 = arith.constant 0 : index
    %c0_22 = arith.constant 0 : index
    %29 = vector.load %arg8[%c0_21, %c0_22] : memref<1x128xf32, #tpu.memory_space<vmem>>, vector<1x128xf32>
    %30 = vector.broadcast %29 : vector<1x128xf32> to vector<8x128xf32>
    %31 = arith.addf %28, %30 : vector<8x128xf32>
    %c0_23 = arith.constant 0 : index
    %c0_24 = arith.constant 0 : index
    %32 = vector.load %arg9[%c0_23, %c0_24] : memref<8x128xf32, #tpu.memory_space<vmem>>, vector<8x128xf32>
    tpu.vector_store %arg9[%c0_23, %c0_24], %31 {strides = array<i32>} : memref<8x128xf32, #tpu.memory_space<vmem>>, vector<8x128xf32>,
    return
  }
  func.func @transform_0(%arg0: i32) -> (i32, i32) {
    %c0_i32 = arith.constant 0 : i32
    %c0_i32_0 = arith.constant 0 : i32
    %c0_i32_1 = arith.constant 0 : i32
    return %c0_i32, %c0_i32_0 : i32, i32
  }
  func.func @transform_1(%arg0: i32) -> (i32, i32) {
    %c0_i32 = arith.constant 0 : i32
    %c0_i32_0 = arith.constant 0 : i32
    %c0_i32_1 = arith.constant 0 : i32
    return %c0_i32, %c0_i32_0 : i32, i32
  }
  func.func @transform_2(%arg0: i32) -> (i32, i32) {
    %c0_i32 = arith.constant 0 : i32
    %c0_i32_0 = arith.constant 0 : i32
    %c0_i32_1 = arith.constant 0 : i32
    return %c0_i32, %c0_i32_0 : i32, i32
  }
  func.func @transform_3(%arg0: i32) -> (i32, i32) {
    %c0_i32 = arith.constant 0 : i32
    %c0_i32_0 = arith.constant 0 : i32
    %c0_i32_1 = arith.constant 0 : i32
    return %c0_i32, %c0_i32_0 : i32, i32
  }
  func.func @transform_4(%arg0: i32) -> (i32, i32) {
    %c0_i32 = arith.constant 0 : i32
    %c0_i32_0 = arith.constant 0 : i32
    %c0_i32_1 = arith.constant 0 : i32
    return %c0_i32, %c0_i32_0 : i32, i32
  }
  func.func @transform_5(%arg0: i32) -> (i32, i32) {
    %c0_i32 = arith.constant 0 : i32
    %c0_i32_0 = arith.constant 0 : i32
    %c0_i32_1 = arith.constant 0 : i32
    return %c0_i32, %c0_i32_0 : i32, i32
  }
  func.func @transform_6(%arg0: i32) -> (i32, i32) {
    %c0_i32 = arith.constant 0 : i32
    %c0_i32_0 = arith.constant 0 : i32
    %c0_i32_1 = arith.constant 0 : i32
    return %c0_i32, %c0_i32_0 : i32, i32
  }
  func.func @transform_7(%arg0: i32) -> (i32, i32) {
    %c0_i32 = arith.constant 0 : i32
    %c0_i32_0 = arith.constant 0 : i32
    %c0_i32_1 = arith.constant 0 : i32
    return %c0_i32, %c0_i32_0 : i32, i32
  }
  func.func @transform_8(%arg0: i32) -> (i32, i32) {
    %c0_i32 = arith.constant 0 : i32
    %c0_i32_0 = arith.constant 0 : i32
    %c0_i32_1 = arith.constant 0 : i32
    return %c0_i32, %c0_i32_0 : i32, i32
  }
}

</mosaic_0001>

<bundles_post_ra>
// kernel: drug_mlp_forward.3
= control target key start
LH: loop header
LB: loop body
LE: loop exit
PB: predicated region body
PF: predicated region fallthrough
CT: control target
= control target key end

     0   :  { %v2069_v0 = vmov 0   ;;  %vm836_vm0 = vcmask 1043456   ;;  %vm832_vm1 = vcmask 719872   ;;  %vm2071_vm2 = vmmov 0   ;;  %s2695_s1 = inlined_call_operand.vmem [shape: f32[16,1], index: 1, kind: input, shape index: {}]   ;;  %s2696_s2 = inlined_call_operand.vmem [shape: bf16[600,300], index: 2, kind: input, shape index: {}]   ;;  %s2697_s0 = inlined_call_operand.vmem [shape: f32[16,600], index: 0, kind: input, shape index: {}]   ;;  %s2698_s4 = inlined_call_operand.vmem [shape: bf16[300,200], index: 4, kind: input, shape index: {}]   ;;  %s2699_s6 = inlined_call_operand.vmem [shape: bf16[200,128], index: 6, kind: input, shape index: {}]   ;;  %s2700_s3 = inlined_call_operand.vmem [shape: f32[1,300], index: 3, kind: input, shape index: {}]   ;;  %s2701_s5 = inlined_call_operand.vmem [shape: f32[1,200], index: 5, kind: input, shape index: {}]   ;;  %s2702_s7 = inlined_call_operand.vmem [shape: f32[1,128], index: 7, kind: input, shape index: {}]   ;;  %s2703_s8 = inlined_call_operand.vmem [shape: f32[8,128], index: 8, kind: output, shape index: {}]  }
   0x1   :  { %1845 = vset.pattern.permute.xlu0 %v2069_v0  ;;  %v35_v1 = vld [vmem:[%s2695_s1] sm:$0xff]  ;;  %v46_v2 = vld [vmem:[%s2695_s1 + $0x8] sm:$0xff]  ;;  %960 = vmatprep.mubr.bf16.mxu1 %v2069_v0  ;;  %v1854_v10 = vld [vmem:[%s2696_s2 + $0x30] ss:$12 sps:$4 sm:$0xff]   ;;  %vm1337_vm3 = vcmask 1045504   ;;  %vm1333_vm4 = vcmask 359424  }
   0x2   :  { %v47_v3 = vadd.f32 %v46_v2, %v35_v1  ;;  %v1846_v4 = vld [vmem:[%s2696_s2 + $0x4] ss:$12 sps:$4 sm:$0xff]   ;;  %v1848_v5 = vld [vmem:[%s2696_s2] ss:$12 sps:$4 sm:$0xff]   ;;  %v1849_v6 = vld [vmem:[%s2696_s2 + $0x1c] ss:$12 sps:$4 sm:$0xff]  }
   0x3   :  { %846 = vmatprep.subr.bf16.mxu0 %v1846_v4  ;;  %v1851_v8 = vld [vmem:[%s2696_s2 + $0x18] ss:$12 sps:$4 sm:$0xff]   ;;  %v1852_v9 = vld [vmem:[%s2696_s2 + $0x34] ss:$12 sps:$4 sm:$0xff]   ;;  %v1861_v16 = vld [vmem:[%s2696_s2 + $0x7c] ss:$12 sps:$4 sm:$0xff]  }
   0x4   :  { %v48_v7 = vmax.f32 %v47_v3, 1.0  ;;  %847 = vmatpush1.bf16.msra.mxu0 %v1848_v5  ;;  %v1855_v11 = vld [vmem:[%s2696_s2 + $0x4c] ss:$12 sps:$4 sm:$0xff]   ;;  %v1857_v12 = vld [vmem:[%s2696_s2 + $0x48] ss:$12 sps:$4 sm:$0xff]   ;;  %v34_v56 = vld [vmem:[%s2697_s0 + $0x20] sm:$0xff] }
   0x5   :  { %848 = vmatprep.subr.bf16.mxu0 %v1849_v6  ;;  %v1858_v13 = vld [vmem:[%s2696_s2 + $0x64] ss:$12 sps:$4 sm:$0xff]   ;;  %v1860_v15 = vld [vmem:[%s2696_s2 + $0x60] ss:$12 sps:$4 sm:$0xff]   ;;  %v1882_v18 = vld [vmem:[%s2696_s2 + $0x31c] ss:$12 sps:$4 sm:$0xff]  }
   0x6   :  { %51 = vperm.xlu0 %1845, %v48_v7   ;;  %v1876_v14 = vld [vmem:[%s2696_s2 + $0x304] ss:$12 sps:$4 sm:$0xff]   ;;  %v1880_v17 = vld [vmem:[%s2696_s2 + $0x300] ss:$12 sps:$4 sm:$0xff]   ;;  %v1898_v27 = vld [vmem:[%s2696_s2 + $0x348] ss:$12 sps:$4 sm:$0xff]  }
   0x7   :  { %928 = vmatprep.subr.bf16.mxu1 %v1876_v14  ;;  %v1886_v19 = vld [vmem:[%s2696_s2 + $0x318] ss:$12 sps:$4 sm:$0xff]   ;;  %v1888_v21 = vld [vmem:[%s2696_s2 + $0x334] ss:$12 sps:$4 sm:$0xff]   ;;  %v1892_v23 = vld [vmem:[%s2696_s2 + $0x330] ss:$12 sps:$4 sm:$0xff]  }
   0x8   :  { %849 = vmatpush1.bf16.msra.mxu0 %v1851_v8  ;;  %929 = vmatpush1.bf16.msra.mxu1 %v1880_v17  ;;  %v1863_v20 = vld [vmem:[%s2696_s2 + $0x78] ss:$12 sps:$4 sm:$0xff]   ;;  %v1864_v22 = vld [vmem:[%s2696_s2 + $0x94] ss:$12 sps:$4 sm:$0xff]   ;;  %v1866_v25 = vld [vmem:[%s2696_s2 + $0x90] ss:$12 sps:$4 sm:$0xff]  }
   0x9   :  { %850 = vmatprep.subr.bf16.mxu0 %v1852_v9  ;;  %930 = vmatprep.subr.bf16.mxu1 %v1882_v18  ;;  %v1894_v24 = vld [vmem:[%s2696_s2 + $0x34c] ss:$12 sps:$4 sm:$0xff]   ;;  %v1900_v28 = vld [vmem:[%s2696_s2 + $0x364] ss:$12 sps:$4 sm:$0xff]   ;;  %v1869_v29 = vld [vmem:[%s2696_s2 + $0xa8] ss:$12 sps:$4 sm:$0xff]  }
   0xa   :  { %v1867_v26 = vld [vmem:[%s2696_s2 + $0xac] ss:$12 sps:$4 sm:$0xff]   ;;  %v1870_v31 = vld [vmem:[%s2696_s2 + $0xc4] ss:$12 sps:$4 sm:$0xff]   ;;  %v1873_v36 = vld [vmem:[%s2696_s2 + $0xdc] ss:$12 sps:$4 sm:$0xff]  }
   0xb   :  { %v213_v30 = vld [vmem:[%s2696_s2 + $0x378] sm:$0xff]  ;;  %v1904_v32 = vld [vmem:[%s2696_s2 + $0x360] ss:$12 sps:$4 sm:$0xff]   ;;  %v1911_v37 = vld [vmem:[%s2696_s2 + $0xc8] ss:$12 sps:$4 sm:$0xff]   ;;  %vm1537_vm5 = vcmask 588800  }
   0xc   :  { %851 = vmatpush1.bf16.msra.mxu0 %v1854_v10  ;;  %931 = vmatpush1.bf16.msra.mxu1 %v1886_v19  ;;  %v1701_v33 = vcombine.high %v213_v30, %v213_v30  ;;  %v1700_v34 = vcombine.low %v213_v30, %v213_v30  ;;  %v1872_v35 = vld [vmem:[%s2696_s2 + $0xc0] ss:$12 sps:$4 sm:$0xff]   ;;  %v1875_v39 = vld [vmem:[%s2696_s2 + $0xd8] ss:$12 sps:$4 sm:$0xff]   ;;  %v1881_v41 = vld [vmem:[%s2696_s2 + $0xf0] ss:$12 sps:$4 sm:$0xff]  }
   0xd   :  { %852 = vmatprep.subr.bf16.mxu0 %v1855_v11  ;;  %932 = vmatprep.subr.bf16.mxu1 %v1888_v21  ;;  %v1878_v40 = vld [vmem:[%s2696_s2 + $0xf4] ss:$12 sps:$4 sm:$0xff]   ;;  %v1884_v42 = vld [vmem:[%s2696_s2 + $0x10c] ss:$12 sps:$4 sm:$0xff]   ;;  %v1890_v44 = vld [vmem:[%s2696_s2 + $0x124] ss:$12 sps:$4 sm:$0xff]  }
   0xe   :  { %v838_v38 = vsel %vm836_vm0, %v1700_v34, 0  ;;  %v1887_v43 = vld [vmem:[%s2696_s2 + $0x108] ss:$12 sps:$4 sm:$0xff]   ;;  %v1893_v45 = vld [vmem:[%s2696_s2 + $0x120] ss:$12 sps:$4 sm:$0xff]   ;;  %v33_v60 = vld [vmem:[%s2697_s0 + $0x18] sm:$0xff] }
   0xf   :  { %v1896_v46 = vld [vmem:[%s2696_s2 + $0x13c] ss:$12 sps:$4 sm:$0xff]   ;;  %v1899_v47 = vld [vmem:[%s2696_s2 + $0x138] ss:$12 sps:$4 sm:$0xff]   ;;  %v1902_v48 = vld [vmem:[%s2696_s2 + $0x154] ss:$12 sps:$4 sm:$0xff]  }
  0x10   :  { %853 = vmatpush1.bf16.msra.mxu0 %v1857_v12  ;;  %933 = vmatpush1.bf16.msra.mxu1 %v1892_v23  ;;  %v1905_v49 = vld [vmem:[%s2696_s2 + $0x150] ss:$12 sps:$4 sm:$0xff]   ;;  %v1907_v50 = vld [vmem:[%s2696_s2 + $0x16c] ss:$12 sps:$4 sm:$0xff]   ;;  %v1910_v51 = vld [vmem:[%s2696_s2 + $0x168] ss:$12 sps:$4 sm:$0xff]  }
  0x11   :  { %854 = vmatprep.subr.bf16.mxu0 %v1858_v13  ;;  %934 = vmatprep.subr.bf16.mxu1 %v1894_v24  ;;  %v1914_v52 = vld [vmem:[%s2696_s2 + $0x184] ss:$12 sps:$4 sm:$0xff]   ;;  %v31_v54 = vld [vmem:[%s2697_s0 + $0x8] sm:$0xff]  ;;  %v38_v63 = vld [vmem:[%s2697_s0 + $0x38] sm:$0xff] }
  0x12   :  { %v37_v55 = vld [vmem:[%s2697_s0 + $0x30] sm:$0xff]  ;;  %v40_v57 = vld [vmem:[%s2697_s0 + $0x48] sm:$0xff]  ;;  %v30_v58 = vld [vmem:[%s2697_s0] sm:$0xff] }
  0x13   :  { %v36_v59 = vld [vmem:[%s2697_s0 + $0x28] sm:$0xff]  ;;  %v39_v61 = vld [vmem:[%s2697_s0 + $0x40] sm:$0xff]  ;;  %v32_v62 = vld [vmem:[%s2697_s0 + $0x10] sm:$0xff]  ;;  %v42_v1 = vadd.f32 %v37_v55, %v31_v54  ;;  %v45_v2 = vadd.f32 %v40_v57, %v34_v56 }
  0x14   :  { %855 = vmatpush1.bf16.msra.mxu0 %v1860_v15  ;;  %935 = vmatpush1.bf16.msra.mxu1 %v1898_v27  ;;  %v41_v3 = vadd.f32 %v36_v59, %v30_v58  ;;  %v44_v4 = vadd.f32 %v39_v61, %v33_v60  ;;  %v43_v5 = vadd.f32 %v38_v63, %v32_v62  ;;  %v1915_v10 = vld [vmem:[%s2696_s2 + $0x8] ss:$12 sps:$4 sm:$0xff]   ;;  %v1912_v14 = vld [vmem:[%s2696_s2 + $0x180] ss:$12 sps:$4 sm:$0xff]   ;;  %v1917_v21 = vld [vmem:[%s2696_s2 + $0x198] ss:$12 sps:$4 sm:$0xff]  }
  0x15   :  { %856 = vmatprep.subr.bf16.mxu0 %v1861_v16  ;;  %936 = vmatprep.subr.bf16.mxu1 %v1900_v28  ;;  %v1916_v17 = vld [vmem:[%s2696_s2 + $0xe0] ss:$12 sps:$4 sm:$0xff]   ;;  %v1919_v18 = vld [vmem:[%s2696_s2 + $0x19c] ss:$12 sps:$4 sm:$0xff]   ;;  %v1925_v24 = vld [vmem:[%s2696_s2 + $0x38] ss:$12 sps:$4 sm:$0xff]  }
  0x16   :  { %v1924_v23 = vld [vmem:[%s2696_s2 + $0x1b4] ss:$12 sps:$4 sm:$0xff]   ;;  %v1929_v27 = vld [vmem:[%s2696_s2 + $0x1cc] ss:$12 sps:$4 sm:$0xff]   ;;  %v1930_v28 = vld [vmem:[%s2696_s2 + $0x50] ss:$12 sps:$4 sm:$0xff]  }
  0x17   :  { %v1931_v30 = vld [vmem:[%s2696_s2 + $0x128] ss:$12 sps:$4 sm:$0xff]   ;;  %v1936_v34 = vld [vmem:[%s2696_s2 + $0x140] ss:$12 sps:$4 sm:$0xff]   ;;  %v1961_v54 = vld [vmem:[%s2696_s2 + $0x278] ss:$12 sps:$4 sm:$0xff]  }
  0x18   :  { %857 = vmatpush1.bf16.msra.mxu0 %v1863_v20  ;;  %937 = vmatpush1.bf16.msra.mxu1 %v1904_v32  ;;  %v1920_v20 = vld [vmem:[%s2696_s2 + $0x20] ss:$12 sps:$4 sm:$0xff]   ;;  %v1935_v32 = vld [vmem:[%s2696_s2 + $0x68] ss:$12 sps:$4 sm:$0xff]   ;;  %v1965_v56 = vld [vmem:[%s2696_s2 + $0x1b8] ss:$12 sps:$4 sm:$0xff]  }
  0x19   :  { %858 = vmatprep.subr.bf16.mxu0 %v1864_v22  ;;  %1703 = vmatprep.subr.msk.bf16.mxu1 %vm836_vm0, %v1701_v33  ;;  %v1921_v22 = vld [vmem:[%s2696_s2 + $0xf8] ss:$12 sps:$4 sm:$0xff]   ;;  %v1932_v33 = vld [vmem:[%s2696_s2 + $0x1e0] ss:$12 sps:$4 sm:$0xff]   ;;  %v1962_v57 = vld [vmem:[%s2696_s2 + $0x270] ss:$12 sps:$4 sm:$0xff]  }
  0x1a   :  { %v1964_v55 = vld [vmem:[%s2696_s2 + $0x274] ss:$12 sps:$4 sm:$0xff]   ;;  %v1966_v58 = vld [vmem:[%s2696_s2 + $0x290] ss:$12 sps:$4 sm:$0xff]   ;;  %v1969_v59 = vld [vmem:[%s2696_s2 + $0x28c] ss:$12 sps:$4 sm:$0xff]  }
  0x1b   :  { %v1970_v60 = vld [vmem:[%s2696_s2 + $0x1d0] ss:$12 sps:$4 sm:$0xff]   ;;  %v1967_v61 = vld [vmem:[%s2696_s2 + $0x288] ss:$12 sps:$4 sm:$0xff]  }
  0x1c   :  { %859 = vmatpush1.bf16.msra.mxu0 %v1866_v25  ;;  %939 = vmatpush1.bf16.msra.mxu1 %v838_v38  ;;  %v1922_v25 = vld [vmem:[%s2696_s2 + $0x1b0] ss:$12 sps:$4 sm:$0xff]   ;;  %v1941_v38 = vld [vmem:[%s2696_s2 + $0x158] ss:$12 sps:$4 sm:$0xff]   ;;  %v1971_v62 = vld [vmem:[%s2696_s2 + $0x2a8] ss:$12 sps:$4 sm:$0xff]  }
  0x1d   :  { %860 = vmatprep.subr.bf16.mxu0 %v1867_v26  ;;  %1761 = vmatprep.subr.bf16.mxu1 %v1911_v37  ;;  %v1926_v26 = vld [vmem:[%s2696_s2 + $0x110] ss:$12 sps:$4 sm:$0xff]   ;;  %v1937_v37 = vld [vmem:[%s2696_s2 + $0x1f8] ss:$12 sps:$4 sm:$0xff]  }
  0x1e   :  { %v1974_v63 = vld [vmem:[%s2696_s2 + $0x2a4] ss:$12 sps:$4 sm:$0xff]  }
  0x20   :  { %861 = vmatpush1.bf16.msra.mxu0 %v1869_v29  ;;  %v1927_v29 = vld [vmem:[%s2696_s2 + $0x1c8] ss:$12 sps:$4 sm:$0xff]  }
  0x21   :  { %862 = vmatprep.subr.bf16.mxu0 %v1870_v31  ;;  %v1934_v31 = vld [vmem:[%s2696_s2 + $0x1e4] ss:$12 sps:$4 sm:$0xff]  }
  0x24   :  { %863 = vmatpush1.bf16.msra.mxu0 %v1872_v35  ;;  %v1939_v35 = vld [vmem:[%s2696_s2 + $0x1fc] ss:$12 sps:$4 sm:$0xff]  }
  0x25   :  { %864 = vmatprep.subr.bf16.mxu0 %v1873_v36  ;;  %v1940_v36 = vld [vmem:[%s2696_s2 + $0x80] ss:$12 sps:$4 sm:$0xff]  }
  0x28   :  { %865 = vmatpush1.bf16.msra.mxu0 %v1875_v39  ;;  %v1944_v39 = vld [vmem:[%s2696_s2 + $0x214] ss:$12 sps:$4 sm:$0xff]  }
  0x29   :  { %866 = vmatprep.subr.bf16.mxu0 %v1878_v40  ;;  %v1945_v40 = vld [vmem:[%s2696_s2 + $0x98] ss:$12 sps:$4 sm:$0xff]  }
  0x2c   :  { %867 = vmatpush1.bf16.msra.mxu0 %v1881_v41  ;;  %v1942_v41 = vld [vmem:[%s2696_s2 + $0x210] ss:$12 sps:$4 sm:$0xff]  }
  0x2d   :  { %868 = vmatprep.subr.bf16.mxu0 %v1884_v42  ;;  %v1946_v42 = vld [vmem:[%s2696_s2 + $0x170] ss:$12 sps:$4 sm:$0xff]  }
  0x30   :  { %869 = vmatpush1.bf16.msra.mxu0 %v1887_v43  ;;  %v1949_v43 = vld [vmem:[%s2696_s2 + $0x22c] ss:$12 sps:$4 sm:$0xff]  }
  0x31   :  { %870 = vmatprep.subr.bf16.mxu0 %v1890_v44  ;;  %v1950_v44 = vld [vmem:[%s2696_s2 + $0xb0] ss:$12 sps:$4 sm:$0xff]  }
  0x34   :  { %871 = vmatpush1.bf16.msra.mxu0 %v1893_v45  ;;  %v1947_v45 = vld [vmem:[%s2696_s2 + $0x228] ss:$12 sps:$4 sm:$0xff]  }
  0x35   :  { %872 = vmatprep.subr.bf16.mxu0 %v1896_v46  ;;  %v1951_v46 = vld [vmem:[%s2696_s2 + $0x248] ss:$12 sps:$4 sm:$0xff]  }
  0x38   :  { %873 = vmatpush1.bf16.msra.mxu0 %v1899_v47  ;;  %v1954_v47 = vld [vmem:[%s2696_s2 + $0x244] ss:$12 sps:$4 sm:$0xff]  }
  0x39   :  { %874 = vmatprep.subr.bf16.mxu0 %v1902_v48  ;;  %v1955_v48 = vld [vmem:[%s2696_s2 + $0x188] ss:$12 sps:$4 sm:$0xff]  }
  0x3c   :  { %875 = vmatpush1.bf16.msra.mxu0 %v1905_v49  ;;  %v1952_v49 = vld [vmem:[%s2696_s2 + $0x240] ss:$12 sps:$4 sm:$0xff]  }
  0x3d   :  { %876 = vmatprep.subr.bf16.mxu0 %v1907_v50  ;;  %v1956_v50 = vld [vmem:[%s2696_s2 + $0x260] ss:$12 sps:$4 sm:$0xff]  }
  0x40   :  { %877 = vmatpush1.bf16.msra.mxu0 %v1910_v51  ;;  %v1959_v51 = vld [vmem:[%s2696_s2 + $0x25c] ss:$12 sps:$4 sm:$0xff]  }
  0x41   :  { %887 = vmatprep.subr.bf16.mxu0 %v1914_v52  ;;  %v1960_v52 = vld [vmem:[%s2696_s2 + $0x1a0] ss:$12 sps:$4 sm:$0xff]  }
  0x85   :  { %v52_v53 = vpop.permute.xlu0 %51 }
  0x86   :  { %2067 = vrcp.f32 %v52_v53  ;;  %v1957_v53 = vld [vmem:[%s2696_s2 + $0x258] ss:$12 sps:$4 sm:$0xff]  }
  0x90   :  { %v2068_v6 = vpop.eup %2067 }
  0x91   :  { %v56_v7 = vmul.f32 %v2068_v6, %v42_v1  ;;  %v59_v8 = vmul.f32 %v2068_v6, %v45_v2  ;;  %v55_v9 = vmul.f32 %v2068_v6, %v41_v3  ;;  %v58_v11 = vmul.f32 %v2068_v6, %v44_v4  ;;  %v1975_v1 = vld [vmem:[%s2696_s2 + $0x1e8] ss:$12 sps:$4 sm:$0xff]   ;;  %v1972_v2 = vld [vmem:[%s2696_s2 + $0x2a0] ss:$12 sps:$4 sm:$0xff]  }
  0x92   :  { %v2295_v12 = vmul.f32 %v2068_v6, %v43_v5  ;;  %v1976_v3 = vld [vmem:[%s2696_s2 + $0x2c0] ss:$12 sps:$4 sm:$0xff]   ;;  %v1979_v4 = vld [vmem:[%s2696_s2 + $0x2bc] ss:$12 sps:$4 sm:$0xff]   ;;  %v1977_v6 = vld [vmem:[%s2696_s2 + $0x2b8] ss:$12 sps:$4 sm:$0xff]  }
  0x93   :  { %v61_v13 = vpack.c.bf16 %v56_v7, %v56_v7  ;;  %v2300_v15 = vpack.c.bf16 %v59_v8, %v59_v8  ;;  %v2302_v16 = vpack.c.bf16 %v55_v9, %v55_v9  ;;  %v2313_v19 = vpack.c.bf16 %v58_v11, %v58_v11  ;;  %v1980_v5 = vld [vmem:[%s2696_s2 + $0x200] ss:$12 sps:$4 sm:$0xff]   ;;  %v1981_v7 = vld [vmem:[%s2696_s2 + $0x2d8] ss:$12 sps:$4 sm:$0xff]   ;;  %v1986_v11 = vld [vmem:[%s2696_s2 + $0x2f0] ss:$12 sps:$4 sm:$0xff]  }
  0x94   :  { %v1984_v8 = vld [vmem:[%s2696_s2 + $0x2d4] ss:$12 sps:$4 sm:$0xff]   ;;  %v1985_v9 = vld [vmem:[%s2696_s2 + $0x218] ss:$12 sps:$4 sm:$0xff]  }
  0x95   :  { %878 = vmatprep.mubr.bf16.mxu0 %v61_v13  ;;  %1704 = vmatmul.mubr.msk.bf16.vlgmr.msra.gmra.mrb[0].mxu1 %vm832_vm1, %v2300_v15 }
  0x96   :  { %1762 = vmatpush3.bf16.msra.mxu1 %v1915_v10  ;;  %879 = vmatmul.mubr.bf16.vlgmr.msra.gmra.mrb[0].mxu0 %v2302_v16  ;;  %v1982_v10 = vld [vmem:[%s2696_s2 + $0x2d0] ss:$12 sps:$4 sm:$0xff]  }
  0x97   :  { %888 = vmatpush1.bf16.msra.mxu0 %v1912_v14  ;;  %1001 = vmatprep.mubr.bf16.mxu1 %v61_v13  ;;  %v1989_v13 = vld [vmem:[%s2696_s2 + $0x2ec] ss:$12 sps:$4 sm:$0xff]   ;;  %v1990_v14 = vld [vmem:[%s2696_s2 + $0x230] ss:$12 sps:$4 sm:$0xff]  }
  0x98   :  { %919 = vmatprep.mubr.bf16.mxu0 %v2313_v19  ;;  %1763 = vmatprep.subr.bf16.mxu1 %v1916_v17  ;;  %v1991_v17 = vld [vmem:[%s2696_s2 + $0x308] ss:$12 sps:$4 sm:$0xff]  }
  0x99   :  { %889 = vmatprep.subr.bf16.mxu0 %v1919_v18  ;;  %v62_v18 = vpack.c.bf16 %v2295_v12, %v2295_v12  ;;  %v1994_v12 = vld [vmem:[%s2696_s2 + $0x350] ss:$12 sps:$4 sm:$0xff]  }
  0x9a   :  { %1764 = vmatpush3.bf16.msra.mxu1 %v1920_v20  ;;  %v1992_v20 = vld [vmem:[%s2696_s2 + $0x320] ss:$12 sps:$4 sm:$0xff]  }
  0x9b   :  { %890 = vmatpush1.bf16.msra.mxu0 %v1917_v21  ;;  %1765 = vmatprep.subr.bf16.mxu1 %v1921_v22  ;;  %v1993_v21 = vld [vmem:[%s2696_s2 + $0x338] ss:$12 sps:$4 sm:$0xff]   ;;  %v1995_v22 = vld [vmem:[%s2696_s2 + $0x368] ss:$12 sps:$4 sm:$0xff]  }
  0x9c   :  { %891 = vmatprep.subr.bf16.mxu0 %v1924_v23  ;;  %v1996_v23 = vld [vmem:[%s2696_s2 + $0x380] ss:$0 sps:$4 sm:$0xff]  }
  0x9e   :  { %1766 = vmatpush3.bf16.msra.mxu1 %v1925_v24  ;;  %v844_v24 = vsel %vm836_vm0, %v1996_v23, 0 }
  0x9f   :  { %892 = vmatpush1.bf16.msra.mxu0 %v1922_v25  ;;  %1767 = vmatprep.subr.bf16.mxu1 %v1926_v26  ;;  %v1997_v25 = vld [vmem:[%s2698_s4] ss:$8 sps:$4 sm:$0xff]   ;;  %v1999_v26 = vld [vmem:[%s2698_s4 + $0x4] ss:$8 sps:$4 sm:$0xff]  }
  0xa0   :  { %893 = vmatprep.subr.bf16.mxu0 %v1929_v27  ;;  %v2002_v27 = vld [vmem:[%s2698_s4 + $0x14] ss:$8 sps:$4 sm:$0xff]  }
  0xa2   :  { %1768 = vmatpush3.bf16.msra.mxu1 %v1930_v28  ;;  %v2000_v28 = vld [vmem:[%s2698_s4 + $0x10] ss:$8 sps:$4 sm:$0xff]  }
  0xa3   :  { %894 = vmatpush1.bf16.msra.mxu0 %v1927_v29  ;;  %1769 = vmatprep.subr.bf16.mxu1 %v1931_v30  ;;  %v2005_v29 = vld [vmem:[%s2698_s4 + $0x24] ss:$8 sps:$4 sm:$0xff]   ;;  %v2008_v30 = vld [vmem:[%s2698_s4 + $0x34] ss:$8 sps:$4 sm:$0xff]  }
  0xa4   :  { %895 = vmatprep.subr.bf16.mxu0 %v1934_v31  ;;  %v2006_v31 = vld [vmem:[%s2698_s4 + $0x30] ss:$8 sps:$4 sm:$0xff]  }
  0xa6   :  { %1770 = vmatpush3.bf16.msra.mxu1 %v1935_v32  ;;  %v2011_v32 = vld [vmem:[%s2698_s4 + $0x44] ss:$8 sps:$4 sm:$0xff]  }
  0xa7   :  { %896 = vmatpush1.bf16.msra.mxu0 %v1932_v33  ;;  %1771 = vmatprep.subr.bf16.mxu1 %v1936_v34  ;;  %v2009_v33 = vld [vmem:[%s2698_s4 + $0x40] ss:$8 sps:$4 sm:$0xff]   ;;  %v2014_v34 = vld [vmem:[%s2698_s4 + $0x54] ss:$8 sps:$4 sm:$0xff]  }
  0xa8   :  { %897 = vmatprep.subr.bf16.mxu0 %v1939_v35  ;;  %v2012_v35 = vld [vmem:[%s2698_s4 + $0x50] ss:$8 sps:$4 sm:$0xff]  }
  0xaa   :  { %1772 = vmatpush3.bf16.msra.mxu1 %v1940_v36  ;;  %v2017_v36 = vld [vmem:[%s2698_s4 + $0x64] ss:$8 sps:$4 sm:$0xff]  }
  0xab   :  { %898 = vmatpush1.bf16.msra.mxu0 %v1937_v37  ;;  %1773 = vmatprep.subr.bf16.mxu1 %v1941_v38  ;;  %v2015_v37 = vld [vmem:[%s2698_s4 + $0x60] ss:$8 sps:$4 sm:$0xff]   ;;  %v2020_v38 = vld [vmem:[%s2698_s4 + $0x74] ss:$8 sps:$4 sm:$0xff]  }
  0xac   :  { %899 = vmatprep.subr.bf16.mxu0 %v1944_v39  ;;  %v2018_v39 = vld [vmem:[%s2698_s4 + $0x70] ss:$8 sps:$4 sm:$0xff]  }
  0xae   :  { %1774 = vmatpush3.bf16.msra.mxu1 %v1945_v40  ;;  %v2023_v40 = vld [vmem:[%s2698_s4 + $0x84] ss:$8 sps:$4 sm:$0xff]  }
  0xaf   :  { %900 = vmatpush1.bf16.msra.mxu0 %v1942_v41  ;;  %1775 = vmatprep.subr.bf16.mxu1 %v1946_v42  ;;  %v2021_v41 = vld [vmem:[%s2698_s4 + $0x80] ss:$8 sps:$4 sm:$0xff]   ;;  %v2026_v42 = vld [vmem:[%s2698_s4 + $0x94] ss:$8 sps:$4 sm:$0xff]  }
  0xb0   :  { %901 = vmatprep.subr.bf16.mxu0 %v1949_v43  ;;  %v2024_v43 = vld [vmem:[%s2698_s4 + $0x90] ss:$8 sps:$4 sm:$0xff]  }
  0xb2   :  { %1776 = vmatpush3.bf16.msra.mxu1 %v1950_v44  ;;  %v2029_v44 = vld [vmem:[%s2698_s4 + $0xa4] ss:$8 sps:$4 sm:$0xff]  }
  0xb3   :  { %902 = vmatpush1.bf16.msra.mxu0 %v1947_v45  ;;  %1783 = vmatprep.subr.bf16.mxu1 %v1951_v46  ;;  %v2027_v45 = vld [vmem:[%s2698_s4 + $0xa0] ss:$8 sps:$4 sm:$0xff]   ;;  %v2032_v46 = vld [vmem:[%s2698_s4 + $0xb4] ss:$8 sps:$4 sm:$0xff]  }
  0xb4   :  { %903 = vmatprep.subr.bf16.mxu0 %v1954_v47  ;;  %v2030_v47 = vld [vmem:[%s2698_s4 + $0xb0] ss:$8 sps:$4 sm:$0xff]  }
  0xb5   :  { %1002 = vmatmul.mubr.bf16.vlgmr.msra.gmra.mrb[4].mxu1 %v2302_v16  ;;  %v1987_v16 = vld [vmem:[%s2696_s2 + $0x2e8] ss:$12 sps:$4 sm:$0xff]  }
  0xb6   :  { %1784 = vmatpush3.bf16.msra.mxu1 %v1955_v48  ;;  %1041 = vmatprep.mubr.bf16.mxu1 %v2313_v19  ;;  %v2070_v19 = vmov 0.0   ;;  %v2035_v48 = vld [vmem:[%s2698_s4 + $0xc4] ss:$8 sps:$4 sm:$0xff]  }
  0xb7   :  { %904 = vmatpush1.bf16.msra.mxu0 %v1952_v49  ;;  %1785 = vmatprep.subr.bf16.mxu1 %v1956_v50  ;;  %v2033_v49 = vld [vmem:[%s2698_s4 + $0xc0] ss:$8 sps:$4 sm:$0xff]   ;;  %v2038_v50 = vld [vmem:[%s2698_s4 + $0xd4] ss:$8 sps:$4 sm:$0xff]  }
  0xb8   :  { %905 = vmatprep.subr.bf16.mxu0 %v1959_v51  ;;  %v2036_v51 = vld [vmem:[%s2698_s4 + $0xd0] ss:$8 sps:$4 sm:$0xff]  }
  0xba   :  { %1786 = vmatpush3.bf16.msra.mxu1 %v1960_v52  ;;  %v2041_v52 = vld [vmem:[%s2698_s4 + $0xe4] ss:$8 sps:$4 sm:$0xff]  }
  0xbb   :  { %906 = vmatpush1.bf16.msra.mxu0 %v1957_v53  ;;  %1787 = vmatprep.subr.bf16.mxu1 %v1961_v54  ;;  %v2039_v53 = vld [vmem:[%s2698_s4 + $0xe0] ss:$8 sps:$4 sm:$0xff]   ;;  %v2044_v54 = vld [vmem:[%s2698_s4 + $0xf4] ss:$8 sps:$4 sm:$0xff]  }
  0xbc   :  { %907 = vmatprep.subr.bf16.mxu0 %v1964_v55  ;;  %v2042_v55 = vld [vmem:[%s2698_s4 + $0xf0] ss:$8 sps:$4 sm:$0xff]  }
  0xbe   :  { %1788 = vmatpush3.bf16.msra.mxu1 %v1965_v56  ;;  %v2047_v56 = vld [vmem:[%s2698_s4 + $0x104] ss:$8 sps:$4 sm:$0xff]  }
  0xbf   :  { %908 = vmatpush1.bf16.msra.mxu0 %v1962_v57  ;;  %1789 = vmatprep.subr.bf16.mxu1 %v1966_v58  ;;  %v2054_v57 = vld [vmem:[%s2699_s6] sm:$0xff]   ;;  %v2055_v58 = vld [vmem:[%s2699_s6 + $0x8] sm:$0xff]  }
  0xc0   :  { %909 = vmatprep.subr.bf16.mxu0 %v1969_v59  ;;  %v2056_v59 = vld [vmem:[%s2699_s6 + $0x10] sm:$0xff]  }
  0xc2   :  { %1790 = vmatpush3.bf16.msra.mxu1 %v1970_v60  ;;  %v2057_v60 = vld [vmem:[%s2699_s6 + $0x18] sm:$0xff]  }
  0xc3   :  { %910 = vmatpush1.bf16.msra.mxu0 %v1967_v61  ;;  %1791 = vmatprep.subr.bf16.mxu1 %v1971_v62  ;;  %v2058_v61 = vld [vmem:[%s2699_s6 + $0x20] sm:$0xff]   ;;  %v2059_v62 = vld [vmem:[%s2699_s6 + $0x28] sm:$0xff]  }
  0xc4   :  { %911 = vmatprep.subr.bf16.mxu0 %v1974_v63  ;;  %v2060_v63 = vld [vmem:[%s2699_s6 + $0x30] sm:$0xff]  }
  0xc6   :  { %1792 = vmatpush3.bf16.msra.mxu1 %v1975_v1  ;;  %v2061_v1 = vld [vmem:[%s2699_s6 + $0x38] sm:$0xff]  }
  0xc7   :  { %912 = vmatpush1.bf16.msra.mxu0 %v1972_v2  ;;  %1793 = vmatprep.subr.bf16.mxu1 %v1976_v3  ;;  %v2062_v2 = vld [vmem:[%s2699_s6 + $0x40] sm:$0xff]  }
  0xc8   :  { %913 = vmatprep.subr.bf16.mxu0 %v1979_v4 }
  0xca   :  { %1794 = vmatpush3.bf16.msra.mxu1 %v1980_v5 }
  0xcb   :  { %914 = vmatpush1.bf16.msra.mxu0 %v1977_v6  ;;  %1795 = vmatprep.subr.bf16.mxu1 %v1981_v7  ;;  %v2063_v6 = vld [vmem:[%s2699_s6 + $0x48] sm:$0xff]  }
  0xcc   :  { %915 = vmatprep.subr.bf16.mxu0 %v1984_v8  ;;  %v2064_v8 = vld [vmem:[%s2699_s6 + $0x50] sm:$0xff]  }
  0xce   :  { %1796 = vmatpush3.bf16.msra.mxu1 %v1985_v9 }
  0xcf   :  { %916 = vmatpush1.bf16.msra.mxu0 %v1982_v10  ;;  %1797 = vmatprep.subr.bf16.mxu1 %v1986_v11 }
  0xd0   :  { %917 = vmatprep.subr.bf16.mxu0 %v1989_v13 }
  0xd2   :  { %1798 = vmatpush3.bf16.msra.mxu1 %v1990_v14 }
  0xd3   :  { %918 = vmatpush1.bf16.msra.mxu0 %v1987_v16  ;;  %1812 = vmatprep.subr.bf16.mxu1 %v2070_v19  ;;  %v217_v16 = vlaneseq }
  0xd4   :  { %1544 = vmatprep.subr.bf16.mxu0 %v2069_v0 }
  0xd5   :  { %1042 = vmatmul.mubr.bf16.vlgmr.msra.gmra.mrb[8].mxu1 %v62_v18 }
  0xd6   :  { %920 = vmatmul.mubr.bf16.vlgmr.msra.gmra.mrb[0].mxu0 %v62_v18  ;;  %1813 = vmatpush3.bf16.msra.mxu1 %v1991_v17  ;;  %v218_v17 = vshrl.u32 %v217_v16, 7 }
  0xd7   :  { %1814 = vmatprep.subr.bf16.mxu1 %v2070_v19  ;;  %1824 = vmatprep.mubr.msk.bf16.mxu1 %vm2071_vm2, %v2070_v19 }
  0xd8   :  { %1545 = vmatpush1.bf16.msra.mxu0 %v2054_v57  ;;  %v227_v18 = vsub.s32 2, %v218_v17 }
  0xd9   :  { %1546 = vmatprep.subr.bf16.mxu0 %v2069_v0 }
  0xda   :  { %1815 = vmatpush3.bf16.msra.mxu1 %v1992_v20  ;;  %v215_v20 = vld [vmem:[%s2700_s3] sm:$0x7] }
  0xdb   :  { %1816 = vmatprep.subr.bf16.mxu1 %v2070_v19 }
  0xdc   :  { %1547 = vmatpush1.bf16.msra.mxu0 %v2055_v58  ;;  %v1133_v58 = vld [vmem:[%s2701_s5] sm:$0x3] }
  0xdd   :  { %1548 = vmatprep.subr.bf16.mxu0 %v2069_v0 }
  0xde   :  { %1817 = vmatpush3.bf16.msra.mxu1 %v1993_v21  ;;  %v223_v21 = vsub.s32 1, %v218_v17 }
  0xdf   :  { %1818 = vmatprep.subr.bf16.mxu1 %v2070_v19 }
  0xe0   :  { %1549 = vmatpush1.bf16.msra.mxu0 %v2056_v59  ;;  %v224_v23 = vrot.slane %v215_v20, %v223_v21 }
  0xe1   :  { %1550 = vmatprep.subr.bf16.mxu0 %v2069_v0 }
  0xe2   :  { %1819 = vmatpush3.bf16.msra.mxu1 %v1994_v12  ;;  %v228_v12 = vrot.slane %v215_v20, %v227_v18 }
  0xe3   :  { %1820 = vmatprep.subr.bf16.mxu1 %v2070_v19 }
  0xe4   :  { %1551 = vmatpush1.bf16.msra.mxu0 %v2057_v60  ;;  %v1142_v60 = vrot.slane %v1133_v58, %v223_v21 }
  0xe5   :  { %1552 = vmatprep.subr.bf16.mxu0 %v2069_v0 }
  0xe6   :  { %1821 = vmatpush3.bf16.msra.mxu1 %v1995_v22 }
  0xe7   :  { %1822 = vmatprep.subr.bf16.mxu1 %v2070_v19  ;;  %v219_v19 = vsub.s32 0, %v218_v17 }
  0xe8   :  { %1553 = vmatpush1.bf16.msra.mxu0 %v2058_v61 }
  0xe9   :  { %1554 = vmatprep.subr.bf16.mxu0 %v2069_v0  ;;  %v220_v22 = vrot.slane %v215_v20, %v219_v19  ;;  %v1138_v59 = vrot.slane %v1133_v58, %v219_v19 }
  0xea   :  { %1823 = vmatpush3.bf16.msra.mxu1 %v844_v24 }
  0xeb   :  { %1344 = vmatprep.subr.bf16.mxu1 %v1999_v26 }
  0xec   :  { %1555 = vmatpush1.bf16.msra.mxu0 %v2059_v62 }
  0xed   :  { %1825 = vmatmul.mubr.msk.bf16.vlgmr.msra.gmra.mrb[12].mxu1 %vm832_vm1, %v2300_v15  ;;  %v2003_v15 = vld [vmem:[%s2698_s4 + $0x20] ss:$8 sps:$4 sm:$0xff]   ;;  %1556 = vmatprep.subr.bf16.mxu0 %v2069_v0 }
  0xee   :  { %1345 = vmatpush1.bf16.msra.mxu1 %v1997_v25 }
  0xef   :  { %1346 = vmatprep.subr.bf16.mxu1 %v2002_v27 }
  0xf0   :  { %1557 = vmatpush1.bf16.msra.mxu0 %v2060_v63 }
  0xf1   :  { %1558 = vmatprep.subr.bf16.mxu0 %v2069_v0 }
  0xf2   :  { %1347 = vmatpush1.bf16.msra.mxu1 %v2000_v28 }
  0xf3   :  { %1348 = vmatprep.subr.bf16.mxu1 %v2005_v29 }
  0xf4   :  { %1559 = vmatpush1.bf16.msra.mxu0 %v2061_v1 }
  0xf5   :  { %1560 = vmatprep.subr.bf16.mxu0 %v2069_v0 }
  0xf6   :  { %1349 = vmatpush1.bf16.msra.mxu1 %v2003_v15 }
  0xf7   :  { %1350 = vmatprep.subr.bf16.mxu1 %v2008_v30 }
  0xf8   :  { %1561 = vmatpush1.bf16.msra.mxu0 %v2062_v2 }
  0xf9   :  { %1562 = vmatprep.subr.bf16.mxu0 %v2069_v0 }
  0xfa   :  { %1351 = vmatpush1.bf16.msra.mxu1 %v2006_v31 }
  0xfb   :  { %1352 = vmatprep.subr.bf16.mxu1 %v2011_v32 }
  0xfc   :  { %1563 = vmatpush1.bf16.msra.mxu0 %v2063_v6 }
  0xfd   :  { %1564 = vmatprep.subr.bf16.mxu0 %v2069_v0 }
  0xfe   :  { %1353 = vmatpush1.bf16.msra.mxu1 %v2009_v33 }
  0xff   :  { %1354 = vmatprep.subr.bf16.mxu1 %v2014_v34 }
 0x100   :  { %1565 = vmatpush1.bf16.msra.mxu0 %v2064_v8 }
 0x101   :  { %1566 = vmatprep.subr.bf16.mxu0 %v2069_v0 }
 0x102   :  { %1355 = vmatpush1.bf16.msra.mxu1 %v2012_v35 }
 0x103   :  { %1356 = vmatprep.subr.bf16.mxu1 %v2017_v36 }
 0x106   :  { %1357 = vmatpush1.bf16.msra.mxu1 %v2015_v37 }
 0x107   :  { %1358 = vmatprep.subr.bf16.mxu1 %v2020_v38 }
 0x10a   :  { %1359 = vmatpush1.bf16.msra.mxu1 %v2018_v39 }
 0x10b   :  { %1360 = vmatprep.subr.bf16.mxu1 %v2023_v40 }
 0x10e   :  { %1361 = vmatpush1.bf16.msra.mxu1 %v2021_v41  ;;  %v2045_v41 = vld [vmem:[%s2698_s4 + $0x100] ss:$8 sps:$4 sm:$0xff]  }
 0x10f   :  { %1362 = vmatprep.subr.bf16.mxu1 %v2026_v42 }
 0x112   :  { %1363 = vmatpush1.bf16.msra.mxu1 %v2024_v43  ;;  %v2050_v43 = vld [vmem:[%s2698_s4 + $0x114] ss:$8 sps:$4 sm:$0xff]  }
 0x113   :  { %1364 = vmatprep.subr.bf16.mxu1 %v2029_v44  ;;  %v2048_v44 = vld [vmem:[%s2698_s4 + $0x110] ss:$8 sps:$4 sm:$0xff]  }
 0x116   :  { %1365 = vmatpush1.bf16.msra.mxu1 %v2027_v45  ;;  %v2051_v45 = vld [vmem:[%s2698_s4 + $0x124] ss:$8 sps:$4 sm:$0x3f]  }
 0x117   :  { %1366 = vmatprep.subr.bf16.mxu1 %v2032_v46  ;;  %v2053_v46 = vld [vmem:[%s2698_s4 + $0x120] ss:$8 sps:$4 sm:$0x3f]  }
 0x11a   :  { %1367 = vmatpush1.bf16.msra.mxu1 %v2030_v47  ;;  %v1339_v47 = vsel %vm1337_vm3, %v2053_v46, 0 }
 0x11b   :  { %1368 = vmatprep.subr.bf16.mxu1 %v2035_v48 }
 0x11e   :  { %1369 = vmatpush1.bf16.msra.mxu1 %v2033_v49 }
 0x11f   :  { %1370 = vmatprep.subr.bf16.mxu1 %v2038_v50 }
 0x122   :  { %1371 = vmatpush1.bf16.msra.mxu1 %v2036_v51 }
 0x123   :  { %1372 = vmatprep.subr.bf16.mxu1 %v2041_v52 }
 0x126   :  { %1373 = vmatpush1.bf16.msra.mxu1 %v2039_v53 }
 0x127   :  { %1374 = vmatprep.subr.bf16.mxu1 %v2044_v54 }
 0x12a   :  { %1375 = vmatpush1.bf16.msra.mxu1 %v2042_v55  ;;  %v2065_v55 = vld [vmem:[%s2699_s6 + $0x58] sm:$0xff]  }
 0x12b   :  { %1385 = vmatprep.subr.bf16.mxu1 %v2047_v56  ;;  %1567 = vmatpush1.bf16.msra.mxu0 %v2065_v55  ;;  %v2066_v56 = vld [vmem:[%s2699_s6 + $0x60] ss:$0 sps:$4 sm:$0xff]  }
 0x12c   :  { %1568 = vmatprep.subr.bf16.mxu0 %v2069_v0  ;;  %v1542_v57 = vsel %vm836_vm0, %v2066_v56, 0 }
 0x12f   :  { %1569 = vmatpush1.bf16.msra.mxu0 %v1542_v57 }
 0x168   :  { %v962_v3 = vpop.f32.mrb[0].mxu1 }
 0x169   :  { %v964_v4 = vpop.f32.mrb[1].mxu1 }
 0x16a   :  { %v966_v5 = vpop.f32.mrb[2].mxu1 }
 0x16b   :  { %v967_v7 = vpop.f32.mrb[3].mxu1 }
 0x16c   :  { %v1746_v7 = vld [vmem:[%s2702_s7] ss:$0 sm:$0xff] }
 0x188   :  { %v1777_v9 = vpop.f32.mrb[4].mxu1 }
 0x189   :  { %v1778_v10 = vpop.f32.mrb[5].mxu1 }
 0x18a   :  { %v1779_v11 = vadd.f32 %v1778_v10, %v1777_v9  ;;  %v1780_v13 = vpop.f32.mrb[6].mxu1 }
 0x18b   :  { %v1781_v14 = vpop.f32.mrb[7].mxu1 }
 0x18c   :  { %v1004_v27 = vadd.f32 %v1779_v11, %v228_v12 }
 0x1a8   :  { %v1799_v24 = vpop.f32.mrb[8].mxu1 }
 0x1a9   :  { %v921_v25 = vpop.f32.mrb[0].mxu0  ;;  %v1800_v26 = vpop.f32.mrb[9].mxu1 }
 0x1aa   :  { %v1828_v28 = vadd.f32 %v921_v25, %v220_v22  ;;  %v1801_v29 = vadd.f32 %v1800_v26, %v1799_v24  ;;  %v923_v15 = vpop.f32.mrb[1].mxu0  ;;  %v1802_v30 = vpop.f32.mrb[10].mxu1 }
 0x1ab   :  { %v1830_v31 = vadd.f32 %v923_v15, %v224_v23  ;;  %v925_v32 = vpop.f32.mrb[2].mxu0  ;;  %v1803_v33 = vpop.f32.mrb[11].mxu1 }
 0x1ac   :  { %v1829_v34 = vadd.f32 %v1828_v28, %v962_v3  ;;  %v926_v35 = vpop.f32.mrb[3].mxu0  ;;  %v1044_v36 = vadd.f32 %v1801_v29, %v1004_v27 }
 0x1ad   :  { %v1831_v37 = vadd.f32 %v1830_v31, %v964_v4 }
 0x1ae   :  { %v1089_v38 = vmax.f32 %v1829_v34, 0.0 }
 0x1af   :  { %v1090_v39 = vmax.f32 %v1831_v37, 0.0 }
 0x1b0   :  { %v1092_v42 = vpack.c.bf16 %v1089_v38, %v1089_v38 }
 0x1b1   :  { %v1093_v40 = vpack.c.bf16 %v1090_v39, %v1090_v39 }
 0x1b3   :  { %1376 = vmatprep.mubr.bf16.mxu1 %v1093_v40 }
 0x1b4   :  { %1377 = vmatmul.mubr.bf16.vlgmr.msra.gmra.mrb[16].mxu1 %v1092_v42 }
 0x1b5   :  { %1386 = vmatpush1.bf16.msra.mxu1 %v2045_v41  ;;  %1417 = vmatprep.mubr.bf16.mxu1 %v2069_v0 }
 0x1b6   :  { %1387 = vmatprep.subr.bf16.mxu1 %v2050_v43 }
 0x1b9   :  { %1388 = vmatpush1.bf16.msra.mxu1 %v2048_v44 }
 0x1ba   :  { %1744 = vmatprep.subr.msk.bf16.mxu1 %vm1337_vm3, %v2051_v45 }
 0x1bd   :  { %1390 = vmatpush1.bf16.msra.mxu1 %v1339_v47 }
 0x1c0   :  { %v1083_v48 = vpop.f32.mrb[12].mxu1 }
 0x1c1   :  { %v1084_v49 = vadd.f32 %v1083_v48, %v1044_v36  ;;  %v1826_v50 = vpop.f32.mrb[13].mxu1 }
 0x1c2   :  { %v1086_v51 = vpop.f32.mrb[14].mxu1 }
 0x1c3   :  { %v1091_v52 = vmax.f32 %v1084_v49, 0.0  ;;  %v1827_v53 = vpop.f32.mrb[15].mxu1 }
 0x1c5   :  { %v1094_v54 = vpack.c.bf16 %v1091_v52, %v1091_v52 }
 0x1c7   :  { %1745 = vmatmul.mubr.msk.bf16.vlgmr.msra.gmra.mrb[16].mxu1 %vm1333_vm4, %v1094_v54 }
 0x29a   :  { %v1419_v61 = vpop.f32.mrb[16].mxu1 }
 0x29b   :  { %v1832_v62 = vadd.f32 %v1419_v61, %v1138_v59  ;;  %v1421_v63 = vpop.f32.mrb[17].mxu1 }
 0x29c   :  { %v1833_v1 = vadd.f32 %v1421_v63, %v1142_v60  ;;  %v1423_v2 = vpop.f32.mrb[18].mxu1 }
 0x29d   :  { %v1426_v3 = vmax.f32 %v1832_v62, 0.0  ;;  %v1424_v0 = vpop.f32.mrb[19].mxu1 }
 0x29e   :  { %v1427_v4 = vmax.f32 %v1833_v1, 0.0 }
 0x29f   :  { %v1428_v6 = vpack.c.bf16 %v1426_v3, %v1426_v3 }
 0x2a0   :  { %v1429_v5 = vpack.c.bf16 %v1427_v4, %v1427_v4 }
 0x2a2   :  { %1760 = vmatprep.mubr.msk.bf16.mxu0 %vm1537_vm5, %v1429_v5 }
 0x2a3   :  { %1577 = vmatmul.mubr.bf16.vlgmr.msra.gmra.mrb[4].mxu0 %v1428_v6 }
 0x376   :  { %v1578_v8 = vpop.f32.mrb[4].mxu0 }
 0x377   :  { %v1579_v9 = vadd.f32 %v1746_v7, %v1578_v8  ;;  %v1580_v10 = vpop.f32.mrb[5].mxu0 }
 0x378   :  { %v1581_v11 = vpop.f32.mrb[6].mxu0 }
 0x379   :  { %1584 = vst [vmem:[%s2703_s8] sm:$0xff] %v1579_v9  ;;  %v1582_v13 = vpop.f32.mrb[7].mxu0 }

// kernel: drug_mlp_forward.2
= control target key start
LH: loop header
LB: loop body
LE: loop exit
PB: predicated region body
PF: predicated region fallthrough
CT: control target
= control target key end

     0   :  { %s5035_s12 = smov 0   ;;  %s5037_s13 = smov 0   ;;  %s8557_s0 = inlined_call_operand.vmem [shape: s32[1,1000], index: 0, kind: input, shape index: {}]   ;;  %s8558_s1 = inlined_call_operand.vmem [shape: bf16[1000,600], index: 1, kind: input, shape index: {}]   ;;  %s8559_s2 = inlined_call_operand.vmem [shape: f32[16,600], index: 2, kind: output, shape index: {0}]   ;;  %s8560_s3 = inlined_call_operand.vmem [shape: f32[16,1], index: 3, kind: output, shape index: {1}]  }
   0x1   :  { %s5039_s14 = smov 0  }
   0x2 LB: > { %s26_s15 = sadd.s32 1, %s5006_s13  ;;  %p4382_p0 = scmp.ge.s32.totalorder %s5010_s14, 1  ;;  %s5010_s14 = sphi %s5039_s14, %s14_s14   ;;  %s5006_s13 = sphi %s5037_s13, %s10127_s13   ;;  %s5002_s12 = sphi %s5035_s12, %s10126_s12  }
   0x3   : > { %p28_p1 = scmp.ge.s32.totalorder %s26_s15, 2  ;;  %p194_p2 = scmp.lt.s32.totalorder %s5010_s14, 3 }
   0x5   : > { %s10129_s15 = smov (%p28_p1, %s26_s15), 0  ;;  %p195_p3 = pnand %p4382_p0, %p194_p2 }
   0x7   : > { %198 = sbr.rel (%p195_p3) target bundleno = 694 (0x2b6), region = 28 }
   0xe   : > { %p237_p4 = scmp.lt.s32.totalorder %s5002_s12, 0  ;;  %v676_v0 = vlaneseq  ;;  %v8587_v1 = vmov 1065369472   ;;  %s4388_s16 = sshll.u32 %s5002_s12, 10  ;;  %v9048_v25 = vmov 0  ;;  %v9052_v32 = vmov 0 }
   0xf   : > { %4783 = vmatprep.subr.bf16.mxu0 %v8587_v1  ;;  %4805 = vmatprep.subr.bf16.mxu1 %v8587_v1  ;;  %v5072_v5 = vstv %s4388_s16  ;;  %v8585_v28 = vmov 1.0|1.0   ;;  %v9057_v51 = vmov 0  ;;  %p266_p7 = scmp.lt.s32.totalorder %s5002_s12, 1 }
  0x10   : > { %4784 = vmatpush3.bf16.msra.mxu0 %v8587_v1  ;;  %4806 = vmatpush3.bf16.msra.mxu1 %v8587_v1  ;;  %s5062_s17 = scalar_select %p237_p4, %s5002_s12, 0  ;;  %v5064_v2 = vand.u32 127, %v676_v0  ;;  %v5068_v3 = vshrl.u32 %v676_v0, 7 }
  0x11   : > { %4785 = vmatprep.subr.bf16.mxu0 %v8587_v1  ;;  %4807 = vmatprep.subr.bf16.mxu1 %v8587_v1  ;;  %s10135_s12 = smov (!%p266_p7, %s5002_s12), 1 }
  0x12   : > { %s4383_s18 = sshll.u32 %s5062_s17, 3  ;;  %v720_v4 = vadd.s32 128, %v5064_v2  ;;  %v722_v6 = vadd.s32 384, %v5064_v2  ;;  %v684_v7 = vsub.s32 1, %v5068_v3  ;;  %v692_v9 = vsub.s32 3, %v5068_v3  ;;  %s4384_s22 = sshll.u32 %s5062_s17, 7 }
  0x13   : > { %p240_p5 = scmp.lt.s32.totalorder %s4383_s18, 7  ;;  %v721_v10 = vadd.s32 256, %v5064_v2  ;;  %v680_v12 = vsub.s32 0, %v5068_v3  ;;  %v728_v14 = vadd.s32 %v5072_v5, %v5064_v2  ;;  %v724_v15 = vadd.s32 640, %v5064_v2  ;;  %p5135_p6 = scmp.lt.s32.totalorder %s4384_s22, 124 }
  0x14   : > { %4786 = vmatpush3.bf16.msra.mxu0 %v8587_v1  ;;  %4808 = vmatpush3.bf16.msra.mxu1 %v8587_v1  ;;  %v729_v8 = vadd.s32 %v5072_v5, %v720_v4  ;;  %v731_v11 = vadd.s32 %v5072_v5, %v722_v6  ;;  %v726_v18 = vadd.s32 896, %v5064_v2  ;;  %v688_v19 = vsub.s32 2, %v5068_v3  ;;  %s4387_s28 = sshll.u32 %s10135_s12, 3  ;;  %s4960_s5 = smul.u32 40, %s10135_s12 }
  0x15   : > { %4787 = vmatprep.subr.bf16.mxu0 %v8587_v1  ;;  %4809 = vmatprep.subr.bf16.mxu1 %v8587_v1  ;;  %s10131_s18 = smov (!%p240_p5, %s4383_s18), 7  ;;  %v5102_v20 = vadd.s32 %v5072_v5, %v721_v10  ;;  %v700_v21 = vsub.s32 5, %v5068_v3  ;;  %v708_v22 = vsub.s32 7, %v5068_v3  ;;  %v733_v24 = vadd.s32 %v5072_v5, %v724_v15  ;;  %s10133_s22 = smov (!%p5135_p6, %s4384_s22), 124 }
  0x16   : > { %s242_s21 = scalar_lea.vmem %s8557_s0, %s10131_s18  ;;  %vm737_vm0 = vcmp.lt.s32.totalorder %v729_v8, 1000  ;;  %vm739_vm3 = vcmp.lt.s32.totalorder %v731_v11, 1000  ;;  %vm736_vm6 = vcmp.lt.s32.totalorder %v728_v14, 1000  ;;  %v5120_v26 = vadd.s32 %v5072_v5, %v726_v18  ;;  %s4959_s24 = smul.u32 20, %s10133_s22 }
  0x17   : > { %v5090_v13 = vld [vmem:[%s242_s21] sm:$0xff]  ;;  %v696_v27 = vsub.s32 4, %v5068_v3  ;;  %vm738_vm8 = vcmp.lt.s32.totalorder %v5102_v20, 1000  ;;  %v723_v30 = vadd.s32 512, %v5064_v2  ;;  %v768_v31 = vadd.s32 8, %v5068_v3  ;;  %s7805_s4 = scalar_lea.vmem %s8560_s3, %s4387_s28  ;;  %s8536_s8 = scalar_lea.vmem %s8559_s2, %s4960_s5 }
  0x18   : > { %4788 = vmatpush3.bf16.msra.mxu0 %v8587_v1  ;;  %4810 = vmatpush3.bf16.msra.mxu1 %v8587_v1  ;;  %v685_v16 = vrot.slane %v5090_v13, %v684_v7  ;;  %v693_v17 = vrot.slane %v5090_v13, %v692_v9  ;;  %v681_v23 = vrot.slane %v5090_v13, %v680_v12  ;;  %vm741_vm11 = vcmp.lt.s32.totalorder %v733_v24, 1000  ;;  %s5299_s27 = scalar_lea.vmem %s8558_s1, %s4959_s24 }
  0x19   : > { %4789 = vmatprep.subr.bf16.mxu0 %v8587_v1  ;;  %4811 = vmatprep.subr.bf16.mxu1 %v8587_v1  ;;  %v689_v29 = vrot.slane %v5090_v13, %v688_v19  ;;  %v701_v33 = vrot.slane %v5090_v13, %v700_v21  ;;  %v709_v34 = vrot.slane %v5090_v13, %v708_v22  ;;  %v704_v36 = vsub.s32 6, %v5068_v3 }
  0x1a   : > { %vm711_vm1 = vcmp.eq.s32.totalorder %v5068_v3, %v685_v16  ;;  %vm713_vm2 = vcmp.eq.s32.totalorder %v5068_v3, %v693_v17  ;;  %vm710_vm10 = vcmp.eq.s32.totalorder %v5068_v3, %v681_v23  ;;  %v5148_v35 = vadd.s32 %v5072_v5, %v5068_v3 }
  0x1b   : > { %vm761_vm4 = vmand %vm711_vm1, %vm737_vm0  ;;  %v799_v37 = vadd.s32 256, %v5068_v3  ;;  %v800_v38 = vadd.s32 264, %v5068_v3  ;;  %vm743_vm12 = vcmp.lt.s32.totalorder %v5120_v26, 1000  ;;  %v5159_v39 = vrot.slane %v5090_v13, %v696_v27  ;;  %v291_v27 = vld [vmem:[%s5299_s27] sm:$0xff] }
  0x1c   : > { %4790 = vmatpush3.bf16.msra.mxu0 %v8587_v1  ;;  %4812 = vmatpush3.bf16.msra.mxu1 %v8587_v1  ;;  %vm5115_vm5 = vmpackc.low %vm761_vm4, %vm761_vm4  ;;  %v725_v40 = vadd.s32 768, %v5064_v2  ;;  %v769_v41 = vadd.s32 16, %v5068_v3  ;;  %vm712_vm14 = vcmp.eq.s32.totalorder %v5068_v3, %v689_v29  ;;  %v5175_v43 = vadd.s32 %v5072_v5, %v723_v30  ;;  %v294_v29 = vld [vmem:[%s5299_s27 + $0x14] sm:$0xff] }
  0x1d   : > { %4791 = vmatprep.subr.bf16.mxu0 %v8587_v1  ;;  %4813 = vmatprep.subr.bf16.mxu1 %v8587_v1  ;;  %v9049_v25 = vsel %vm5115_vm5, 4294967295, %v9048_v25  ;;  %vm763_vm7 = vmand %vm713_vm2, %vm739_vm3  ;;  %v5178_v44 = vadd.s32 %v768_v31, %v5072_v5  ;;  %v770_v45 = vadd.s32 24, %v5068_v3  ;;  %vm715_vm15 = vcmp.eq.s32.totalorder %v5068_v3, %v701_v33 }
  0x1e   : > { %9050 = vst [vmem:[#allocation2_spill] sm:$0xff] %v9049_v25  ;;  %4398 = vmatprep.mubr.msk.bf16.mxu0 %vm5115_vm5, %v8585_v28  ;;  %vm5139_vm9 = vmpackc.low %vm763_vm7, %vm763_vm7  ;;  %vm717_vm0 = vcmp.eq.s32.totalorder %v5068_v3, %v709_v34  ;;  %vm1023_vm1 = vcmp.lt.s32.totalorder %v5148_v35, 1000  ;;  %v801_v46 = vadd.s32 272, %v5068_v3  ;;  %v5194_v47 = vrot.slane %v5090_v13, %v704_v36  ;;  %v387_v36 = vld [vmem:[%s5299_s27 + $0x280] sm:$0xff] }
  0x1f   : > { %v9053_v32 = vsel %vm5139_vm9, 4294967295, %v9052_v32  ;;  %4402 = vmatprep.mubr.msk.bf16.mxu1 %vm5139_vm9, %v8585_v28  ;;  %vm5169_vm13 = vmand %vm710_vm10, %vm736_vm6  ;;  %v5197_v48 = vadd.s32 %v799_v37, %v5072_v5  ;;  %v5200_v49 = vadd.s32 %v800_v38, %v5072_v5  ;;  %v802_v50 = vadd.s32 280, %v5068_v3  ;;  %v390_v37 = vld [vmem:[%s5299_s27 + $0x294] sm:$0xff] }
  0x20   : > { %9054 = vst [vmem:[#allocation3_spill] sm:$0xff] %v9053_v32  ;;  %4792 = vmatpush3.bf16.msra.mxu0 %v8587_v1  ;;  %4814 = vmatpush3.bf16.msra.mxu1 %v8587_v1  ;;  %vm5208_vm2 = vmpackc.low %vm5169_vm13, %vm5169_vm13  ;;  %v5213_v52 = vadd.s32 %v5072_v5, %v725_v40  ;;  %v5216_v53 = vadd.s32 %v769_v41, %v5072_v5  ;;  %v771_v54 = vadd.s32 32, %v5068_v3  ;;  %v772_v55 = vadd.s32 40, %v5068_v3 }
  0x21   : > { %4793 = vmatprep.subr.bf16.mxu0 %v8587_v1  ;;  %4815 = vmatprep.subr.bf16.mxu1 %v8587_v1  ;;  %v9058_v51 = vsel %vm5208_vm2, 4294967295, %v9057_v51  ;;  %vm5224_vm3 = vmand %vm712_vm14, %vm738_vm8  ;;  %vm1024_vm4 = vcmp.lt.s32.totalorder %v5178_v44, 1000  ;;  %v5230_v57 = vadd.s32 %v770_v45, %v5072_v5  ;;  %v803_v58 = vadd.s32 288, %v5068_v3 }
  0x22   : > { %v804_v59 = vadd.s32 296, %v5068_v3  ;;  %vm5238_vm6 = vmand %vm715_vm15, %vm741_vm11  ;;  %v5243_v61 = vadd.s32 %v801_v46, %v5072_v5  ;;  %v773_v62 = vadd.s32 48, %v5068_v3  ;;  %v774_v63 = vadd.s32 56, %v5068_v3 }
  0x23   : > { %v805_v0 = vadd.s32 304, %v5068_v3  ;;  %vm5254_vm7 = vmand %vm717_vm0, %vm743_vm12  ;;  %vm1055_vm8 = vcmp.lt.s32.totalorder %v5197_v48, 1000  ;;  %vm1056_vm10 = vcmp.lt.s32.totalorder %v5200_v49, 1000  ;;  %v5261_v4 = vadd.s32 %v802_v50, %v5072_v5  ;;  %v297_v49 = vld [vmem:[%s5299_s27 + $0x28] sm:$0xff]  ;;  %v300_v50 = vld [vmem:[%s5299_s27 + $0x3c] sm:$0xff] }
  0x24   : > { %4794 = vmatpush3.bf16.msra.mxu0 %v8587_v1  ;;  %4816 = vmatpush3.bf16.msra.mxu1 %v8587_v1  ;;  %v806_v6 = vadd.s32 312, %v5068_v3  ;;  %vm5269_vm11 = vmpackc.low %vm5224_vm3, %vm5224_vm3  ;;  %v9065_v7 = vmov 0  ;;  %v5275_v8 = vadd.s32 %v771_v54, %v5072_v5  ;;  %v5278_v9 = vadd.s32 %v772_v55, %v5072_v5 }
  0x25   : > { %4795 = vmatprep.subr.bf16.mxu0 %v8587_v1  ;;  %4817 = vmatprep.subr.bf16.mxu1 %v8587_v1  ;;  %v9066_v7 = vsel %vm5269_vm11, 4294967295, %v9065_v7  ;;  %v775_v10 = vadd.s32 64, %v5068_v3  ;;  %vm5284_vm13 = vmpackc.low %vm5238_vm6, %vm5238_vm6  ;;  %v9068_v11 = vmov 0  ;;  %v5290_v12 = vadd.s32 %v803_v58, %v5072_v5 }
  0x26   : > { %9067 = vst [vmem:[#allocation4_spill] sm:$0xff] %v9066_v7  ;;  %v9069_v11 = vsel %vm5284_vm13, 4294967295, %v9068_v11  ;;  %v5293_v13 = vadd.s32 %v804_v59, %v5072_v5  ;;  %v776_v14 = vadd.s32 72, %v5068_v3  ;;  %vm5304_vm15 = vmpackc.low %vm5254_vm7, %vm5254_vm7  ;;  %v9071_v15 = vmov 0 }
  0x27   : > { %9070 = vst [vmem:[#allocation5_spill] sm:$0xff] %v9069_v11  ;;  %v9072_v15 = vsel %vm5304_vm15, 4294967295, %v9071_v15  ;;  %v5310_v16 = vadd.s32 %v773_v62, %v5072_v5  ;;  %v5313_v17 = vadd.s32 %v774_v63, %v5072_v5  ;;  %v5316_v18 = vadd.s32 %v805_v0, %v5072_v5  ;;  %vm5323_vm3 = vmpackc.low %vm1023_vm1, %vm1023_vm1  ;;  %v393_v63 = vld [vmem:[%s5299_s27 + $0x2a8] sm:$0xff]  ;;  %v396_v0 = vld [vmem:[%s5299_s27 + $0x2bc] sm:$0xff] }
  0x28   : > { %4796 = vmatpush3.bf16.msra.mxu0 %v8587_v1  ;;  %4818 = vmatpush3.bf16.msra.mxu1 %v8587_v1  ;;  %9073 = vst [vmem:[#allocation6_spill] sm:$0xff] %v9072_v15  ;;  %v9074_v19 = vmov 0  ;;  %v5329_v20 = vadd.s32 %v806_v6, %v5072_v5  ;;  %v807_v21 = vadd.s32 320, %v5068_v3  ;;  %v808_v22 = vadd.s32 328, %v5068_v3  ;;  %vm5338_vm1 = vmpackc.low %vm1024_vm4, %vm1024_vm4 }
  0x29   : > { %4797 = vmatprep.subr.bf16.mxu0 %v8587_v1  ;;  %4819 = vmatprep.subr.bf16.mxu1 %v8587_v1  ;;  %v9075_v19 = vsel %vm5323_vm3, 4294967295, %v9074_v19  ;;  %v9077_v23 = vmov 0  ;;  %v5345_v24 = vadd.s32 %v775_v10, %v5072_v5  ;;  %v777_v26 = vadd.s32 80, %v5068_v3  ;;  %vm5359_vm6 = vmpackc.low %vm1055_vm8, %vm1055_vm8 }
  0x2a   : > { %9076 = vst [vmem:[#allocation7_spill] sm:$0xff] %v9075_v19  ;;  %v9078_v23 = vsel %vm5338_vm1, 4294967295, %v9077_v23  ;;  %v9080_v30 = vmov 0  ;;  %v5366_v31 = vadd.s32 %v776_v14, %v5072_v5  ;;  %v778_v33 = vadd.s32 88, %v5068_v3  ;;  %vm5378_vm8 = vmpackc.low %vm1056_vm10, %vm1056_vm10 }
  0x2b   : > { %9079 = vst [vmem:[#allocation8_spill] sm:$0xff] %v9078_v23  ;;  %v9081_v30 = vsel %vm5359_vm6, 4294967295, %v9080_v30  ;;  %v9083_v34 = vmov 0  ;;  %v809_v35 = vadd.s32 336, %v5068_v3  ;;  %vm9086_vm10 = vcmp.lt.s32.totalorder %v5216_v53, 1000 }
  0x2c   : > { %4798 = vmatpush3.bf16.msra.mxu0 %v8587_v1  ;;  %4820 = vmatpush3.bf16.msra.mxu1 %v8587_v1  ;;  %9082 = vst [vmem:[#allocation9_spill] sm:$0xff] %v9081_v30  ;;  %v9084_v34 = vsel %vm5378_vm8, 4294967295, %v9083_v34  ;;  %vm5393_vm0 = vmpackc.low %vm9086_vm10, %vm9086_vm10  ;;  %v9087_v38 = vmov 0  ;;  %v5399_v40 = vadd.s32 %v807_v21, %v5072_v5  ;;  %v5402_v41 = vadd.s32 %v808_v22, %v5072_v5 }
  0x2d   : > { %4827 = vmatprep.subr.bf16.mxu0 %v8587_v1  ;;  %4849 = vmatprep.subr.bf16.mxu1 %v8587_v1  ;;  %9085 = vst [vmem:[#allocation10_spill] sm:$0xff] %v9084_v34  ;;  %v9088_v38 = vsel %vm5393_vm0, 4294967295, %v9087_v38  ;;  %v810_v42 = vadd.s32 344, %v5068_v3  ;;  %v5409_v44 = vsel %vm5323_vm3, %v291_v27, 0  ;;  %v5413_v45 = vsel %vm5338_vm1, %v294_v29, 0  ;;  %v303_v27 = vld [vmem:[%s5299_s27 + $0x50] sm:$0xff] }
  0x2e   : > { %9089 = vst [vmem:[#allocation11_spill] sm:$0xff] %v9088_v38  ;;  %vm9090_vm10 = vcmp.lt.s32.totalorder %v5230_v57, 1000  ;;  %v9091_v46 = vmov 0  ;;  %v5424_v48 = vadd.s32 %v777_v26, %v5072_v5  ;;  %v9095_v53 = vmov 0  ;;  %v306_v29 = vld [vmem:[%s5299_s27 + $0x64] sm:$0xff] }
  0x2f   : > { %4400 = vmatmul.mubr.msk.bf16.vlgmr.msra.gmra.mrb[0].mxu0 %vm5208_vm2, %v8585_v28  ;;  %4404 = vmatmul.mubr.msk.bf16.vlgmr.msra.gmra.mrb[0].mxu1 %vm5269_vm11, %v8585_v28  ;;  %vm5418_vm12 = vmpackc.low %vm9090_vm10, %vm9090_vm10  ;;  %vm9094_vm10 = vcmp.lt.s32.totalorder %v5243_v61, 1000  ;;  %v5443_v54 = vadd.s32 %v778_v33, %v5072_v5  ;;  %v779_v55 = vadd.s32 96, %v5068_v3  ;;  %v780_v56 = vadd.s32 104, %v5068_v3 }
  0x30   : > { %4828 = vmatpush3.bf16.msra.mxu0 %v8587_v1  ;;  %4850 = vmatpush3.bf16.msra.mxu1 %v8587_v1  ;;  %v9092_v46 = vsel %vm5418_vm12, 4294967295, %v9091_v46  ;;  %vm5437_vm4 = vmpackc.low %vm9094_vm10, %vm9094_vm10  ;;  %v5449_v57 = vsel %vm5359_vm6, %v387_v36, 0  ;;  %v5453_v58 = vsel %vm5378_vm8, %v390_v37, 0  ;;  %vm9098_vm10 = vcmp.lt.s32.totalorder %v5261_v4, 1000 }
  0x31   : > { %4829 = vmatprep.subr.bf16.mxu0 %v8587_v1  ;;  %4851 = vmatprep.subr.bf16.mxu1 %v8587_v1  ;;  %9093 = vst [vmem:[#allocation12_spill] sm:$0xff] %v9092_v46  ;;  %v9096_v53 = vsel %vm5437_vm4, 4294967295, %v9095_v53  ;;  %vm5458_vm7 = vmpackc.low %vm9098_vm10, %vm9098_vm10  ;;  %v9099_v59 = vmov 0  ;;  %v5463_v60 = vadd.s32 %v809_v35, %v5072_v5  ;;  %v811_v61 = vadd.s32 352, %v5068_v3  ;;  %v426_v46 = vld [vmem:[%s5299_s27 + $0x384] sm:$0xff] }
  0x32   : > { %4406 = vmatprep.mubr.msk.bf16.mxu0 %vm5284_vm13, %v8585_v28  ;;  %4410 = vmatprep.mubr.msk.bf16.mxu1 %vm5304_vm15, %v8585_v28  ;;  %9097 = vst [vmem:[#allocation13_spill] sm:$0xff] %v9096_v53  ;;  %v9100_v59 = vsel %vm5458_vm7, 4294967295, %v9099_v59  ;;  %vm9102_vm10 = vcmp.lt.s32.totalorder %v5275_v8, 1000  ;;  %v9103_v2 = vmov 0  ;;  %v5482_v4 = vadd.s32 %v810_v42, %v5072_v5  ;;  %v408_v28 = vld [vmem:[%s5299_s27 + $0x30c] sm:$0xff] }
  0x33   : > { %9101 = vst [vmem:[#allocation14_spill] sm:$0xff] %v9100_v59  ;;  %vm5475_vm14 = vmpackc.low %vm9102_vm10, %vm9102_vm10  ;;  %v5490_v8 = vsel %vm5393_vm0, %v297_v49, 0  ;;  %v5494_v10 = vsel %vm5418_vm12, %v300_v50, 0  ;;  %vm9106_vm10 = vcmp.lt.s32.totalorder %v5278_v9, 1000  ;;  %v9107_v14 = vmov 0 }
  0x34   : > { %4830 = vmatpush3.bf16.msra.mxu0 %v8587_v1  ;;  %4852 = vmatpush3.bf16.msra.mxu1 %v8587_v1  ;;  %v9104_v2 = vsel %vm5475_vm14, 4294967295, %v9103_v2  ;;  %vm5499_vm6 = vmpackc.low %vm9106_vm10, %vm9106_vm10  ;;  %v812_v21 = vadd.s32 360, %v5068_v3  ;;  %vm9110_vm12 = vcmp.lt.s32.totalorder %v5290_v12, 1000  ;;  %v9111_v9 = vmov 0 }
  0x35   : > { %9105 = vst [vmem:[#allocation15_spill] sm:$0xff] %v9104_v2  ;;  %4831 = vmatprep.subr.bf16.mxu0 %v8587_v1  ;;  %4853 = vmatprep.subr.bf16.mxu1 %v8587_v1  ;;  %v9108_v14 = vsel %vm5499_vm6, 4294967295, %v9107_v14  ;;  %vm5514_vm10 = vmpackc.low %vm9110_vm12, %vm9110_vm12  ;;  %v5520_v33 = vadd.s32 %v779_v55, %v5072_v5  ;;  %v5523_v35 = vadd.s32 %v780_v56, %v5072_v5  ;;  %v5527_v36 = vsel %vm5437_vm4, %v393_v63, 0  ;;  %v399_v55 = vld [vmem:[%s5299_s27 + $0x2d0] sm:$0xff]  ;;  %v402_v56 = vld [vmem:[%s5299_s27 + $0x2e4] sm:$0xff] }
  0x36   : > { %9109 = vst [vmem:[#allocation16_spill] sm:$0xff] %v9108_v14  ;;  %v9112_v9 = vsel %vm5514_vm10, 4294967295, %v9111_v9  ;;  %v5531_v12 = vsel %vm5458_vm7, %v396_v0, 0  ;;  %vm9114_vm12 = vcmp.lt.s32.totalorder %v5293_v13, 1000  ;;  %v9115_v37 = vmov 0 }
  0x37   : > { %9113 = vst [vmem:[#allocation17_spill] sm:$0xff] %v9112_v9  ;;  %vm5536_vm0 = vmpackc.low %vm9114_vm12, %vm9114_vm12  ;;  %v5542_v42 = vadd.s32 %v811_v61, %v5072_v5  ;;  %v781_v49 = vadd.s32 112, %v5068_v3  ;;  %vm9118_vm12 = vcmp.lt.s32.totalorder %v5310_v16, 1000  ;;  %v9119_v61 = vmov 0  ;;  %v417_v16 = vld [vmem:[%s5299_s27 + $0x348] sm:$0xff] }
  0x38   : > { %v9116_v37 = vsel %vm5536_vm0, 4294967295, %v9115_v37  ;;  %4832 = vmatpush3.bf16.msra.mxu0 %v8587_v1  ;;  %4854 = vmatpush3.bf16.msra.mxu1 %v8587_v1  ;;  %vm5556_vm8 = vmpackc.low %vm9118_vm12, %vm9118_vm12  ;;  %v782_v63 = vadd.s32 120, %v5068_v3  ;;  %vm9122_vm4 = vcmp.lt.s32.totalorder %v5175_v43, 1000  ;;  %vm9123_vm1 = vcmp.eq.s32.totalorder %v5068_v3, %v5159_v39 }
  0x39   : > { %9117 = vst [vmem:[#allocation18_spill] sm:$0xff] %v9116_v37  ;;  %v9120_v61 = vsel %vm5556_vm8, 4294967295, %v9119_v61  ;;  %4833 = vmatprep.subr.bf16.mxu0 %v8587_v1  ;;  %4855 = vmatprep.subr.bf16.mxu1 %v8587_v1  ;;  %vm5569_vm3 = vmand %vm9123_vm1, %vm9122_vm4  ;;  %vm9126_vm12 = vcmp.lt.s32.totalorder %v5213_v52, 1000  ;;  %vm9127_vm7 = vcmp.eq.s32.totalorder %v5068_v3, %v5194_v47  ;;  %v5584_v50 = vsel %vm5475_vm14, %v303_v27, 0 }
  0x3a   : > { %9121 = vst [vmem:[#allocation19_spill] sm:$0xff] %v9120_v61  ;;  %vm5578_vm15 = vmand %vm9127_vm7, %vm9126_vm12  ;;  %v5588_v39 = vsel %vm5499_vm6, %v306_v29, 0  ;;  %vm9130_vm1 = vcmp.lt.s32.totalorder %v5313_v17, 1000  ;;  %v9131_v43 = vmov 0  ;;  %v5598_v47 = vadd.s32 %v812_v21, %v5072_v5  ;;  %v309_v29 = vld [vmem:[%s5299_s27 + $0x78] sm:$0xff]  ;;  %v312_v17 = vld [vmem:[%s5299_s27 + $0x8c] sm:$0xff] }
  0x3b   : > { %vm5593_vm4 = vmpackc.low %vm9130_vm1, %vm9130_vm1  ;;  %v813_v52 = vadd.s32 368, %v5068_v3  ;;  %vm9134_vm7 = vcmp.lt.s32.totalorder %v5316_v18, 1000  ;;  %v9135_v22 = vmov 0  ;;  %v5618_v21 = vsel %vm5514_vm10, %v399_v55, 0 }
  0x3c   : > { %v9132_v43 = vsel %vm5593_vm4, 4294967295, %v9131_v43  ;;  %vm5610_vm12 = vmpackc.low %vm9134_vm7, %vm9134_vm7  ;;  %v5622_v27 = vsel %vm5536_vm0, %v402_v56, 0  ;;  %vm9138_vm14 = vcmp.lt.s32.totalorder %v5329_v20, 1000  ;;  %v9139_v18 = vmov 0  ;;  %4834 = vmatpush3.bf16.msra.mxu0 %v8587_v1  ;;  %4856 = vmatpush3.bf16.msra.mxu1 %v8587_v1  ;;  %v405_v56 = vld [vmem:[%s5299_s27 + $0x2f8] sm:$0xff] }
  0x3d   : > { %9133 = vst [vmem:[#allocation20_spill] sm:$0xff] %v9132_v43  ;;  %v9136_v22 = vsel %vm5610_vm12, 4294967295, %v9135_v22  ;;  %vm5627_vm13 = vmpackc.low %vm9138_vm14, %vm9138_vm14  ;;  %v5633_v13 = vadd.s32 %v781_v49, %v5072_v5  ;;  %v814_v62 = vadd.s32 376, %v5068_v3  ;;  %vm9142_vm14 = vcmp.lt.s32.totalorder %v5345_v24, 1000  ;;  %4835 = vmatprep.subr.bf16.mxu0 %v8587_v1  ;;  %4857 = vmatprep.subr.bf16.mxu1 %v8587_v1  ;;  %v315_v1 = vld [vmem:[%s5299_s27 + $0xa0] sm:$0xff] }
  0x3e   : > { %9137 = vst [vmem:[#allocation21_spill] sm:$0xff] %v9136_v22  ;;  %v9140_v18 = vsel %vm5627_vm13, 4294967295, %v9139_v18  ;;  %vm5647_vm7 = vmpackc.low %vm9142_vm14, %vm9142_vm14  ;;  %v9143_v49 = vmov 0  ;;  %v5652_v26 = vadd.s32 %v782_v63, %v5072_v5  ;;  %v783_v6 = vadd.s32 128, %v5068_v3 }
  0x3f   : > { %9141 = vst [vmem:[#allocation22_spill] sm:$0xff] %v9140_v18  ;;  %v9144_v49 = vsel %vm5647_vm7, 4294967295, %v9143_v49  ;;  %v5659_v55 = vsel %vm5556_vm8, %v309_v29, 0  ;;  %v5663_v24 = vsel %vm5593_vm4, %v312_v17, 0  ;;  %vm9146_vm14 = vcmp.lt.s32.totalorder %v5366_v31, 1000  ;;  %v318_v31 = vld [vmem:[%s5299_s27 + $0xb4] sm:$0xff] }
  0x40   : > { %9145 = vst [vmem:[#allocation23_spill] sm:$0xff] %v9144_v49  ;;  %vm5668_vm6 = vmpackc.low %vm9146_vm14, %vm9146_vm14  ;;  %v9147_v63 = vmov 0  ;;  %v5674_v20 = vadd.s32 %v813_v52, %v5072_v5  ;;  %vm9150_vm14 = vcmp.lt.s32.totalorder %v5399_v40, 1000  ;;  %v9151_v43 = vmov 0  ;;  %v414_v18 = vld [vmem:[%s5299_s27 + $0x334] sm:$0xff] }
  0x41   : > { %v9148_v63 = vsel %vm5668_vm6, 4294967295, %v9147_v63  ;;  %vm5685_vm4 = vmpackc.low %vm9150_vm14, %vm9150_vm14  ;;  %v784_v52 = vadd.s32 136, %v5068_v3  ;;  %v815_v61 = vadd.s32 384, %v5068_v3  ;;  %v5693_v29 = vsel %vm5610_vm12, %v405_v56, 0  ;;  %v411_v56 = vld [vmem:[%s5299_s27 + $0x320] sm:$0xff] }
  0x42   : > { %9149 = vst [vmem:[#allocation24_spill] sm:$0xff] %v9148_v63  ;;  %v9152_v43 = vsel %vm5685_vm4, 4294967295, %v9151_v43  ;;  %v5697_v17 = vsel %vm5627_vm13, %v408_v28, 0  ;;  %vm9154_vm1 = vcmp.lt.s32.totalorder %v5402_v41, 1000  ;;  %v9155_v40 = vmov 0  ;;  %v321_v63 = vld [vmem:[%s5299_s27 + $0xc8] sm:$0xff] }
  0x43   : > { %9153 = vst [vmem:[#allocation25_spill] sm:$0xff] %v9152_v43  ;;  %vm5702_vm8 = vmpackc.low %vm9154_vm1, %vm9154_vm1  ;;  %v5708_v37 = vadd.s32 %v814_v62, %v5072_v5  ;;  %v9158_v9 = vmov 1065369472   ;;  %vm9159_vm1 = vcmp.lt.s32.totalorder %v5424_v48, 1000  ;;  %v9160_v62 = vmov 0 }
  0x44   : > { %v9156_v40 = vsel %vm5702_vm8, 4294967295, %v9155_v40  ;;  %4836 = vmatpush3.bf16.msra.mxu0 %v9158_v9  ;;  %4858 = vmatpush3.bf16.msra.mxu1 %v9158_v9  ;;  %vm5721_vm14 = vmpackc.low %vm9159_vm1, %vm9159_vm1  ;;  %v5727_v22 = vadd.s32 %v783_v6, %v5072_v5  ;;  %v5733_v28 = vsel %vm5647_vm7, %v315_v1, 0  ;;  %v5737_v48 = vsel %vm5668_vm6, %v318_v31, 0  ;;  %v324_v31 = vld [vmem:[%s5299_s27 + $0xdc] sm:$0xff] }
  0x45   : > { %9157 = vst [vmem:[#allocation26_spill] sm:$0xff] %v9156_v40  ;;  %v9161_v62 = vsel %vm5721_vm14, 4294967295, %v9160_v62  ;;  %4837 = vmatprep.subr.bf16.mxu0 %v9158_v9  ;;  %4859 = vmatprep.subr.bf16.mxu1 %v9158_v9  ;;  %vm9163_vm1 = vcmp.lt.s32.totalorder %v5443_v54, 1000  ;;  %v9164_v41 = vmov 0  ;;  %v816_v6 = vadd.s32 392, %v5068_v3  ;;  %v420_v40 = vld [vmem:[%s5299_s27 + $0x35c] sm:$0xff] }
  0x46   : > { %9162 = vst [vmem:[#allocation27_spill] sm:$0xff] %v9161_v62  ;;  %vm5742_vm12 = vmpackc.low %vm9163_vm1, %vm9163_vm1  ;;  %vm9167_vm6 = vcmp.lt.s32.totalorder %v5463_v60, 1000  ;;  %v9168_v54 = vmov 0  ;;  %v5762_v14 = vadd.s32 %v784_v52, %v5072_v5  ;;  %v5765_v2 = vadd.s32 %v815_v61, %v5072_v5  ;;  %v330_v62 = vld [vmem:[%s5299_s27 + $0x104] sm:$0xff] }
  0x47   : > { %v9165_v41 = vsel %vm5742_vm12, 4294967295, %v9164_v41  ;;  %vm5757_vm1 = vmpackc.low %vm9167_vm6, %vm9167_vm6  ;;  %v5769_v49 = vsel %vm5685_vm4, %v411_v56, 0  ;;  %v5773_v1 = vsel %vm5702_vm8, %v414_v18, 0  ;;  %vm9171_vm13 = vcmp.lt.s32.totalorder %v5482_v4, 1000 }
  0x48   : > { %9166 = vst [vmem:[#allocation28_spill] sm:$0xff] %v9165_v41  ;;  %v9169_v54 = vsel %vm5757_vm1, 4294967295, %v9168_v54  ;;  %vm5778_vm6 = vmpackc.low %vm9171_vm13, %vm9171_vm13  ;;  %v9172_v60 = vmov 0  ;;  %v785_v61 = vadd.s32 144, %v5068_v3  ;;  %4838 = vmatpush3.bf16.msra.mxu0 %v9158_v9  ;;  %4860 = vmatpush3.bf16.msra.mxu1 %v9158_v9  ;;  %v9175_v18 = vmov 0  ;;  %v423_v41 = vld [vmem:[%s5299_s27 + $0x370] sm:$0xff] }
  0x49   : > { %9170 = vst [vmem:[#allocation29_spill] sm:$0xff] %v9169_v54  ;;  %v9173_v60 = vsel %vm5778_vm6, 4294967295, %v9172_v60  ;;  %vm5789_vm8 = vmpackc.low %vm5569_vm3, %vm5569_vm3  ;;  %v9178_v4 = vmov 0  ;;  %vm9181_vm3 = vcmp.lt.s32.totalorder %v5520_v33, 1000  ;;  %v9182_v0 = vmov 0  ;;  %4839 = vmatprep.subr.bf16.mxu0 %v9158_v9  ;;  %4861 = vmatprep.subr.bf16.mxu1 %v9158_v9 }
  0x4a   : > { %9174 = vst [vmem:[#allocation30_spill] sm:$0xff] %v9173_v60  ;;  %v9176_v18 = vsel %vm5789_vm8, 4294967295, %v9175_v18  ;;  %vm5796_vm13 = vmpackc.low %vm5578_vm15, %vm5578_vm15  ;;  %v786_v43 = vadd.s32 152, %v5068_v3  ;;  %v5819_v52 = vsel %vm5721_vm14, %v321_v63, 0  ;;  %v5823_v33 = vsel %vm5742_vm12, %v324_v31, 0  ;;  %v327_v31 = vld [vmem:[%s5299_s27 + $0xf0] sm:$0xff] }
  0x4b   : > { %9177 = vst [vmem:[#allocation31_spill] sm:$0xff] %v9176_v18  ;;  %v9179_v4 = vsel %vm5796_vm13, 4294967295, %v9178_v4  ;;  %vm5809_vm7 = vmpackc.low %vm9181_vm3, %vm9181_vm3  ;;  %vm9185_vm3 = vcmp.lt.s32.totalorder %v5523_v35, 1000  ;;  %v9186_v56 = vmov 0  ;;  %v5833_v59 = vadd.s32 %v816_v6, %v5072_v5  ;;  %v435_v18 = vld [vmem:[%s5299_s27 + $0x3c0] sm:$0xff] }
  0x4c   : > { %9180 = vst [vmem:[#allocation32_spill] sm:$0xff] %v9179_v4  ;;  %v9183_v0 = vsel %vm5809_vm7, 4294967295, %v9182_v0  ;;  %vm5828_vm15 = vmpackc.low %vm9185_vm3, %vm9185_vm3  ;;  %v817_v53 = vadd.s32 400, %v5068_v3  ;;  %vm9189_vm12 = vcmp.lt.s32.totalorder %v5542_v42, 1000  ;;  %v9190_v35 = vmov 0  ;;  %4840 = vmatpush3.bf16.msra.mxu0 %v9158_v9  ;;  %4862 = vmatpush3.bf16.msra.mxu1 %v9158_v9 }
  0x4d   : > { %9184 = vst [vmem:[#allocation33_spill] sm:$0xff] %v9183_v0  ;;  %v9187_v56 = vsel %vm5828_vm15, 4294967295, %v9186_v56  ;;  %vm5845_vm3 = vmpackc.low %vm9189_vm12, %vm9189_vm12  ;;  %v5853_v6 = vsel %vm5757_vm1, %v417_v16, 0  ;;  %v5857_v63 = vsel %vm5778_vm6, %v420_v40, 0  ;;  %vm9193_vm0 = vcmp.lt.s32.totalorder %v5598_v47, 1000  ;;  %4841 = vmatprep.subr.bf16.mxu0 %v9158_v9  ;;  %4863 = vmatprep.subr.bf16.mxu1 %v9158_v9  ;;  %v336_v0 = vld [vmem:[%s5299_s27 + $0x12c] sm:$0xff] }
  0x4e   : > { %9188 = vst [vmem:[#allocation34_spill] sm:$0xff] %v9187_v56  ;;  %v9191_v35 = vsel %vm5845_vm3, 4294967295, %v9190_v35  ;;  %vm5864_vm12 = vmpackc.low %vm9193_vm0, %vm9193_vm0  ;;  %v9194_v42 = vmov 0  ;;  %v5869_v38 = vadd.s32 %v785_v61, %v5072_v5  ;;  %v818_v54 = vadd.s32 408, %v5068_v3 }
  0x4f   : > { %9192 = vst [vmem:[#allocation35_spill] sm:$0xff] %v9191_v35  ;;  %v9195_v42 = vsel %vm5864_vm12, 4294967295, %v9194_v42  ;;  %vm9197_vm0 = vcmp.lt.s32.totalorder %v5633_v13, 1000  ;;  %v9198_v61 = vmov 0  ;;  %v5886_v16 = vadd.s32 %v786_v43, %v5072_v5  ;;  %v432_v35 = vld [vmem:[%s5299_s27 + $0x3ac] sm:$0xff] }
  0x50   : > { %9196 = vst [vmem:[#allocation36_spill] sm:$0xff] %v9195_v42  ;;  %vm5881_vm4 = vmpackc.low %vm9197_vm0, %vm9197_vm0  ;;  %v787_v60 = vadd.s32 160, %v5068_v3  ;;  %v5893_v40 = vsel %vm5809_vm7, %v327_v31, 0  ;;  %v5897_v13 = vsel %vm5828_vm15, %v330_v62, 0  ;;  %vm9201_vm0 = vcmp.lt.s32.totalorder %v5652_v26, 1000  ;;  %v333_v62 = vld [vmem:[%s5299_s27 + $0x118] sm:$0xff]  ;;  %4842 = vmatpush3.bf16.msra.mxu0 %v9158_v9  ;;  %4864 = vmatpush3.bf16.msra.mxu1 %v9158_v9 }
  0x51   : > { %v9199_v61 = vsel %vm5881_vm4, 4294967295, %v9198_v61  ;;  %vm5902_vm14 = vmpackc.low %vm9201_vm0, %vm9201_vm0  ;;  %v9202_v43 = vmov 0  ;;  %v5908_v47 = vadd.s32 %v817_v53, %v5072_v5  ;;  %v5914_v56 = vsel %vm5845_vm3, %v423_v41, 0  ;;  %v429_v41 = vld [vmem:[%s5299_s27 + $0x398] sm:$0xff] }
  0x52   : > { %9200 = vst [vmem:[#allocation37_spill] sm:$0xff] %v9199_v61  ;;  %v9203_v43 = vsel %vm5902_vm14, 4294967295, %v9202_v43  ;;  %v5918_v26 = vsel %vm5864_vm12, %v426_v46, 0  ;;  %vm9205_vm0 = vcmp.lt.s32.totalorder %v5674_v20, 1000  ;;  %v9206_v34 = vmov 0 }
  0x53   : > { %9204 = vst [vmem:[#allocation38_spill] sm:$0xff] %v9203_v43  ;;  %vm5925_vm6 = vmpackc.low %vm9205_vm0, %vm9205_vm0  ;;  %v788_v53 = vadd.s32 168, %v5068_v3  ;;  %vm9209_vm3 = vcmp.lt.s32.totalorder %v5708_v37, 1000  ;;  %v9210_v46 = vmov 0  ;;  %v5943_v20 = vadd.s32 %v818_v54, %v5072_v5 }
  0x54   : > { %v9207_v34 = vsel %vm5925_vm6, 4294967295, %v9206_v34  ;;  %vm5937_vm12 = vmpackc.low %vm9209_vm3, %vm9209_vm3  ;;  %v819_v42 = vadd.s32 416, %v5068_v3  ;;  %vm9213_vm3 = vcmp.lt.s32.totalorder %v5727_v22, 1000  ;;  %v9214_v30 = vmov 0  ;;  %v339_v22 = vld [vmem:[%s5299_s27 + $0x140] sm:$0xff] }
  0x55   : > { %9208 = vst [vmem:[#allocation39_spill] sm:$0xff] %v9207_v34  ;;  %v9211_v46 = vsel %vm5937_vm12, 4294967295, %v9210_v46  ;;  %vm5955_vm0 = vmpackc.low %vm9213_vm3, %vm9213_vm3  ;;  %v5961_v54 = vadd.s32 %v787_v60, %v5072_v5  ;;  %v9216_v9 = vcombine.high %v5409_v44, %v5413_v45  ;;  %v9217_v37 = vcombine.high %v5449_v57, %v5453_v58 }
  0x56   : > { %9212 = vst [vmem:[#allocation40_spill] sm:$0xff] %v9211_v46  ;;  %v9215_v30 = vsel %vm5955_vm0, 4294967295, %v9214_v30  ;;  %v5973_v31 = vsel %vm5881_vm4, %v333_v62, 0  ;;  %v5977_v60 = vsel %vm5902_vm14, %v336_v0, 0  ;;  %vm9218_vm3 = vcmp.lt.s32.totalorder %v5762_v14, 1000 }
  0x57   : > { %3776 = vmatprep.subr.bf16.mxu0 %v9216_v9  ;;  %3817 = vmatprep.subr.bf16.mxu1 %v9217_v37  ;;  %vm5982_vm15 = vmpackc.low %vm9218_vm3, %vm9218_vm3  ;;  %v9219_v9 = vmov 0  ;;  %v5989_v37 = vsel %vm5925_vm6, %v429_v41, 0  ;;  %v5993_v62 = vsel %vm5937_vm12, %v432_v35, 0  ;;  %vm9222_vm14 = vcmp.lt.s32.totalorder %v5765_v2, 1000  ;;  %v342_v35 = vld [vmem:[%s5299_s27 + $0x154] sm:$0xff]  ;;  %v348_v2 = vld [vmem:[%s5299_s27 + $0x17c] sm:$0xff] }
  0x58   : > { %v9220_v9 = vsel %vm5982_vm15, 4294967295, %v9219_v9  ;;  %vm5999_vm4 = vmpackc.low %vm9222_vm14, %vm9222_vm14  ;;  %v9223_v14 = vmov 0  ;;  %v6004_v0 = vadd.s32 %v788_v53, %v5072_v5  ;;  %v820_v41 = vadd.s32 424, %v5068_v3 }
  0x59   : > { %9221 = vst [vmem:[#allocation41_spill] sm:$0xff] %v9220_v9  ;;  %v9224_v14 = vsel %vm5999_vm4, 4294967295, %v9223_v14  ;;  %v9225_v34 = vmov 1.0|1.0   ;;  %vm9226_vm14 = vcmp.lt.s32.totalorder %v5833_v59, 1000  ;;  %v9227_v53 = vmov 0 }
  0x5a   : > { %4408 = vmatmul.mubr.msk.bf16.vlgmr.msra.gmra.mrb[4].mxu0 %vm5789_vm8, %v9225_v34  ;;  %4412 = vmatmul.mubr.msk.bf16.vlgmr.msra.gmra.mrb[4].mxu1 %vm5796_vm13, %v9225_v34  ;;  %vm6019_vm3 = vmpackc.low %vm9226_vm14, %vm9226_vm14  ;;  %v947_v46 = vadd.s32 %v819_v42, %v5072_v5  ;;  %v789_v43 = vadd.s32 176, %v5068_v3  ;;  %v9230_v61 = vcombine.low %v5409_v44, %v5413_v45  ;;  %v9231_v59 = vcombine.low %v5449_v57, %v5453_v58  ;;  %v438_v42 = vld [vmem:[%s5299_s27 + $0x3d4] sm:$0xff] }
  0x5b   : > { %v9228_v53 = vsel %vm6019_vm3, 4294967295, %v9227_v53  ;;  %vm9232_vm14 = vcmp.lt.s32.totalorder %v5869_v38, 1000  ;;  %v9233_v23 = vmov 0  ;;  %v790_v44 = vadd.s32 184, %v5068_v3  ;;  %4734 = vmatprep.mubr.msk.bf16.mxu0 %vm5115_vm5, %v9225_v34  ;;  %4738 = vmatprep.mubr.msk.bf16.mxu1 %vm5139_vm9, %v9225_v34 }
  0x5c   : > { %9229 = vst [vmem:[#allocation42_spill] sm:$0xff] %v9228_v53  ;;  %3777 = vmatpush1.bf16.msra.mxu0 %v9230_v61  ;;  %3818 = vmatpush1.bf16.msra.mxu1 %v9231_v59  ;;  %vm6041_vm7 = vmpackc.low %vm9232_vm14, %vm9232_vm14  ;;  %v9235_v45 = vcombine.high %v5490_v8, %v5494_v10  ;;  %v9236_v57 = vcombine.high %v5527_v36, %v5531_v12  ;;  %v6059_v61 = vsel %vm5955_vm0, %v339_v22, 0  ;;  %v345_v59 = vld [vmem:[%s5299_s27 + $0x168] sm:$0xff]  ;;  %vm9237_vm14 = vcmp.lt.s32.totalorder %v5886_v16, 1000 }
  0x5d   : > { %v9234_v23 = vsel %vm6041_vm7, 4294967295, %v9233_v23  ;;  %vm6066_vm12 = vmpackc.low %vm9237_vm14, %vm9237_vm14  ;;  %v6073_v38 = vsel %vm5982_vm15, %v342_v35, 0  ;;  %v948_v22 = vadd.s32 %v820_v41, %v5072_v5  ;;  %v822_v58 = vadd.s32 440, %v5068_v3  ;;  %v441_v53 = vld [vmem:[%s5299_s27 + $0x3e8] sm:$0xff] }
  0x5e   : > { %3778 = vmatprep.subr.bf16.mxu0 %v9235_v45  ;;  %3819 = vmatprep.subr.bf16.mxu1 %v9236_v57  ;;  %v9238_v45 = vmov 0  ;;  %v821_v57 = vadd.s32 432, %v5068_v3  ;;  %v6086_v16 = vsel %vm5999_vm4, %v435_v18, 0  ;;  %v6090_v35 = vsel %vm6019_vm3, %v438_v42, 0 }
  0x5f   : > { %v9239_v45 = vsel %vm6066_vm12, 4294967295, %v9238_v45  ;;  %v917_v41 = vadd.s32 %v789_v43, %v5072_v5  ;;  %v9241_v4 = vcombine.low %v5490_v8, %v5494_v10  ;;  %v9242_v9 = vcombine.low %v5527_v36, %v5531_v12 }
  0x60   : > { %9240 = vst [vmem:[#allocation43_spill] sm:$0xff] %v9239_v45  ;;  %v6101_v18 = vsel %vm6041_vm7, %v345_v59, 0  ;;  %v6105_v42 = vsel %vm6066_vm12, %v348_v2, 0  ;;  %vm9243_vm14 = vcmp.lt.s32.totalorder %v5908_v47, 1000  ;;  %v9244_v8 = vmov 0 }
  0x61   : > { %3779 = vmatpush1.bf16.msra.mxu0 %v9241_v4  ;;  %3820 = vmatpush1.bf16.msra.mxu1 %v9242_v9  ;;  %vm6111_vm6 = vmpackc.low %vm9243_vm14, %vm9243_vm14  ;;  %v918_v10 = vadd.s32 %v790_v44, %v5072_v5  ;;  %v791_v36 = vadd.s32 192, %v5068_v3  ;;  %v9247_v12 = vcombine.high %v5584_v50, %v5588_v39  ;;  %v9248_v4 = vcombine.high %v5618_v21, %v5622_v27  ;;  %v444_v9 = vld [vmem:[%s5299_s27 + $0x3fc] sm:$0xff] }
  0x62   : > { %v9245_v8 = vsel %vm6111_vm6, 4294967295, %v9244_v8  ;;  %vm9249_vm14 = vcmp.lt.s32.totalorder %v5943_v20, 1000  ;;  %v9250_v2 = vmov 0  ;;  %v949_v44 = vadd.s32 %v821_v57, %v5072_v5 }
  0x63   : > { %9246 = vst [vmem:[#allocation44_spill] sm:$0xff] %v9245_v8  ;;  %3780 = vmatprep.subr.bf16.mxu0 %v9247_v12  ;;  %3821 = vmatprep.subr.bf16.mxu1 %v9248_v4  ;;  %vm6131_vm12 = vmpackc.low %vm9249_vm14, %vm9249_vm14  ;;  %v792_v59 = vadd.s32 200, %v5068_v3  ;;  %v351_v4 = vld [vmem:[%s5299_s27 + $0x190] sm:$0xff]  ;;  %vm9253_vm7 = vcmp.lt.s32.totalorder %v5961_v54, 1000  ;;  %v9254_v47 = vmov 0  ;;  %v950_v20 = vadd.s32 %v822_v58, %v5072_v5  ;;  %v354_v12 = vld [vmem:[%s5299_s27 + $0x1a4] sm:$0xff] }
  0x64   : > { %v9251_v2 = vsel %vm6131_vm12, 4294967295, %v9250_v2  ;;  %vm6143_vm3 = vmpackc.low %vm9253_vm7, %vm9253_vm7  ;;  %v823_v43 = vadd.s32 448, %v5068_v3  ;;  %v6155_v54 = vsel %vm6111_vm6, %v441_v53, 0  ;;  %vm9257_vm7 = vcmp.lt.s32.totalorder %v6004_v0, 1000 }
  0x65   : > { %9252 = vst [vmem:[#allocation45_spill] sm:$0xff] %v9251_v2  ;;  %v9255_v47 = vsel %vm6143_vm3, 4294967295, %v9254_v47  ;;  %vm6161_vm14 = vmpackc.low %vm9257_vm7, %vm9257_vm7  ;;  %v9258_v58 = vmov 0  ;;  %v9261_v57 = vcombine.low %v5584_v50, %v5588_v39  ;;  %v9262_v45 = vcombine.low %v5618_v21, %v5622_v27 }
  0x66   : > { %9256 = vst [vmem:[#allocation46_spill] sm:$0xff] %v9255_v47  ;;  %v9259_v58 = vsel %vm6161_vm14, 4294967295, %v9258_v58  ;;  %v6173_v53 = vsel %vm6131_vm12, %v444_v9, 0  ;;  %vm9263_vm6 = vcmp.lt.s32.totalorder %v947_v46, 1000  ;;  %v9264_v0 = vmov 0 }
  0x67   : > { %9260 = vst [vmem:[#allocation47_spill] sm:$0xff] %v9259_v58  ;;  %3781 = vmatpush1.bf16.msra.mxu0 %v9261_v57  ;;  %3822 = vmatpush1.bf16.msra.mxu1 %v9262_v45  ;;  %vm6177_vm7 = vmpackc.low %vm9263_vm6, %vm9263_vm6  ;;  %v919_v8 = vadd.s32 %v791_v36, %v5072_v5  ;;  %v824_v50 = vadd.s32 456, %v5068_v3  ;;  %v9267_v39 = vcombine.high %v5659_v55, %v5663_v24  ;;  %v6193_v46 = vsel %vm6143_vm3, %v351_v4, 0  ;;  %v447_v45 = vld [vmem:[%s5299_s27 + $0x410] sm:$0xff]  ;;  %v450_v36 = vld [vmem:[%s5299_s27 + $0x424] sm:$0xff] }
  0x68   : > { %v9265_v0 = vsel %vm6177_vm7, 4294967295, %v9264_v0  ;;  %v9268_v27 = vcombine.high %v5693_v29, %v5697_v17  ;;  %vm9269_vm6 = vcmp.lt.s32.totalorder %v948_v22, 1000  ;;  %v9270_v9 = vmov 0 }
  0x69   : > { %9266 = vst [vmem:[#allocation48_spill] sm:$0xff] %v9265_v0  ;;  %3782 = vmatprep.subr.bf16.mxu0 %v9267_v39  ;;  %vm6199_vm4 = vmpackc.low %vm9269_vm6, %vm9269_vm6  ;;  %vm1077_vm12 = vcmp.lt.s32.totalorder %v949_v44, 1000  ;;  %v920_v57 = vadd.s32 %v792_v59, %v5072_v5  ;;  %v6206_v39 = vsel %vm6161_vm14, %v354_v12, 0  ;;  %vm9273_vm15 = vcmp.lt.s32.totalorder %v917_v41, 1000  ;;  %v360_v12 = vld [vmem:[%s5299_s27 + $0x1cc] sm:$0xff] }
  0x6a   : > { %3823 = vmatprep.subr.bf16.mxu1 %v9268_v27  ;;  %v9271_v9 = vsel %vm6199_vm4, 4294967295, %v9270_v9  ;;  %v357_v27 = vld [vmem:[%s5299_s27 + $0x1b8] sm:$0xff]  ;;  %vm6211_vm3 = vmpackc.low %vm9273_vm15, %vm9273_vm15  ;;  %v9274_v4 = vmov 0  ;;  %v951_v22 = vadd.s32 %v823_v43, %v5072_v5  ;;  %v793_v21 = vadd.s32 208, %v5068_v3  ;;  %v456_v44 = vld [vmem:[%s5299_s27 + $0x44c] sm:$0xff] }
  0x6b   : > { %9272 = vst [vmem:[#allocation49_spill] sm:$0xff] %v9271_v9  ;;  %v9275_v4 = vsel %vm6211_vm3, 4294967295, %v9274_v4  ;;  %vm9277_vm6 = vcmp.lt.s32.totalorder %v918_v10, 1000  ;;  %v9278_v41 = vmov 0  ;;  %v952_v58 = vadd.s32 %v824_v50, %v5072_v5 }
  0x6c   : > { %9276 = vst [vmem:[#allocation50_spill] sm:$0xff] %v9275_v4  ;;  %vm6224_vm15 = vmpackc.low %vm9277_vm6, %vm9277_vm6  ;;  %v794_v43 = vadd.s32 216, %v5068_v3  ;;  %v9281_v2 = vcombine.low %v5659_v55, %v5663_v24  ;;  %v9282_v47 = vcombine.low %v5693_v29, %v5697_v17  ;;  %v6238_v10 = vsel %vm6177_vm7, %v447_v45, 0 }
  0x6d   : > { %v9279_v41 = vsel %vm6224_vm15, 4294967295, %v9278_v41  ;;  %v6242_v59 = vsel %vm6199_vm4, %v450_v36, 0  ;;  %vm6246_vm6 = vmpackc.low %vm1077_vm12, %vm1077_vm12  ;;  %v9283_v50 = vmov 0  ;;  %v825_v55 = vadd.s32 464, %v5068_v3 }
  0x6e   : > { %9280 = vst [vmem:[#allocation51_spill] sm:$0xff] %v9279_v41  ;;  %3783 = vmatpush1.bf16.msra.mxu0 %v9281_v2  ;;  %3824 = vmatpush1.bf16.msra.mxu1 %v9282_v47  ;;  %v9284_v50 = vsel %vm6246_vm6, 4294967295, %v9283_v50  ;;  %v9286_v24 = vcombine.high %v5733_v28, %v5737_v48  ;;  %v9287_v29 = vcombine.high %v5769_v49, %v5773_v1  ;;  %v6261_v47 = vsel %vm6211_vm3, %v357_v27, 0  ;;  %v453_v2 = vld [vmem:[%s5299_s27 + $0x438] sm:$0xff]  ;;  %v363_v41 = vld [vmem:[%s5299_s27 + $0x1e0] sm:$0xff] }
  0x6f   : > { %9285 = vst [vmem:[#allocation52_spill] sm:$0xff] %v9284_v50  ;;  %vm9288_vm12 = vcmp.lt.s32.totalorder %v950_v20, 1000  ;;  %v9289_v45 = vmov 0  ;;  %v921_v36 = vadd.s32 %v793_v21, %v5072_v5  ;;  %vm1079_vm7 = vcmp.lt.s32.totalorder %v951_v22, 1000 }
  0x70   : > { %3784 = vmatprep.subr.bf16.mxu0 %v9286_v24  ;;  %3825 = vmatprep.subr.bf16.mxu1 %v9287_v29  ;;  %vm6267_vm0 = vmpackc.low %vm9288_vm12, %vm9288_vm12  ;;  %v6274_v24 = vsel %vm6224_vm15, %v360_v12, 0  ;;  %v922_v27 = vadd.s32 %v794_v43, %v5072_v5  ;;  %v826_v29 = vadd.s32 472, %v5068_v3  ;;  %vm9292_vm12 = vcmp.lt.s32.totalorder %v919_v8, 1000 }
  0x71   : > { %v9290_v45 = vsel %vm6267_vm0, 4294967295, %v9289_v45  ;;  %vm6284_vm4 = vmpackc.low %vm9292_vm12, %vm9292_vm12  ;;  %v9293_v21 = vmov 0  ;;  %v953_v12 = vadd.s32 %v825_v55, %v5072_v5  ;;  %v9296_v43 = vcombine.low %v5733_v28, %v5737_v48 }
  0x72   : > { %9291 = vst [vmem:[#allocation53_spill] sm:$0xff] %v9290_v45  ;;  %v9294_v21 = vsel %vm6284_vm4, 4294967295, %v9293_v21  ;;  %v9297_v20 = vcombine.low %v5769_v49, %v5773_v1  ;;  %v6297_v8 = vsel %vm6246_vm6, %v453_v2, 0  ;;  %v6301_v17 = vsel %vm6267_vm0, %v456_v44, 0  ;;  %v366_v44 = vld [vmem:[%s5299_s27 + $0x1f4] sm:$0xff] }
  0x73   : > { %9295 = vst [vmem:[#allocation54_spill] sm:$0xff] %v9294_v21  ;;  %3785 = vmatpush1.bf16.msra.mxu0 %v9296_v43  ;;  %vm9298_vm12 = vcmp.lt.s32.totalorder %v920_v57, 1000  ;;  %v9299_v28 = vmov 0  ;;  %v954_v49 = vadd.s32 %v826_v29, %v5072_v5  ;;  %v795_v48 = vadd.s32 224, %v5068_v3  ;;  %v468_v21 = vld [vmem:[%s5299_s27 + $0x49c] sm:$0xff] }
  0x74   : > { %3826 = vmatpush1.bf16.msra.mxu1 %v9297_v20  ;;  %vm6306_vm15 = vmpackc.low %vm9298_vm12, %vm9298_vm12  ;;  %v9302_v1 = vcombine.high %v5819_v52, %v5823_v33  ;;  %v9303_v55 = vcombine.high %v5853_v6, %v5857_v63  ;;  %v9304_v29 = vmov 0  ;;  %vm1049_vm0 = vcmp.lt.s32.totalorder %v921_v36, 1000 }
  0x75   : > { %v9300_v28 = vsel %vm6306_vm15, 4294967295, %v9299_v28  ;;  %vm6325_vm12 = vmpackc.low %vm1079_vm7, %vm1079_vm7  ;;  %v796_v20 = vadd.s32 232, %v5068_v3  ;;  %vm9307_vm6 = vcmp.lt.s32.totalorder %v952_v58, 1000  ;;  %v9308_v57 = vmov 0 }
  0x76   : > { %9301 = vst [vmem:[#allocation55_spill] sm:$0xff] %v9300_v28  ;;  %3786 = vmatprep.subr.bf16.mxu0 %v9302_v1  ;;  %3827 = vmatprep.subr.bf16.mxu1 %v9303_v55  ;;  %v9305_v29 = vsel %vm6325_vm12, 4294967295, %v9304_v29  ;;  %v459_v1 = vld [vmem:[%s5299_s27 + $0x460] sm:$0xff]  ;;  %v462_v55 = vld [vmem:[%s5299_s27 + $0x474] sm:$0xff]  ;;  %vm6336_vm3 = vmpackc.low %vm9307_vm6, %vm9307_vm6  ;;  %vm1050_vm14 = vcmp.lt.s32.totalorder %v922_v27, 1000  ;;  %v923_v22 = vadd.s32 %v795_v48, %v5072_v5  ;;  %v827_v2 = vadd.s32 480, %v5068_v3 }
  0x77   : > { %9306 = vst [vmem:[#allocation56_spill] sm:$0xff] %v9305_v29  ;;  %v9309_v57 = vsel %vm6336_vm3, 4294967295, %v9308_v57  ;;  %v6346_v50 = vsel %vm6284_vm4, %v363_v41, 0  ;;  %v924_v58 = vadd.s32 %v796_v20, %v5072_v5  ;;  %v9311_v43 = vcombine.low %v5819_v52, %v5823_v33  ;;  %vm6361_vm6 = vmpackc.low %vm1049_vm0, %vm1049_vm0  ;;  %v465_v28 = vld [vmem:[%s5299_s27 + $0x488] sm:$0xff] }
  0x78   : > { %9310 = vst [vmem:[#allocation57_spill] sm:$0xff] %v9309_v57  ;;  %v9312_v48 = vcombine.low %v5853_v6, %v5857_v63  ;;  %v6357_v4 = vsel %vm6306_vm15, %v366_v44, 0  ;;  %v9313_v41 = vmov 0  ;;  %v828_v20 = vadd.s32 488, %v5068_v3  ;;  %vm6383_vm0 = vmpackc.low %vm1050_vm14, %vm1050_vm14 }
  0x79   : > { %3787 = vmatpush1.bf16.msra.mxu0 %v9311_v43  ;;  %v9314_v41 = vsel %vm6361_vm6, 4294967295, %v9313_v41  ;;  %v955_v52 = vadd.s32 %v827_v2, %v5072_v5  ;;  %v9316_v33 = vcombine.high %v5893_v40, %v5897_v13  ;;  %v9317_v63 = vcombine.high %v5914_v56, %v5918_v26 }
  0x7a   : > { %3828 = vmatpush1.bf16.msra.mxu1 %v9312_v48  ;;  %9315 = vst [vmem:[#allocation58_spill] sm:$0xff] %v9314_v41  ;;  %v6375_v6 = vsel %vm6325_vm12, %v459_v1, 0  ;;  %v6379_v36 = vsel %vm6336_vm3, %v462_v55, 0  ;;  %v9318_v2 = vmov 0  ;;  %v797_v44 = vadd.s32 240, %v5068_v3  ;;  %v369_v48 = vld [vmem:[%s5299_s27 + $0x208] sm:$0xff] }
  0x7b   : > { %3788 = vmatprep.subr.bf16.mxu0 %v9316_v33  ;;  %3829 = vmatprep.subr.bf16.mxu1 %v9317_v63  ;;  %v9319_v2 = vsel %vm6383_vm0, 4294967295, %v9318_v2  ;;  %vm9321_vm15 = vcmp.lt.s32.totalorder %v953_v12, 1000  ;;  %v9322_v1 = vmov 0  ;;  %v956_v27 = vadd.s32 %v828_v20, %v5072_v5  ;;  %v372_v63 = vld [vmem:[%s5299_s27 + $0x21c] sm:$0xff] }
  0x7c   : > { %9320 = vst [vmem:[#allocation59_spill] sm:$0xff] %v9319_v2  ;;  %vm6393_vm12 = vmpackc.low %vm9321_vm15, %vm9321_vm15  ;;  %v798_v55 = vadd.s32 248, %v5068_v3  ;;  %vm9325_vm14 = vcmp.lt.s32.totalorder %v954_v49, 1000  ;;  %v9326_v12 = vmov 0  ;;  %v925_v45 = vadd.s32 %v797_v44, %v5072_v5 }
  0x7d   : > { %v9323_v1 = vsel %vm6393_vm12, 4294967295, %v9322_v1  ;;  %vm6404_vm7 = vmpackc.low %vm9325_vm14, %vm9325_vm14  ;;  %v829_v43 = vadd.s32 496, %v5068_v3  ;;  %v830_v20 = vadd.s32 504, %v5068_v3  ;;  %v9329_v57 = vcombine.low %v5893_v40, %v5897_v13 }
  0x7e   : > { %9324 = vst [vmem:[#allocation60_spill] sm:$0xff] %v9323_v1  ;;  %v9327_v12 = vsel %vm6404_vm7, 4294967295, %v9326_v12  ;;  %v9330_v49 = vcombine.low %v5914_v56, %v5918_v26  ;;  %vm9331_vm15 = vcmp.lt.s32.totalorder %v923_v22, 1000  ;;  %v9332_v40 = vmov 0  ;;  %v378_v22 = vld [vmem:[%s5299_s27 + $0x244] sm:$0xff] }
  0x7f   : > { %9328 = vst [vmem:[#allocation61_spill] sm:$0xff] %v9327_v12  ;;  %3789 = vmatpush1.bf16.msra.mxu0 %v9329_v57  ;;  %vm6427_vm14 = vmpackc.low %vm9331_vm15, %vm9331_vm15  ;;  %v9335_v56 = vcombine.high %v5973_v31, %v5977_v60  ;;  %v9336_v13 = vcombine.high %v5989_v37, %v5993_v62  ;;  %v6439_v26 = vsel %vm6361_vm6, %v369_v48, 0  ;;  %v375_v57 = vld [vmem:[%s5299_s27 + $0x230] sm:$0xff]  ;;  %vm9337_vm4 = vcmp.lt.s32.totalorder %v924_v58, 1000  ;;  %v474_v12 = vld [vmem:[%s5299_s27 + $0x4c4] sm:$0xff] }
  0x80   : > { %3830 = vmatpush1.bf16.msra.mxu1 %v9330_v49  ;;  %v9333_v40 = vsel %vm6427_vm14, 4294967295, %v9332_v40  ;;  %vm6445_vm15 = vmpackc.low %vm9337_vm4, %vm9337_vm4  ;;  %v9338_v49 = vmov 0  ;;  %v957_v29 = vadd.s32 %v829_v43, %v5072_v5  ;;  %v831_v48 = vadd.s32 512, %v5068_v3 }
  0x81   : > { %9334 = vst [vmem:[#allocation62_spill] sm:$0xff] %v9333_v40  ;;  %3790 = vmatprep.subr.bf16.mxu0 %v9335_v56  ;;  %3831 = vmatprep.subr.bf16.mxu1 %v9336_v13  ;;  %v9339_v49 = vsel %vm6445_vm15, 4294967295, %v9338_v49  ;;  %v926_v56 = vadd.s32 %v798_v55, %v5072_v5  ;;  %v958_v13 = vadd.s32 %v830_v20, %v5072_v5  ;;  %v832_v44 = vadd.s32 520, %v5068_v3 }
  0x82   : > { %9340 = vst [vmem:[#allocation63_spill] sm:$0xff] %v9339_v49  ;;  %v863_v58 = vadd.s32 768, %v5068_v3  ;;  %v6457_v33 = vsel %vm6383_vm0, %v372_v63, 0  ;;  %v6461_v41 = vsel %vm6393_vm12, %v465_v28, 0  ;;  %v6465_v55 = vsel %vm6404_vm7, %v468_v21, 0 }
  0x83   : > { %vm9341_vm4 = vcmp.lt.s32.totalorder %v955_v52, 1000  ;;  %v9342_v43 = vmov 0  ;;  %v9345_v20 = vcombine.low %v5973_v31, %v5977_v60  ;;  %v9346_v63 = vcombine.low %v5989_v37, %v5993_v62  ;;  %v471_v52 = vld [vmem:[%s5299_s27 + $0x4b0] sm:$0xff] }
  0x84   : > { %vm6469_vm3 = vmpackc.low %vm9341_vm4, %vm9341_vm4  ;;  %v6481_v28 = vsel %vm6427_vm14, %v375_v57, 0  ;;  %v6485_v21 = vsel %vm6445_vm15, %v378_v22, 0  ;;  %vm9347_vm4 = vcmp.lt.s32.totalorder %v956_v27, 1000  ;;  %v9348_v1 = vmov 0 }
  0x85   : > { %v9343_v43 = vsel %vm6469_vm3, 4294967295, %v9342_v43  ;;  %3791 = vmatpush1.bf16.msra.mxu0 %v9345_v20  ;;  %3832 = vmatpush1.bf16.msra.mxu1 %v9346_v63  ;;  %vm6491_vm6 = vmpackc.low %vm9347_vm4, %vm9347_vm4  ;;  %v959_v31 = vadd.s32 %v831_v48, %v5072_v5  ;;  %v9351_v60 = vcombine.high %v6059_v61, %v6073_v38  ;;  %v9352_v37 = vcombine.high %v6086_v16, %v6090_v35  ;;  %v384_v48 = vld [vmem:[%s5299_s27 + $0x26c] sm:$0xff] }
  0x86   : > { %9344 = vst [vmem:[#allocation64_spill] sm:$0xff] %v9343_v43  ;;  %v9349_v1 = vsel %vm6491_vm6, 4294967295, %v9348_v1  ;;  %v960_v62 = vadd.s32 %v832_v44, %v5072_v5  ;;  %v864_v27 = vadd.s32 776, %v5068_v3  ;;  %v833_v57 = vadd.s32 528, %v5068_v3 }
  0x87   : > { %9350 = vst [vmem:[#allocation65_spill] sm:$0xff] %v9349_v1  ;;  %3792 = vmatprep.subr.bf16.mxu0 %v9351_v60  ;;  %3833 = vmatprep.subr.bf16.mxu1 %v9352_v37  ;;  %vm9353_vm4 = vcmp.lt.s32.totalorder %v925_v45, 1000  ;;  %v9354_v20 = vmov 0  ;;  %v991_v44 = vadd.s32 %v863_v58, %v5072_v5  ;;  %v6520_v60 = vsel %vm6469_vm3, %v471_v52, 0  ;;  %v381_v45 = vld [vmem:[%s5299_s27 + $0x258] sm:$0xff] }
  0x88   : > { %vm6511_vm7 = vmpackc.low %vm9353_vm4, %vm9353_vm4  ;;  %v6524_v37 = vsel %vm6491_vm6, %v474_v12, 0  ;;  %vm9357_vm4 = vcmp.lt.s32.totalorder %v926_v56, 1000  ;;  %v9358_v22 = vmov 0  ;;  %v992_v58 = vadd.s32 %v864_v27, %v5072_v5  ;;  %v480_v27 = vld [vmem:[%s5299_s27 + $0x4ec] sm:$0xff] }
  0x89   : > { %v9355_v20 = vsel %vm6511_vm7, 4294967295, %v9354_v20  ;;  %vm6529_vm14 = vmpackc.low %vm9357_vm4, %vm9357_vm4  ;;  %v9361_v63 = vcombine.low %v6059_v61, %v6073_v38  ;;  %v9362_v52 = vcombine.low %v6086_v16, %v6090_v35  ;;  %vm9363_vm4 = vcmp.lt.s32.totalorder %v957_v29, 1000  ;;  %v477_v29 = vld [vmem:[%s5299_s27 + $0x4d8] sm:$0xff] }
  0x8a   : > { %9356 = vst [vmem:[#allocation66_spill] sm:$0xff] %v9355_v20  ;;  %v9359_v22 = vsel %vm6529_vm14, 4294967295, %v9358_v22  ;;  %vm6547_vm15 = vmpackc.low %vm9363_vm4, %vm9363_vm4  ;;  %v9364_v1 = vmov 0  ;;  %v834_v38 = vadd.s32 536, %v5068_v3  ;;  %v9367_v61 = vcombine.high %v6101_v18, %v6105_v42 }
  0x8b   : > { %9360 = vst [vmem:[#allocation67_spill] sm:$0xff] %v9359_v22  ;;  %3793 = vmatpush1.bf16.msra.mxu0 %v9361_v63  ;;  %3834 = vmatpush1.bf16.msra.mxu1 %v9362_v52  ;;  %v9365_v1 = vsel %vm6547_vm15, 4294967295, %v9364_v1  ;;  %v9368_v16 = vcombine.high %v6155_v54, %v6173_v53  ;;  %vm9369_vm4 = vcmp.lt.s32.totalorder %v958_v13, 1000  ;;  %v9370_v63 = vmov 0  ;;  %v582_v22 = vld [vmem:[%s5299_s27 + $0x794] sm:$0xff] }
  0x8c   : > { %9366 = vst [vmem:[#allocation68_spill] sm:$0xff] %v9365_v1  ;;  %3794 = vmatprep.subr.bf16.mxu0 %v9367_v61  ;;  %vm6564_vm3 = vmpackc.low %vm9369_vm4, %vm9369_vm4  ;;  %v961_v52 = vadd.s32 %v833_v57, %v5072_v5  ;;  %v865_v61 = vadd.s32 784, %v5068_v3  ;;  %v962_v13 = vadd.s32 %v834_v38, %v5072_v5  ;;  %v6579_v35 = vsel %vm6529_vm14, %v384_v48, 0  ;;  %v579_v1 = vld [vmem:[%s5299_s27 + $0x780] sm:$0xff] }
  0x8d   : > { %3835 = vmatprep.subr.bf16.mxu1 %v9368_v16  ;;  %v9371_v63 = vsel %vm6564_vm3, 4294967295, %v9370_v63  ;;  %v6574_v16 = vsel %vm6511_vm7, %v381_v45, 0  ;;  %vm9373_vm4 = vcmp.lt.s32.totalorder %v959_v31, 1000  ;;  %v9374_v57 = vmov 0 }
  0x8e   : > { %9372 = vst [vmem:[#allocation69_spill] sm:$0xff] %v9371_v63  ;;  %vm6583_vm6 = vmpackc.low %vm9373_vm4, %vm9373_vm4  ;;  %v866_v56 = vadd.s32 792, %v5068_v3  ;;  %v993_v45 = vadd.s32 %v865_v61, %v5072_v5  ;;  %v9376_v12 = vcombine.low %v6101_v18, %v6105_v42  ;;  %v9377_v38 = vcombine.low %v6155_v54, %v6173_v53 }
  0x8f   : > { %v9375_v57 = vsel %vm6583_vm6, 4294967295, %v9374_v57  ;;  %v6597_v31 = vsel %vm6547_vm15, %v477_v29, 0  ;;  %v6601_v48 = vsel %vm6564_vm3, %v480_v27, 0  ;;  %vm9378_vm4 = vcmp.lt.s32.totalorder %v960_v62, 1000  ;;  %v483_v62 = vld [vmem:[%s5299_s27 + $0x500] sm:$0xff] }
  0x90   : > { %3795 = vmatpush1.bf16.msra.mxu0 %v9376_v12  ;;  %3836 = vmatpush1.bf16.msra.mxu1 %v9377_v38  ;;  %vm6605_vm0 = vmpackc.low %vm9378_vm4, %vm9378_vm4  ;;  %v9379_v61 = vmov 0  ;;  %v835_v18 = vadd.s32 544, %v5068_v3  ;;  %v9381_v42 = vcombine.high %v6193_v46, %v6206_v39  ;;  %v9382_v54 = vcombine.high %v6238_v10, %v6242_v59 }
  0x91   : > { %v9380_v61 = vsel %vm6605_vm0, 4294967295, %v9379_v61  ;;  %vm9383_vm4 = vcmp.lt.s32.totalorder %v991_v44, 1000  ;;  %v9384_v12 = vmov 0  ;;  %v994_v29 = vadd.s32 %v866_v56, %v5072_v5 }
  0x92   : > { %3796 = vmatprep.subr.bf16.mxu0 %v9381_v42  ;;  %3837 = vmatprep.subr.bf16.mxu1 %v9382_v54  ;;  %vm6621_vm3 = vmpackc.low %vm9383_vm4, %vm9383_vm4  ;;  %v836_v27 = vadd.s32 552, %v5068_v3  ;;  %v486_v42 = vld [vmem:[%s5299_s27 + $0x514] sm:$0xff]  ;;  %vm9387_vm15 = vcmp.lt.s32.totalorder %v992_v58, 1000  ;;  %v9388_v44 = vmov 0  ;;  %v963_v54 = vadd.s32 %v835_v18, %v5072_v5  ;;  %v489_v58 = vld [vmem:[%s5299_s27 + $0x528] sm:$0xff] }
  0x93   : > { %v9385_v12 = vsel %vm6621_vm3, 4294967295, %v9384_v12  ;;  %vm6632_vm14 = vmpackc.low %vm9387_vm15, %vm9387_vm15  ;;  %v867_v53 = vadd.s32 800, %v5068_v3  ;;  %v868_v56 = vadd.s32 808, %v5068_v3  ;;  %vm9391_vm15 = vcmp.lt.s32.totalorder %v961_v52, 1000  ;;  %v492_v52 = vld [vmem:[%s5299_s27 + $0x53c] sm:$0xff] }
  0x94   : > { %9386 = vst [vmem:[#allocation70_spill] sm:$0xff] %v9385_v12  ;;  %v9389_v44 = vsel %vm6632_vm14, 4294967295, %v9388_v44  ;;  %vm6649_vm4 = vmpackc.low %vm9391_vm15, %vm9391_vm15  ;;  %v9392_v20 = vmov 0  ;;  %v9395_v18 = vcombine.low %v6193_v46, %v6206_v39  ;;  %v9396_v63 = vcombine.low %v6238_v10, %v6242_v59  ;;  %v588_v12 = vld [vmem:[%s5299_s27 + $0x7bc] sm:$0xff] }
  0x95   : > { %9390 = vst [vmem:[#allocation71_spill] sm:$0xff] %v9389_v44  ;;  %v9393_v20 = vsel %vm6649_vm4, 4294967295, %v9392_v20  ;;  %v6661_v38 = vsel %vm6583_vm6, %v483_v62, 0  ;;  %vm9397_vm7 = vcmp.lt.s32.totalorder %v962_v13, 1000  ;;  %v9398_v43 = vmov 0 }
  0x96   : > { %9394 = vst [vmem:[#allocation72_spill] sm:$0xff] %v9393_v20  ;;  %3797 = vmatpush1.bf16.msra.mxu0 %v9395_v18  ;;  %3838 = vmatpush1.bf16.msra.mxu1 %v9396_v63  ;;  %vm6667_vm15 = vmpackc.low %vm9397_vm7, %vm9397_vm7  ;;  %v964_v46 = vadd.s32 %v836_v27, %v5072_v5  ;;  %v995_v39 = vadd.s32 %v867_v53, %v5072_v5  ;;  %v837_v13 = vadd.s32 560, %v5068_v3  ;;  %v838_v62 = vadd.s32 568, %v5068_v3 }
  0x97   : > { %v9399_v43 = vsel %vm6667_vm15, 4294967295, %v9398_v43  ;;  %v9401_v59 = vcombine.high %v6261_v47, %v6274_v24  ;;  %v9402_v10 = vcombine.high %v6297_v8, %v6301_v17  ;;  %v996_v63 = vadd.s32 %v868_v56, %v5072_v5 }
  0x98   : > { %9400 = vst [vmem:[#allocation73_spill] sm:$0xff] %v9399_v43  ;;  %v869_v18 = vadd.s32 816, %v5068_v3  ;;  %v6685_v27 = vsel %vm6605_vm0, %v486_v42, 0  ;;  %v6689_v53 = vsel %vm6621_vm3, %v579_v1, 0  ;;  %vm9403_vm7 = vcmp.lt.s32.totalorder %v993_v45, 1000  ;;  %v585_v1 = vld [vmem:[%s5299_s27 + $0x7a8] sm:$0xff] }
  0x99   : > { %3798 = vmatprep.subr.bf16.mxu0 %v9401_v59  ;;  %3839 = vmatprep.subr.bf16.mxu1 %v9402_v10  ;;  %v6693_v59 = vsel %vm6632_vm14, %v582_v22, 0  ;;  %vm6697_vm12 = vmpackc.low %vm9403_vm7, %vm9403_vm7  ;;  %v9404_v56 = vmov 0  ;;  %v6703_v10 = vsel %vm6649_vm4, %v489_v58, 0  ;;  %v6707_v42 = vsel %vm6667_vm15, %v492_v52, 0 }
  0x9a   : > { %v9405_v56 = vsel %vm6697_vm12, 4294967295, %v9404_v56  ;;  %vm9407_vm3 = vcmp.lt.s32.totalorder %v994_v29, 1000  ;;  %v9408_v22 = vmov 0  ;;  %v965_v45 = vadd.s32 %v837_v13, %v5072_v5 }
  0x9b   : > { %9406 = vst [vmem:[#allocation74_spill] sm:$0xff] %v9405_v56  ;;  %vm6713_vm14 = vmpackc.low %vm9407_vm3, %vm9407_vm3  ;;  %v9411_v20 = vcombine.low %v6261_v47, %v6274_v24  ;;  %v9412_v58 = vcombine.low %v6297_v8, %v6301_v17  ;;  %v966_v29 = vadd.s32 %v838_v62, %v5072_v5  ;;  %v870_v52 = vadd.s32 824, %v5068_v3  ;;  %v495_v62 = vld [vmem:[%s5299_s27 + $0x550] sm:$0xff] }
  0x9c   : > { %v9409_v22 = vsel %vm6713_vm14, 4294967295, %v9408_v22  ;;  %v839_v43 = vadd.s32 576, %v5068_v3  ;;  %v9413_v44 = vcombine.high %v6346_v50, %v6357_v4  ;;  %v9414_v47 = vcombine.high %v6375_v6, %v6379_v36 }
  0x9d   : > { %9410 = vst [vmem:[#allocation75_spill] sm:$0xff] %v9409_v22  ;;  %3799 = vmatpush1.bf16.msra.mxu0 %v9411_v20  ;;  %3840 = vmatpush1.bf16.msra.mxu1 %v9412_v58  ;;  %vm9415_vm3 = vcmp.lt.s32.totalorder %v963_v54, 1000  ;;  %v9416_v8 = vmov 0  ;;  %v997_v20 = vadd.s32 %v869_v18, %v5072_v5  ;;  %v6748_v13 = vsel %vm6697_vm12, %v585_v1, 0 }
  0x9e   : > { %3800 = vmatprep.subr.bf16.mxu0 %v9413_v44  ;;  %3841 = vmatprep.subr.bf16.mxu1 %v9414_v47  ;;  %vm6739_vm6 = vmpackc.low %vm9415_vm3, %vm9415_vm3  ;;  %v6752_v54 = vsel %vm6713_vm14, %v588_v12, 0  ;;  %vm9419_vm3 = vcmp.lt.s32.totalorder %v964_v46, 1000  ;;  %v9420_v58 = vmov 0  ;;  %v998_v18 = vadd.s32 %v870_v52, %v5072_v5  ;;  %v498_v44 = vld [vmem:[%s5299_s27 + $0x564] sm:$0xff] }
  0x9f   : > { %v9417_v8 = vsel %vm6739_vm6, 4294967295, %v9416_v8  ;;  %vm6757_vm15 = vmpackc.low %vm9419_vm3, %vm9419_vm3  ;;  %vm9423_vm7 = vcmp.lt.s32.totalorder %v995_v39, 1000  ;;  %v9424_v12 = vmov 0  ;;  %v840_v46 = vadd.s32 584, %v5068_v3  ;;  %v591_v39 = vld [vmem:[%s5299_s27 + $0x7d0] sm:$0xff]  ;;  %v594_v47 = vld [vmem:[%s5299_s27 + $0x7e4] sm:$0xff] }
  0xa0   : > { %9418 = vst [vmem:[#allocation76_spill] sm:$0xff] %v9417_v8  ;;  %v9421_v58 = vsel %vm6757_vm15, 4294967295, %v9420_v58  ;;  %vm6769_vm14 = vmpackc.low %vm9423_vm7, %vm9423_vm7  ;;  %v9427_v17 = vcombine.low %v6346_v50, %v6357_v4  ;;  %v9428_v52 = vcombine.low %v6375_v6, %v6379_v36  ;;  %vm9429_vm7 = vcmp.lt.s32.totalorder %v996_v63, 1000 }
  0xa1   : > { %9422 = vst [vmem:[#allocation77_spill] sm:$0xff] %v9421_v58  ;;  %v9425_v12 = vsel %vm6769_vm14, 4294967295, %v9424_v12  ;;  %vm6786_vm3 = vmpackc.low %vm9429_vm7, %vm9429_vm7  ;;  %v9430_v24 = vmov 0  ;;  %v967_v22 = vadd.s32 %v839_v43, %v5072_v5  ;;  %v871_v4 = vadd.s32 832, %v5068_v3  ;;  %v510_v58 = vld [vmem:[%s5299_s27 + $0x5b4] sm:$0xff] }
  0xa2   : > { %9426 = vst [vmem:[#allocation78_spill] sm:$0xff] %v9425_v12  ;;  %3801 = vmatpush1.bf16.msra.mxu0 %v9427_v17  ;;  %3842 = vmatpush1.bf16.msra.mxu1 %v9428_v52  ;;  %v9431_v24 = vsel %vm6786_vm3, 4294967295, %v9430_v24  ;;  %v9433_v50 = vcombine.high %v6439_v26, %v6457_v33  ;;  %v9434_v6 = vcombine.high %v6461_v41, %v6465_v55  ;;  %v6802_v63 = vsel %vm6739_vm6, %v495_v62, 0 }
  0xa3   : > { %9432 = vst [vmem:[#allocation79_spill] sm:$0xff] %v9431_v24  ;;  %v968_v43 = vadd.s32 %v840_v46, %v5072_v5  ;;  %v6807_v17 = vsel %vm6757_vm15, %v498_v44, 0  ;;  %vm9435_vm12 = vcmp.lt.s32.totalorder %v965_v45, 1000  ;;  %v9436_v52 = vmov 0  ;;  %v600_v24 = vld [vmem:[%s5299_s27 + $0x80c] sm:$0xff] }
  0xa4   : > { %3802 = vmatprep.subr.bf16.mxu0 %v9433_v50  ;;  %3843 = vmatprep.subr.bf16.mxu1 %v9434_v6  ;;  %vm6811_vm4 = vmpackc.low %vm9435_vm12, %vm9435_vm12  ;;  %v872_v50 = vadd.s32 840, %v5068_v3  ;;  %v999_v62 = vadd.s32 %v871_v4, %v5072_v5  ;;  %v6819_v6 = vsel %vm6769_vm14, %v591_v39, 0  ;;  %v6823_v44 = vsel %vm6786_vm3, %v594_v47, 0 }
  0xa5   : > { %v9437_v52 = vsel %vm6811_vm4, 4294967295, %v9436_v52  ;;  %vm9439_vm7 = vcmp.lt.s32.totalorder %v966_v29, 1000  ;;  %v9440_v45 = vmov 0  ;;  %v841_v46 = vadd.s32 592, %v5068_v3  ;;  %v501_v29 = vld [vmem:[%s5299_s27 + $0x578] sm:$0xff] }
  0xa6   : > { %9438 = vst [vmem:[#allocation80_spill] sm:$0xff] %v9437_v52  ;;  %vm6827_vm12 = vmpackc.low %vm9439_vm7, %vm9439_vm7  ;;  %v9443_v4 = vcombine.low %v6439_v26, %v6457_v33  ;;  %v9444_v39 = vcombine.low %v6461_v41, %v6465_v55  ;;  %vm9445_vm3 = vcmp.lt.s32.totalorder %v997_v20, 1000  ;;  %v9446_v36 = vmov 0  ;;  %v597_v20 = vld [vmem:[%s5299_s27 + $0x7f8] sm:$0xff] }
  0xa7   : > { %v9441_v45 = vsel %vm6827_vm12, 4294967295, %v9440_v45  ;;  %vm6843_vm7 = vmpackc.low %vm9445_vm3, %vm9445_vm3  ;;  %v1000_v33 = vadd.s32 %v872_v50, %v5072_v5  ;;  %v842_v26 = vadd.s32 600, %v5068_v3  ;;  %v9449_v41 = vcombine.high %v6481_v28, %v6485_v21 }
  0xa8   : > { %9442 = vst [vmem:[#allocation81_spill] sm:$0xff] %v9441_v45  ;;  %3803 = vmatpush1.bf16.msra.mxu0 %v9443_v4  ;;  %3844 = vmatpush1.bf16.msra.mxu1 %v9444_v39  ;;  %v9447_v36 = vsel %vm6843_vm7, 4294967295, %v9446_v36  ;;  %v9450_v55 = vcombine.high %v6520_v60, %v6524_v37  ;;  %v504_v4 = vld [vmem:[%s5299_s27 + $0x58c] sm:$0xff]  ;;  %vm9451_vm3 = vcmp.lt.s32.totalorder %v998_v18, 1000  ;;  %v9452_v50 = vmov 0 }
  0xa9   : > { %9448 = vst [vmem:[#allocation82_spill] sm:$0xff] %v9447_v36  ;;  %3804 = vmatprep.subr.bf16.mxu0 %v9449_v41  ;;  %vm6860_vm0 = vmpackc.low %vm9451_vm3, %vm9451_vm3  ;;  %v969_v39 = vadd.s32 %v841_v46, %v5072_v5  ;;  %v873_v41 = vadd.s32 848, %v5068_v3  ;;  %v874_v47 = vadd.s32 856, %v5068_v3  ;;  %vm9455_vm3 = vcmp.lt.s32.totalorder %v967_v22, 1000 }
  0xaa   : > { %3845 = vmatprep.subr.bf16.mxu1 %v9450_v55  ;;  %v9453_v50 = vsel %vm6860_vm0, 4294967295, %v9452_v50  ;;  %vm6877_vm14 = vmpackc.low %vm9455_vm3, %vm9455_vm3  ;;  %v9456_v12 = vmov 0  ;;  %vm1127_vm15 = vcmp.lt.s32.totalorder %v999_v62, 1000  ;;  %v6883_v46 = vsel %vm6811_vm4, %v501_v29, 0  ;;  %v507_v55 = vld [vmem:[%s5299_s27 + $0x5a0] sm:$0xff] }
  0xab   : > { %9454 = vst [vmem:[#allocation83_spill] sm:$0xff] %v9453_v50  ;;  %v9457_v12 = vsel %vm6877_vm14, 4294967295, %v9456_v12  ;;  %vm9459_vm6 = vcmp.lt.s32.totalorder %v968_v43, 1000  ;;  %v9460_v1 = vmov 0  ;;  %vm1128_vm9 = vcmp.lt.s32.totalorder %v1000_v33, 1000 }
  0xac   : > { %9458 = vst [vmem:[#allocation84_spill] sm:$0xff] %v9457_v12  ;;  %vm6889_vm1 = vmpackc.low %vm9459_vm6, %vm9459_vm6  ;;  %v970_v22 = vadd.s32 %v842_v26, %v5072_v5  ;;  %v1001_v18 = vadd.s32 %v873_v41, %v5072_v5  ;;  %v9463_v8 = vcombine.low %v6481_v28, %v6485_v21  ;;  %v9464_v29 = vcombine.low %v6520_v60, %v6524_v37 }
  0xad   : > { %v9461_v1 = vsel %vm6889_vm1, 4294967295, %v9460_v1  ;;  %v1002_v43 = vadd.s32 %v874_v47, %v5072_v5  ;;  %v843_v52 = vadd.s32 608, %v5068_v3  ;;  %v844_v56 = vadd.s32 616, %v5068_v3  ;;  %vm6925_vm6 = vmpackc.low %vm1127_vm15, %vm1127_vm15 }
  0xae   : > { %9462 = vst [vmem:[#allocation85_spill] sm:$0xff] %v9461_v1  ;;  %3805 = vmatpush1.bf16.msra.mxu0 %v9463_v8  ;;  %3846 = vmatpush1.bf16.msra.mxu1 %v9464_v29  ;;  %v875_v26 = vadd.s32 864, %v5068_v3  ;;  %v9465_v41 = vcombine.high %v6574_v16, %v6579_v35  ;;  %v9466_v28 = vcombine.high %v6597_v31, %v6601_v48  ;;  %v6913_v21 = vsel %vm6827_vm12, %v504_v4, 0  ;;  %v606_v29 = vld [vmem:[%s5299_s27 + $0x834] sm:$0xff] }
  0xaf   : > { %v6917_v60 = vsel %vm6843_vm7, %v597_v20, 0  ;;  %v6921_v37 = vsel %vm6860_vm0, %v600_v24, 0  ;;  %v9467_v8 = vmov 0  ;;  %v6931_v47 = vsel %vm6877_vm14, %v507_v55, 0  ;;  %v603_v20 = vld [vmem:[%s5299_s27 + $0x820] sm:$0xff]  ;;  %vm6941_vm0 = vmpackc.low %vm1128_vm9, %vm1128_vm9 }
  0xb0   : > { %3806 = vmatprep.subr.bf16.mxu0 %v9465_v41  ;;  %3847 = vmatprep.subr.bf16.mxu1 %v9466_v28  ;;  %v9468_v8 = vsel %vm6925_vm6, 4294967295, %v9467_v8  ;;  %v6935_v4 = vsel %vm6889_vm1, %v510_v58, 0  ;;  %v9470_v24 = vmov 0  ;;  %v971_v62 = vadd.s32 %v843_v52, %v5072_v5 }
  0xb1   : > { %9469 = vst [vmem:[#allocation86_spill] sm:$0xff] %v9468_v8  ;;  %v9471_v24 = vsel %vm6941_vm0, 4294967295, %v9470_v24  ;;  %v972_v55 = vadd.s32 %v844_v56, %v5072_v5  ;;  %v876_v41 = vadd.s32 872, %v5068_v3  ;;  %v845_v58 = vadd.s32 624, %v5068_v3 }
  0xb2   : > { %9472 = vst [vmem:[#allocation87_spill] sm:$0xff] %v9471_v24  ;;  %v9473_v28 = vcombine.low %v6574_v16, %v6579_v35  ;;  %v9474_v33 = vcombine.low %v6597_v31, %v6601_v48  ;;  %vm9475_vm9 = vcmp.lt.s32.totalorder %v969_v39, 1000  ;;  %v9476_v56 = vmov 0  ;;  %v516_v48 = vld [vmem:[%s5299_s27 + $0x5dc] sm:$0xff] }
  0xb3   : > { %vm6961_vm3 = vmpackc.low %vm9475_vm9, %vm9475_vm9  ;;  %v1003_v35 = vadd.s32 %v875_v26, %v5072_v5  ;;  %v9479_v16 = vcombine.high %v6661_v38, %v6685_v27  ;;  %v9480_v31 = vcombine.high %v6689_v53, %v6693_v59  ;;  %v6976_v39 = vsel %vm6925_vm6, %v603_v20, 0  ;;  %v612_v20 = vld [vmem:[%s5299_s27 + $0x85c] sm:$0xff] }
  0xb4   : > { %3807 = vmatpush1.bf16.msra.mxu0 %v9473_v28  ;;  %3848 = vmatpush1.bf16.msra.mxu1 %v9474_v33  ;;  %v9477_v56 = vsel %vm6961_vm3, 4294967295, %v9476_v56  ;;  %v6980_v26 = vsel %vm6941_vm0, %v606_v29, 0  ;;  %v513_v28 = vld [vmem:[%s5299_s27 + $0x5c8] sm:$0xff]  ;;  %vm9481_vm9 = vcmp.lt.s32.totalorder %v970_v22, 1000  ;;  %v9482_v33 = vmov 0 }
  0xb5   : > { %9478 = vst [vmem:[#allocation88_spill] sm:$0xff] %v9477_v56  ;;  %3858 = vmatprep.subr.bf16.mxu0 %v9479_v16  ;;  %3899 = vmatprep.subr.bf16.mxu1 %v9480_v31  ;;  %vm6985_vm15 = vmpackc.low %vm9481_vm9, %vm9481_vm9  ;;  %v1004_v16 = vadd.s32 %v876_v41, %v5072_v5  ;;  %vm9485_vm6 = vcmp.lt.s32.totalorder %v1001_v18, 1000  ;;  %v9486_v29 = vmov 0  ;;  %v846_v22 = vadd.s32 632, %v5068_v3  ;;  %v609_v18 = vld [vmem:[%s5299_s27 + $0x848] sm:$0xff] }
  0xb6   : > { %v9483_v33 = vsel %vm6985_vm15, 4294967295, %v9482_v33  ;;  %vm6997_vm0 = vmpackc.low %vm9485_vm6, %vm9485_vm6  ;;  %vm9489_vm6 = vcmp.lt.s32.totalorder %v1002_v43, 1000  ;;  %v9490_v52 = vmov 0  ;;  %v973_v31 = vadd.s32 %v845_v58, %v5072_v5  ;;  %v522_v43 = vld [vmem:[%s5299_s27 + $0x604] sm:$0xff] }
  0xb7   : > { %9484 = vst [vmem:[#allocation89_spill] sm:$0xff] %v9483_v33  ;;  %v9487_v29 = vsel %vm6997_vm0, 4294967295, %v9486_v29  ;;  %4736 = vmatmul.mubr.msk.bf16.vlgmr.msra.gmra.mrb[8].mxu0 %vm5208_vm2, %v9225_v34  ;;  %4740 = vmatmul.mubr.msk.bf16.vlgmr.msra.gmra.mrb[8].mxu1 %vm5269_vm11, %v9225_v34  ;;  %vm7014_vm9 = vmpackc.low %vm9489_vm6, %vm9489_vm6  ;;  %v877_v1 = vadd.s32 880, %v5068_v3  ;;  %v9493_v24 = vcombine.low %v6661_v38, %v6685_v27  ;;  %v9494_v41 = vcombine.low %v6689_v53, %v6693_v59 }
  0xb8   : > { %9488 = vst [vmem:[#allocation90_spill] sm:$0xff] %v9487_v29  ;;  %v9491_v52 = vsel %vm7014_vm9, 4294967295, %v9490_v52  ;;  %v7030_v8 = vsel %vm6961_vm3, %v513_v28, 0  ;;  %v974_v58 = vadd.s32 %v846_v22, %v5072_v5  ;;  %v9495_v12 = vcombine.high %v6703_v10, %v6707_v42 }
  0xb9   : > { %9492 = vst [vmem:[#allocation91_spill] sm:$0xff] %v9491_v52  ;;  %3859 = vmatpush1.bf16.msra.mxu0 %v9493_v24  ;;  %3900 = vmatpush1.bf16.msra.mxu1 %v9494_v41  ;;  %v9496_v38 = vcombine.high %v6748_v13, %v6752_v54  ;;  %v7041_v27 = vsel %vm6985_vm15, %v516_v48, 0  ;;  %vm9497_vm1 = vcmp.lt.s32.totalorder %v971_v62, 1000  ;;  %v9498_v53 = vmov 0 }
  0xba   : > { %3860 = vmatprep.subr.bf16.mxu0 %v9495_v12  ;;  %vm7045_vm3 = vmpackc.low %vm9497_vm1, %vm9497_vm1  ;;  %v878_v59 = vadd.s32 888, %v5068_v3  ;;  %v1005_v24 = vadd.s32 %v877_v1, %v5072_v5  ;;  %v7053_v12 = vsel %vm6997_vm0, %v609_v18, 0  ;;  %v7057_v48 = vsel %vm7014_vm9, %v612_v20, 0 }
  0xbb   : > { %3901 = vmatprep.subr.bf16.mxu1 %v9496_v38  ;;  %v9499_v53 = vsel %vm7045_vm3, 4294967295, %v9498_v53  ;;  %vm9501_vm15 = vcmp.lt.s32.totalorder %v972_v55, 1000  ;;  %v9502_v62 = vmov 0  ;;  %v847_v28 = vadd.s32 640, %v5068_v3  ;;  %v519_v55 = vld [vmem:[%s5299_s27 + $0x5f0] sm:$0xff] }
  0xbc   : > { %9500 = vst [vmem:[#allocation92_spill] sm:$0xff] %v9499_v53  ;;  %vm7061_vm1 = vmpackc.low %vm9501_vm15, %vm9501_vm15  ;;  %vm9505_vm14 = vnez %v9069_v11  ;;  %vm9506_vm0 = vnez %v9072_v15  ;;  %vm9507_vm9 = vcmp.lt.s32.totalorder %v1003_v35, 1000  ;;  %v9508_v20 = vmov 0  ;;  %v618_v35 = vld [vmem:[%s5299_s27 + $0x884] sm:$0xff] }
  0xbd   : > { %v9503_v62 = vsel %vm7061_vm1, 4294967295, %v9502_v62  ;;  %4742 = vmatprep.mubr.msk.bf16.mxu0 %vm9505_vm14, %v9225_v34  ;;  %4746 = vmatprep.mubr.msk.bf16.mxu1 %vm9506_vm0, %v9225_v34  ;;  %vm7077_vm15 = vmpackc.low %vm9507_vm9, %vm9507_vm9  ;;  %v1006_v22 = vadd.s32 %v878_v59, %v5072_v5  ;;  %v848_v41 = vadd.s32 648, %v5068_v3  ;;  %v9511_v18 = vcombine.low %v6703_v10, %v6707_v42 }
  0xbe   : > { %9504 = vst [vmem:[#allocation93_spill] sm:$0xff] %v9503_v62  ;;  %v9509_v20 = vsel %vm7077_vm15, 4294967295, %v9508_v20  ;;  %v9512_v38 = vcombine.low %v6748_v13, %v6752_v54  ;;  %vm9513_vm9 = vcmp.lt.s32.totalorder %v1004_v16, 1000  ;;  %v9514_v59 = vmov 0  ;;  %v528_v16 = vld [vmem:[%s5299_s27 + $0x62c] sm:$0xff] }
  0xbf   : > { %9510 = vst [vmem:[#allocation94_spill] sm:$0xff] %v9509_v20  ;;  %3861 = vmatpush1.bf16.msra.mxu0 %v9511_v18  ;;  %vm7094_vm6 = vmpackc.low %vm9513_vm9, %vm9513_vm9  ;;  %v975_v1 = vadd.s32 %v847_v28, %v5072_v5  ;;  %v879_v10 = vadd.s32 896, %v5068_v3  ;;  %v880_v42 = vadd.s32 904, %v5068_v3  ;;  %v9517_v13 = vcombine.high %v6802_v63, %v6807_v17 }
  0xc0   : > { %3902 = vmatpush1.bf16.msra.mxu1 %v9512_v38  ;;  %v9515_v59 = vsel %vm7094_vm6, 4294967295, %v9514_v59  ;;  %v9518_v54 = vcombine.high %v6819_v6, %v6823_v44  ;;  %v615_v38 = vld [vmem:[%s5299_s27 + $0x870] sm:$0xff]  ;;  %vm9519_vm9 = vcmp.lt.s32.totalorder %v973_v31, 1000  ;;  %v9520_v52 = vmov 0 }
  0xc1   : > { %9516 = vst [vmem:[#allocation95_spill] sm:$0xff] %v9515_v59  ;;  %3862 = vmatprep.subr.bf16.mxu0 %v9517_v13  ;;  %vm7117_vm0 = vmpackc.low %vm9519_vm9, %vm9519_vm9  ;;  %vm1133_vm14 = vcmp.lt.s32.totalorder %v1005_v24, 1000  ;;  %v7123_v13 = vsel %vm7045_vm3, %v519_v55, 0  ;;  %vm9523_vm7 = vcmp.lt.s32.totalorder %v974_v58, 1000  ;;  %v9524_v18 = vmov 0  ;;  %v636_v59 = vld [vmem:[%s5299_s27 + $0x8fc] sm:$0xff] }
  0xc2   : > { %3903 = vmatprep.subr.bf16.mxu1 %v9518_v54  ;;  %v9521_v52 = vsel %vm7117_vm0, 4294967295, %v9520_v52  ;;  %v525_v54 = vld [vmem:[%s5299_s27 + $0x618] sm:$0xff]  ;;  %vm7129_vm12 = vmpackc.low %vm9523_vm7, %vm9523_vm7  ;;  %vm1134_vm4 = vcmp.lt.s32.totalorder %v1006_v22, 1000  ;;  %v976_v31 = vadd.s32 %v848_v41, %v5072_v5  ;;  %v1007_v28 = vadd.s32 %v879_v10, %v5072_v5 }
  0xc3   : > { %9522 = vst [vmem:[#allocation96_spill] sm:$0xff] %v9521_v52  ;;  %v9525_v18 = vsel %vm7129_vm12, 4294967295, %v9524_v18  ;;  %v1008_v29 = vadd.s32 %v880_v42, %v5072_v5  ;;  %v849_v55 = vadd.s32 656, %v5068_v3  ;;  %v850_v53 = vadd.s32 664, %v5068_v3  ;;  %vm7159_vm7 = vmpackc.low %vm1133_vm14, %vm1133_vm14 }
  0xc4   : > { %9526 = vst [vmem:[#allocation97_spill] sm:$0xff] %v9525_v18  ;;  %v881_v58 = vadd.s32 912, %v5068_v3  ;;  %v9527_v33 = vcombine.low %v6802_v63, %v6807_v17  ;;  %v9528_v56 = vcombine.low %v6819_v6, %v6823_v44  ;;  %v7147_v41 = vsel %vm7061_vm1, %v522_v43, 0  ;;  %v624_v43 = vld [vmem:[%s5299_s27 + $0x8ac] sm:$0xff]  ;;  %vm7181_vm14 = vmpackc.low %vm1134_vm4, %vm1134_vm4  ;;  %v531_v18 = vld [vmem:[%s5299_s27 + $0x640] sm:$0xff] }
  0xc5   : > { %v7151_v10 = vsel %vm7077_vm15, %v615_v38, 0  ;;  %v7155_v42 = vsel %vm7094_vm6, %v618_v35, 0  ;;  %v9529_v63 = vmov 0  ;;  %v9532_v17 = vcombine.high %v6883_v46, %v6913_v21 }
  0xc6   : > { %3863 = vmatpush1.bf16.msra.mxu0 %v9527_v33  ;;  %3904 = vmatpush1.bf16.msra.mxu1 %v9528_v56  ;;  %v9530_v63 = vsel %vm7159_vm7, 4294967295, %v9529_v63  ;;  %v9533_v6 = vcombine.high %v6917_v60, %v6921_v37  ;;  %v7171_v44 = vsel %vm7117_vm0, %v525_v54, 0  ;;  %v7175_v56 = vsel %vm7129_vm12, %v528_v16, 0  ;;  %v621_v33 = vld [vmem:[%s5299_s27 + $0x898] sm:$0xff] }
  0xc7   : > { %9531 = vst [vmem:[#allocation98_spill] sm:$0xff] %v9530_v63  ;;  %3864 = vmatprep.subr.bf16.mxu0 %v9532_v17  ;;  %v9534_v24 = vmov 0  ;;  %v977_v35 = vadd.s32 %v849_v55, %v5072_v5  ;;  %v978_v38 = vadd.s32 %v850_v53, %v5072_v5  ;;  %v882_v54 = vadd.s32 920, %v5068_v3 }
  0xc8   : > { %3905 = vmatprep.subr.bf16.mxu1 %v9533_v6  ;;  %v9535_v24 = vsel %vm7181_vm14, 4294967295, %v9534_v24  ;;  %v851_v16 = vadd.s32 672, %v5068_v3  ;;  %vm9537_vm4 = vcmp.lt.s32.totalorder %v975_v1, 1000  ;;  %v9538_v6 = vmov 0 }
  0xc9   : > { %9536 = vst [vmem:[#allocation99_spill] sm:$0xff] %v9535_v24  ;;  %vm7195_vm9 = vmpackc.low %vm9537_vm4, %vm9537_vm4  ;;  %v1009_v53 = vadd.s32 %v881_v58, %v5072_v5  ;;  %v9541_v55 = vcombine.low %v6883_v46, %v6913_v21  ;;  %v9542_v17 = vcombine.low %v6917_v60, %v6921_v37  ;;  %v7210_v22 = vsel %vm7159_vm7, %v621_v33, 0 }
  0xca   : > { %v9539_v6 = vsel %vm7195_vm9, 4294967295, %v9538_v6  ;;  %v7214_v58 = vsel %vm7181_vm14, %v624_v43, 0  ;;  %vm9543_vm4 = vcmp.lt.s32.totalorder %v976_v31, 1000  ;;  %v9544_v46 = vmov 0  ;;  %v534_v43 = vld [vmem:[%s5299_s27 + $0x654] sm:$0xff] }
  0xcb   : > { %9540 = vst [vmem:[#allocation100_spill] sm:$0xff] %v9539_v6  ;;  %3865 = vmatpush1.bf16.msra.mxu0 %v9541_v55  ;;  %3906 = vmatpush1.bf16.msra.mxu1 %v9542_v17  ;;  %vm7219_vm6 = vmpackc.low %vm9543_vm4, %vm9543_vm4  ;;  %v1010_v21 = vadd.s32 %v882_v54, %v5072_v5  ;;  %v9547_v60 = vcombine.high %v6931_v47, %v6935_v4  ;;  %vm9549_vm4 = vcmp.lt.s32.totalorder %v1007_v28, 1000  ;;  %v9550_v17 = vmov 0  ;;  %v633_v6 = vld [vmem:[%s5299_s27 + $0x8e8] sm:$0xff] }
  0xcc   : > { %v9545_v46 = vsel %vm7219_vm6, 4294967295, %v9544_v46  ;;  %v9548_v37 = vcombine.high %v6976_v39, %v6980_v26  ;;  %v4684_v33 = vcombine.high %v7151_v10, %v7155_v42  ;;  %vm7237_vm14 = vmpackc.low %vm9549_vm4, %vm9549_vm4  ;;  %vm1105_vm7 = vcmp.lt.s32.totalorder %v977_v35, 1000 }
  0xcd   : > { %9546 = vst [vmem:[#allocation101_spill] sm:$0xff] %v9545_v46  ;;  %3866 = vmatprep.subr.bf16.mxu0 %v9547_v60  ;;  %v9551_v17 = vsel %vm7237_vm14, 4294967295, %v9550_v17  ;;  %v852_v54 = vadd.s32 680, %v5068_v3  ;;  %v627_v60 = vld [vmem:[%s5299_s27 + $0x8c0] sm:$0xff]  ;;  %vm9553_vm12 = vcmp.lt.s32.totalorder %v1008_v29, 1000  ;;  %v9554_v1 = vmov 0 }
  0xce   : > { %3907 = vmatprep.subr.bf16.mxu1 %v9548_v37  ;;  %9552 = vst [vmem:[#allocation102_spill] sm:$0xff] %v9551_v17  ;;  %v630_v37 = vld [vmem:[%s5299_s27 + $0x8d4] sm:$0xff]  ;;  %vm7248_vm0 = vmpackc.low %vm9553_vm12, %vm9553_vm12  ;;  %vm1106_vm15 = vcmp.lt.s32.totalorder %v978_v38, 1000  ;;  %v979_v28 = vadd.s32 %v851_v16, %v5072_v5  ;;  %v883_v31 = vadd.s32 928, %v5068_v3  ;;  %v7258_v63 = vsel %vm7195_vm9, %v531_v18, 0 }
  0xcf   : > { %v9555_v1 = vsel %vm7248_vm0, 4294967295, %v9554_v1  ;;  %v980_v29 = vadd.s32 %v852_v54, %v5072_v5  ;;  %v9557_v55 = vcombine.low %v6931_v47, %v6935_v4  ;;  %v9558_v16 = vcombine.low %v6976_v39, %v6980_v26  ;;  %vm7273_vm12 = vmpackc.low %vm1105_vm7, %vm1105_vm7 }
  0xd0   : > { %9556 = vst [vmem:[#allocation103_spill] sm:$0xff] %v9555_v1  ;;  %v7269_v52 = vsel %vm7219_vm6, %v534_v43, 0  ;;  %v9559_v18 = vmov 0  ;;  %v884_v54 = vadd.s32 936, %v5068_v3  ;;  %v1011_v47 = vadd.s32 %v883_v31, %v5072_v5  ;;  %vm7295_vm7 = vmpackc.low %vm1106_vm15, %vm1106_vm15 }
  0xd1   : > { %3867 = vmatpush1.bf16.msra.mxu0 %v9557_v55  ;;  %3908 = vmatpush1.bf16.msra.mxu1 %v9558_v16  ;;  %v9560_v18 = vsel %vm7273_vm12, 4294967295, %v9559_v18  ;;  %v9562_v4 = vcombine.high %v7030_v8, %v7041_v27  ;;  %v9563_v39 = vcombine.high %v7053_v12, %v7057_v48  ;;  %v7287_v26 = vsel %vm7237_vm14, %v627_v60, 0  ;;  %v537_v16 = vld [vmem:[%s5299_s27 + $0x668] sm:$0xff] }
  0xd2   : > { %9561 = vst [vmem:[#allocation104_spill] sm:$0xff] %v9560_v18  ;;  %v7291_v35 = vsel %vm7248_vm0, %v630_v37, 0  ;;  %v9564_v31 = vmov 0  ;;  %v853_v43 = vadd.s32 688, %v5068_v3  ;;  %v4689_v55 = vcombine.high %v7210_v22, %v7214_v58 }
  0xd3   : > { %3868 = vmatprep.subr.bf16.mxu0 %v9562_v4  ;;  %3909 = vmatprep.subr.bf16.mxu1 %v9563_v39  ;;  %v9565_v31 = vsel %vm7295_vm7, 4294967295, %v9564_v31  ;;  %vm9567_vm6 = vcmp.lt.s32.totalorder %v1009_v53, 1000  ;;  %v9568_v60 = vmov 0  ;;  %v1012_v38 = vadd.s32 %v884_v54, %v5072_v5  ;;  %v540_v39 = vld [vmem:[%s5299_s27 + $0x67c] sm:$0xff] }
  0xd4   : > { %9566 = vst [vmem:[#allocation105_spill] sm:$0xff] %v9565_v31  ;;  %vm7305_vm14 = vmpackc.low %vm9567_vm6, %vm9567_vm6  ;;  %v854_v37 = vadd.s32 696, %v5068_v3  ;;  %vm9571_vm15 = vcmp.lt.s32.totalorder %v1010_v21, 1000  ;;  %v9572_v53 = vmov 0  ;;  %v981_v24 = vadd.s32 %v853_v43, %v5072_v5 }
  0xd5   : > { %v9569_v60 = vsel %vm7305_vm14, 4294967295, %v9568_v60  ;;  %vm7316_vm4 = vmpackc.low %vm9571_vm15, %vm9571_vm15  ;;  %v885_v1 = vadd.s32 944, %v5068_v3  ;;  %v886_v54 = vadd.s32 952, %v5068_v3  ;;  %v9575_v17 = vcombine.low %v7030_v8, %v7041_v27 }
  0xd6   : > { %9570 = vst [vmem:[#allocation106_spill] sm:$0xff] %v9569_v60  ;;  %v9573_v53 = vsel %vm7316_vm4, 4294967295, %v9572_v53  ;;  %v9576_v21 = vcombine.low %v7053_v12, %v7057_v48  ;;  %v4614_v4 = vcombine.high %v7258_v63, %v7269_v52  ;;  %v4694_v43 = vcombine.high %v7287_v26, %v7291_v35  ;;  %v543_v48 = vld [vmem:[%s5299_s27 + $0x690] sm:$0xff]  ;;  %v642_v60 = vld [vmem:[%s5299_s27 + $0x924] sm:$0xff] }
  0xd7   : > { %9574 = vst [vmem:[#allocation107_spill] sm:$0xff] %v9573_v53  ;;  %3869 = vmatpush1.bf16.msra.mxu0 %v9575_v17  ;;  %vm9577_vm6 = vcmp.lt.s32.totalorder %v979_v28, 1000  ;;  %v9578_v8 = vmov 0  ;;  %vm1139_vm0 = vcmp.lt.s32.totalorder %v1011_v47, 1000  ;;  %v9580_v27 = vcombine.high %v7123_v13, %v7147_v41  ;;  %v546_v17 = vld [vmem:[%s5299_s27 + $0x6a4] sm:$0xff]  ;;  %v639_v53 = vld [vmem:[%s5299_s27 + $0x910] sm:$0xff] }
  0xd8   : > { %3910 = vmatpush1.bf16.msra.mxu1 %v9576_v21  ;;  %vm7339_vm15 = vmpackc.low %vm9577_vm6, %vm9577_vm6  ;;  %v7348_v12 = vsel %vm7273_vm12, %v537_v16, 0  ;;  %vm9581_vm9 = vcmp.lt.s32.totalorder %v980_v29, 1000  ;;  %v9582_v28 = vmov 0  ;;  %v982_v21 = vadd.s32 %v854_v37, %v5072_v5 }
  0xd9   : > { %v9579_v8 = vsel %vm7339_vm15, 4294967295, %v9578_v8  ;;  %3870 = vmatprep.subr.bf16.mxu0 %v9580_v27  ;;  %3911 = vmatprep.subr.bf16.mxu1 %v4684_v33  ;;  %vm7354_vm1 = vmpackc.low %vm9581_vm9, %vm9581_vm9  ;;  %v1013_v27 = vadd.s32 %v885_v1, %v5072_v5  ;;  %v7362_v33 = vsel %vm7295_vm7, %v540_v39, 0  ;;  %v1014_v16 = vadd.s32 %v886_v54, %v5072_v5 }
  0xda   : > { %v9583_v28 = vsel %vm7354_vm1, 4294967295, %v9582_v28  ;;  %v855_v29 = vadd.s32 704, %v5068_v3  ;;  %v856_v46 = vadd.s32 712, %v5068_v3  ;;  %v7369_v18 = vsel %vm7305_vm14, %v633_v6, 0  ;;  %vm7377_vm9 = vmpackc.low %vm1139_vm0, %vm1139_vm0 }
  0xdb   : > { %v7373_v37 = vsel %vm7316_vm4, %v636_v59, 0  ;;  %v9584_v1 = vmov 0  ;;  %v887_v39 = vadd.s32 960, %v5068_v3  ;;  %v9586_v54 = vcombine.low %v7123_v13, %v7147_v41 }
  0xdc   : > { %v9585_v1 = vsel %vm7377_vm9, 4294967295, %v9584_v1  ;;  %v9587_v6 = vcombine.low %v7151_v10, %v7155_v42  ;;  %v7390_v59 = vsel %vm7339_vm15, %v543_v48, 0  ;;  %v7394_v47 = vsel %vm7354_vm1, %v546_v17, 0 }
  0xdd   : > { %3871 = vmatpush1.bf16.msra.mxu0 %v9586_v54  ;;  %vm9588_vm0 = vcmp.lt.s32.totalorder %v1012_v38, 1000  ;;  %v9589_v31 = vmov 0  ;;  %v983_v13 = vadd.s32 %v855_v29, %v5072_v5  ;;  %v9592_v41 = vcombine.high %v7171_v44, %v7175_v56 }
  0xde   : > { %3912 = vmatpush1.bf16.msra.mxu1 %v9587_v6  ;;  %vm7400_vm6 = vmpackc.low %vm9588_vm0, %vm9588_vm0  ;;  %v984_v10 = vadd.s32 %v856_v46, %v5072_v5  ;;  %v888_v42 = vadd.s32 968, %v5068_v3  ;;  %v857_v38 = vadd.s32 720, %v5068_v3  ;;  %v4619_v17 = vcombine.high %v7348_v12, %v7362_v33 }
  0xdf   : > { %v9590_v31 = vsel %vm7400_vm6, 4294967295, %v9589_v31  ;;  %3872 = vmatprep.subr.bf16.mxu0 %v9592_v41  ;;  %3913 = vmatprep.subr.bf16.mxu1 %v4689_v55  ;;  %v4698_v29 = vcombine.low %v7369_v18, %v7373_v37  ;;  %vm9593_vm0 = vcmp.lt.s32.totalorder %v981_v24, 1000  ;;  %v9594_v55 = vmov 0  ;;  %v549_v24 = vld [vmem:[%s5299_s27 + $0x6b8] sm:$0xff]  ;;  %v552_v41 = vld [vmem:[%s5299_s27 + $0x6cc] sm:$0xff] }
  0xe0   : > { %9591 = vst [vmem:[#allocation108_spill] sm:$0xff] %v9590_v31  ;;  %vm7419_vm4 = vmpackc.low %vm9593_vm0, %vm9593_vm0  ;;  %v4699_v46 = vcombine.high %v7369_v18, %v7373_v37  ;;  %v7427_v54 = vsel %vm7377_vm9, %v639_v53, 0  ;;  %v7431_v6 = vsel %vm7400_vm6, %v642_v60, 0  ;;  %vm9597_vm0 = vcmp.lt.s32.totalorder %v982_v21, 1000 }
  0xe1   : > { %v9595_v55 = vsel %vm7419_vm4, 4294967295, %v9594_v55  ;;  %vm7437_vm15 = vmpackc.low %vm9597_vm0, %vm9597_vm0  ;;  %v9598_v48 = vmov 0  ;;  %v1015_v18 = vadd.s32 %v887_v39, %v5072_v5  ;;  %v9601_v53 = vcombine.low %v7171_v44, %v7175_v56  ;;  %v645_v56 = vld [vmem:[%s5299_s27 + $0x938] sm:$0xff] }
  0xe2   : > { %9596 = vst [vmem:[#allocation109_spill] sm:$0xff] %v9595_v55  ;;  %v9599_v48 = vsel %vm7437_vm15, 4294967295, %v9598_v48  ;;  %v9602_v37 = vcombine.low %v7210_v22, %v7214_v58  ;;  %vm9603_vm1 = vcmp.lt.s32.totalorder %v1013_v27, 1000  ;;  %v9604_v21 = vmov 0  ;;  %v648_v22 = vld [vmem:[%s5299_s27 + $0x94c] sm:$0xff]  ;;  %v558_v55 = vld [vmem:[%s5299_s27 + $0x6f4] sm:$0xff] }
  0xe3   : > { %9600 = vst [vmem:[#allocation110_spill] sm:$0xff] %v9599_v48  ;;  %3873 = vmatpush1.bf16.msra.mxu0 %v9601_v53  ;;  %vm7452_vm6 = vmpackc.low %vm9603_vm1, %vm9603_vm1  ;;  %vm1111_vm0 = vcmp.lt.s32.totalorder %v983_v13, 1000  ;;  %v1016_v39 = vadd.s32 %v888_v42, %v5072_v5  ;;  %v858_v31 = vadd.s32 728, %v5068_v3  ;;  %v4624_v44 = vcombine.high %v7390_v59, %v7394_v47  ;;  %v555_v48 = vld [vmem:[%s5299_s27 + $0x6e0] sm:$0xff] }
  0xe4   : > { %3914 = vmatpush1.bf16.msra.mxu1 %v9602_v37  ;;  %v9605_v21 = vsel %vm7452_vm6, 4294967295, %v9604_v21  ;;  %3874 = vmatprep.subr.bf16.mxu0 %v4614_v4  ;;  %vm9607_vm9 = vcmp.lt.s32.totalorder %v1014_v16, 1000  ;;  %v9608_v58 = vmov 0  ;;  %v985_v27 = vadd.s32 %v857_v38, %v5072_v5 }
  0xe5   : > { %9606 = vst [vmem:[#allocation111_spill] sm:$0xff] %v9605_v21  ;;  %3915 = vmatprep.subr.bf16.mxu1 %v4694_v43  ;;  %vm7464_vm14 = vmpackc.low %vm9607_vm9, %vm9607_vm9  ;;  %v889_v42 = vadd.s32 976, %v5068_v3  ;;  %v7474_v43 = vsel %vm7419_vm4, %v549_v24, 0  ;;  %v7478_v16 = vsel %vm7437_vm15, %v552_v41, 0  ;;  %v986_v53 = vadd.s32 %v858_v31, %v5072_v5 }
  0xe6   : > { %v9609_v58 = vsel %vm7464_vm14, 4294967295, %v9608_v58  ;;  %v4704_v37 = vcombine.high %v7427_v54, %v7431_v6  ;;  %vm7485_vm9 = vmpackc.low %vm1111_vm0, %vm1111_vm0  ;;  %v9611_v38 = vmov 0  ;;  %v890_v4 = vadd.s32 984, %v5068_v3 }
  0xe7   : > { %9610 = vst [vmem:[#allocation112_spill] sm:$0xff] %v9609_v58  ;;  %v9612_v38 = vsel %vm7485_vm9, 4294967295, %v9611_v38  ;;  %v1017_v24 = vadd.s32 %v889_v42, %v5072_v5  ;;  %v9614_v41 = vcombine.low %v7258_v63, %v7269_v52  ;;  %v9615_v31 = vcombine.low %v7287_v26, %v7291_v35 }
  0xe8   : > { %9613 = vst [vmem:[#allocation113_spill] sm:$0xff] %v9612_v38  ;;  %v7499_v13 = vsel %vm7452_vm6, %v645_v56, 0  ;;  %v7503_v60 = vsel %vm7464_vm14, %v648_v22, 0  ;;  %vm9616_vm0 = vcmp.lt.s32.totalorder %v984_v10, 1000  ;;  %v9617_v42 = vmov 0  ;;  %v657_v38 = vld [vmem:[%s5299_s27 + $0x988] sm:$0xff] }
  0xe9   : > { %3875 = vmatpush1.bf16.msra.mxu0 %v9614_v41  ;;  %3916 = vmatpush1.bf16.msra.mxu1 %v9615_v31  ;;  %vm7509_vm1 = vmpackc.low %vm9616_vm0, %vm9616_vm0  ;;  %v859_v52 = vadd.s32 736, %v5068_v3  ;;  %v4629_v63 = vcombine.high %v7474_v43, %v7478_v16  ;;  %v1018_v26 = vadd.s32 %v890_v4, %v5072_v5  ;;  %v860_v35 = vadd.s32 744, %v5068_v3  ;;  %v651_v41 = vld [vmem:[%s5299_s27 + $0x960] sm:$0xff]  ;;  %v654_v31 = vld [vmem:[%s5299_s27 + $0x974] sm:$0xff] }
  0xea   : > { %v9618_v42 = vsel %vm7509_vm1, 4294967295, %v9617_v42  ;;  %3876 = vmatprep.subr.bf16.mxu0 %v4619_v17  ;;  %3917 = vmatprep.subr.bf16.mxu1 %v4699_v46  ;;  %vm9620_vm6 = vcmp.lt.s32.totalorder %v1015_v18, 1000  ;;  %v9621_v10 = vmov 0  ;;  %v891_v17 = vadd.s32 992, %v5068_v3 }
  0xeb   : > { %9619 = vst [vmem:[#allocation114_spill] sm:$0xff] %v9618_v42  ;;  %vm7520_vm0 = vmpackc.low %vm9620_vm6, %vm9620_vm6  ;;  %v987_v56 = vadd.s32 %v859_v52, %v5072_v5  ;;  %v892_v46 = vadd.s32 1000, %v5068_v3  ;;  %v4709_v22 = vcombine.high %v7499_v13, %v7503_v60  ;;  %v7531_v4 = vsel %vm7485_vm9, %v555_v48, 0 }
  0xec   : > { %v9622_v10 = vsel %vm7520_vm0, 4294967295, %v9621_v10  ;;  %v7535_v18 = vsel %vm7509_vm1, %v558_v55, 0  ;;  %vm9623_vm6 = vcmp.lt.s32.totalorder %v1016_v39, 1000  ;;  %v9624_v52 = vmov 0 }
  0xed   : > { %vm7541_vm15 = vmpackc.low %vm9623_vm6, %vm9623_vm6  ;;  %v9626_v58 = vcombine.low %v7348_v12, %v7362_v33  ;;  %3918 = vmatpush1.bf16.msra.mxu1 %v4698_v29  ;;  %vm9627_vm9 = vcmp.lt.s32.totalorder %v985_v27, 1000  ;;  %v9628_v48 = vmov 0  ;;  %v988_v55 = vadd.s32 %v860_v35, %v5072_v5  ;;  %v564_v35 = vld [vmem:[%s5299_s27 + $0x71c] sm:$0xff] }
  0xee   : > { %v9625_v52 = vsel %vm7541_vm15, 4294967295, %v9624_v52  ;;  %vm7550_vm4 = vmpackc.low %vm9627_vm9, %vm9627_vm9  ;;  %v1019_v39 = vadd.s32 %v891_v17, %v5072_v5  ;;  %v1020_v42 = vadd.s32 %v892_v46, %v5072_v5  ;;  %3919 = vmatprep.subr.bf16.mxu1 %v4704_v37  ;;  %vm9630_vm6 = vcmp.lt.s32.totalorder %v986_v53, 1000  ;;  %v561_v37 = vld [vmem:[%s5299_s27 + $0x708] sm:$0xff] }
  0xef   : > { %3877 = vmatpush1.bf16.msra.mxu0 %v9626_v58  ;;  %v9629_v48 = vsel %vm7550_vm4, 4294967295, %v9628_v48  ;;  %vm7559_vm14 = vmpackc.low %vm9630_vm6, %vm9630_vm6  ;;  %v9631_v12 = vmov 0  ;;  %v861_v33 = vadd.s32 752, %v5068_v3  ;;  %v862_v29 = vadd.s32 760, %v5068_v3 }
  0xf0   : > { %3878 = vmatprep.subr.bf16.mxu0 %v4624_v44  ;;  %v9632_v12 = vsel %vm7559_vm14, 4294967295, %v9631_v12  ;;  %v893_v58 = vadd.s32 1008, %v5068_v3  ;;  %v4628_v27 = vcombine.low %v7474_v43, %v7478_v16  ;;  %v1895_v44 = vsel %vm7520_vm0, %v651_v41, 0  ;;  %v660_v43 = vld [vmem:[%s5299_s27 + $0x99c] sm:$0xff] }
  0xf1   : > { %v1898_v53 = vsel %vm7541_vm15, %v654_v31, 0  ;;  %vm9633_vm6 = vcmp.lt.s32.totalorder %v1017_v24, 1000  ;;  %v9634_v17 = vmov 0  ;;  %vm1116_vm1 = vcmp.lt.s32.totalorder %v988_v55, 1000 }
  0xf2   : > { %vm7576_vm9 = vmpackc.low %vm9633_vm6, %vm9633_vm6  ;;  %v4708_v46 = vcombine.low %v7499_v13, %v7503_v60  ;;  %vm9636_vm7 = vcmp.lt.s32.totalorder %v1018_v26, 1000  ;;  %v9637_v16 = vmov 0  ;;  %v989_v24 = vadd.s32 %v861_v33, %v5072_v5 }
  0xf3   : > { %v9635_v17 = vsel %vm7576_vm9, 4294967295, %v9634_v17  ;;  %vm7586_vm0 = vmpackc.low %vm9636_vm7, %vm9636_vm7  ;;  %v990_v41 = vadd.s32 %v862_v29, %v5072_v5  ;;  %v9640_v31 = vcombine.low %v7390_v59, %v7394_v47  ;;  %v9641_v60 = vcombine.low %v7427_v54, %v7431_v6  ;;  %v570_v29 = vld [vmem:[%s5299_s27 + $0x744] sm:$0xff] }
  0xf4   : > { %v9638_v16 = vsel %vm7586_vm0, 4294967295, %v9637_v16  ;;  %v4634_v13 = vcombine.high %v7531_v4, %v7535_v18  ;;  %vm9642_vm7 = vcmp.lt.s32.totalorder %v987_v56, 1000  ;;  %v9643_v26 = vmov 0 }
  0xf5   : > { %9639 = vst [vmem:[#allocation115_spill] sm:$0xff] %v9638_v16  ;;  %3879 = vmatpush1.bf16.msra.mxu0 %v9640_v31  ;;  %3920 = vmatpush1.bf16.msra.mxu1 %v9641_v60  ;;  %vm7602_vm6 = vmpackc.low %vm9642_vm7, %vm9642_vm7  ;;  %v894_v33 = vadd.s32 1016, %v5068_v3  ;;  %v1021_v59 = vadd.s32 %v893_v58, %v5072_v5  ;;  %v4714_v47 = vcombine.high %v1895_v44, %v1898_v53  ;;  %v1805_v54 = vsel %vm7550_vm4, %v561_v37, 0  ;;  %v663_v37 = vld [vmem:[%s5299_s27 + $0x9b0] sm:$0xff]  ;;  %v669_v60 = vld [vmem:[%s5299_s27 + $0x9d8] sm:$0xff] }
  0xf6   : > { %v9644_v26 = vsel %vm7602_vm6, 4294967295, %v9643_v26  ;;  %3880 = vmatprep.subr.bf16.mxu0 %v4629_v63  ;;  %3921 = vmatprep.subr.bf16.mxu1 %v4709_v22  ;;  %v1808_v6 = vsel %vm7559_vm14, %v564_v35, 0  ;;  %vm7614_vm7 = vmpackc.low %vm1116_vm1, %vm1116_vm1  ;;  %v9646_v56 = vmov 0  ;;  %v1901_v3 = vsel %vm7576_vm9, %v657_v38, 0  ;;  %v567_v22 = vld [vmem:[%s5299_s27 + $0x730] sm:$0xff]  ;;  %v666_v35 = vld [vmem:[%s5299_s27 + $0x9c4] sm:$0xff] }
  0xf7   : > { %9645 = vst [vmem:[#allocation116_spill] sm:$0xff] %v9644_v26  ;;  %v9647_v56 = vsel %vm7614_vm7, 4294967295, %v9646_v56  ;;  %v1904_v63 = vsel %vm7586_vm0, %v660_v43, 0  ;;  %vm9649_vm12 = vcmp.lt.s32.totalorder %v1019_v39, 1000  ;;  %v9650_v58 = vmov 0 }
  0xf8   : > { %9648 = vst [vmem:[#allocation117_spill] sm:$0xff] %v9647_v56  ;;  %vm7626_vm4 = vmpackc.low %vm9649_vm12, %vm9649_vm12  ;;  %v1022_v55 = vadd.s32 %v894_v33, %v5072_v5  ;;  %vm9653_vm1 = vcmp.lt.s32.totalorder %v1020_v42, 1000  ;;  %v9654_v38 = vmov 0  ;;  %v4633_v39 = vcombine.low %v7531_v4, %v7535_v18  ;;  %v302_v26 = vld [vmem:[%s5299_s27 + $0x4c] sm:$0xf] }
  0xf9   : > { %v9651_v58 = vsel %vm7626_vm4, 4294967295, %v9650_v58  ;;  %vm7635_vm15 = vmpackc.low %vm9653_vm1, %vm9653_vm1  ;;  %3881 = vmatpush1.bf16.msra.mxu0 %v4628_v27  ;;  %3922 = vmatpush1.bf16.msra.mxu1 %v4708_v46  ;;  %v4713_v43 = vcombine.low %v1895_v44, %v1898_v53  ;;  %vm9657_vm12 = vcmp.lt.s32.totalorder %v989_v24, 1000  ;;  %v9658_v5 = vmov 0  ;;  %v573_v46 = vld [vmem:[%s5299_s27 + $0x758] sm:$0xff]  ;;  %v576_v24 = vld [vmem:[%s5299_s27 + $0x76c] sm:$0xff] }
  0xfa   : > { %9652 = vst [vmem:[#allocation118_spill] sm:$0xff] %v9651_v58  ;;  %v9655_v38 = vsel %vm7635_vm15, 4294967295, %v9654_v38  ;;  %vm7643_vm14 = vmpackc.low %vm9657_vm12, %vm9657_vm12  ;;  %vm1150_vm1 = vcmp.lt.s32.totalorder %v1022_v55, 1000  ;;  %3882 = vmatprep.subr.bf16.mxu0 %v4634_v13  ;;  %3923 = vmatprep.subr.bf16.mxu1 %v4714_v47  ;;  %v4639_v42 = vcombine.high %v1805_v54, %v1808_v6  ;;  %v4719_v31 = vcombine.high %v1901_v3, %v1904_v63  ;;  %v672_v13 = vld [vmem:[%s5299_s27 + $0x9ec] sm:$0xff] }
  0xfb   : > { %9656 = vst [vmem:[#allocation119_spill] sm:$0xff] %v9655_v38  ;;  %v9659_v5 = vsel %vm7643_vm14, 4294967295, %v9658_v5  ;;  %vm9661_vm0 = vcmp.lt.s32.totalorder %v990_v41, 1000  ;;  %v9662_v27 = vmov 0  ;;  %v1811_v4 = vsel %vm7602_vm6, %v567_v22, 0 }
  0xfc   : > { %9660 = vst [vmem:[#allocation120_spill] sm:$0xff] %v9659_v5  ;;  %vm7649_vm9 = vmpackc.low %vm9661_vm0, %vm9661_vm0  ;;  %v1814_v18 = vsel %vm7614_vm7, %v570_v29, 0  ;;  %v1907_v44 = vsel %vm7626_vm4, %v663_v37, 0  ;;  %v1910_v53 = vsel %vm7635_vm15, %v666_v35, 0  ;;  %vm9665_vm12 = vcmp.lt.s32.totalorder %v1021_v59, 1000 }
  0xfd   : > { %v9663_v27 = vsel %vm7649_vm9, 4294967295, %v9662_v27  ;;  %vm7665_vm0 = vmpackc.low %vm9665_vm12, %vm9665_vm12  ;;  %v9666_v41 = vmov 0  ;;  %v9669_v33 = vmov 0  ;;  %3883 = vmatpush1.bf16.msra.mxu0 %v4633_v39  ;;  %3924 = vmatpush1.bf16.msra.mxu1 %v4713_v43  ;;  %v4638_v47 = vcombine.low %v1805_v54, %v1808_v6  ;;  %v292_v39 = vld [vmem:[%s5299_s27 + $0x8] sm:$0xff]  ;;  %v295_v54 = vld [vmem:[%s5299_s27 + $0x1c] sm:$0xff] }
  0xfe   : > { %9664 = vst [vmem:[#allocation121_spill] sm:$0xff] %v9663_v27  ;;  %v9667_v41 = vsel %vm7665_vm0, 4294967295, %v9666_v41  ;;  %vm7671_vm7 = vmpackc.low %vm1150_vm1, %vm1150_vm1  ;;  %v4718_v22 = vcombine.low %v1901_v3, %v1904_v63  ;;  %3884 = vmatprep.subr.bf16.mxu0 %v4639_v42  ;;  %3925 = vmatprep.subr.bf16.mxu1 %v4719_v31  ;;  %v4644_v59 = vcombine.high %v1811_v4, %v1814_v18  ;;  %v1817_v55 = vsel %vm7643_vm14, %v573_v46, 0  ;;  %v388_v6 = vld [vmem:[%s5299_s27 + $0x288] sm:$0xff]  ;;  %v391_v3 = vld [vmem:[%s5299_s27 + $0x29c] sm:$0xff] }
  0xff   : > { %9668 = vst [vmem:[#allocation122_spill] sm:$0xff] %v9667_v41  ;;  %v9670_v33 = vsel %vm7671_vm7, 4294967295, %v9669_v33  ;;  %v4724_v29 = vcombine.high %v1907_v44, %v1910_v53  ;;  %v1820_v37 = vsel %vm7649_vm9, %v576_v24, 0  ;;  %v1913_v35 = vsel %vm7665_vm0, %v669_v60, 0  ;;  %v9673_v24 = vld [vmem:[#allocation8_spill] sm:$0xff]  ;;  %v9677_v41 = vld [vmem:[#allocation10_spill] sm:$0xff] }
 0x100   : > { %9671 = vst [vmem:[#allocation123_spill] sm:$0xff] %v9670_v33  ;;  %v1916_v38 = vsel %vm7671_vm7, %v672_v13, 0  ;;  %v4643_v63 = vcombine.low %v1811_v4, %v1814_v18  ;;  %v4723_v43 = vcombine.low %v1907_v44, %v1910_v53  ;;  %v4649_v42 = vcombine.high %v1817_v55, %v1820_v37  ;;  %v9675_v13 = vld [vmem:[#allocation9_spill] sm:$0xff]  ;;  %v301_v4 = vld [vmem:[%s5299_s27 + $0x44] sm:$0xff]  ;;  %v394_v18 = vld [vmem:[%s5299_s27 + $0x2b0] sm:$0xff] }
 0x101   : > { %3885 = vmatpush1.bf16.msra.mxu0 %v4638_v47  ;;  %3926 = vmatpush1.bf16.msra.mxu1 %v4718_v22  ;;  %v4729_v31 = vcombine.high %v1913_v35, %v1916_v38  ;;  %vm9672_vm1 = vnez %v9075_v19  ;;  %vm9674_vm12 = vnez %v9673_v24  ;;  %vm9676_vm7 = vnez %v9675_v13  ;;  %v298_v47 = vld [vmem:[%s5299_s27 + $0x30] sm:$0xff]  ;;  %v397_v44 = vld [vmem:[%s5299_s27 + $0x2c4] sm:$0xff]  ;;  %v350_v5 = vld [vmem:[%s5299_s27 + $0x18c] sm:$0xf] }
 0x102   : > { %3886 = vmatprep.subr.bf16.mxu0 %v4644_v59  ;;  %3927 = vmatprep.subr.bf16.mxu1 %v4724_v29  ;;  %v1536_v46 = vsel %vm9672_vm1, %v292_v39, 0  ;;  %v1539_v60 = vsel %vm9674_vm12, %v295_v54, 0  ;;  %v1632_v33 = vsel %vm9676_vm7, %v388_v6, 0  ;;  %vm9678_vm0 = vnez %v9677_v41  ;;  %v9679_v39 = vld [vmem:[#allocation11_spill] sm:$0xff]  ;;  %v9681_v6 = vld [vmem:[#allocation12_spill] sm:$0xff]  ;;  %v9683_v41 = vld [vmem:[#allocation13_spill] sm:$0xff] }
 0x103   : > { %v1635_v27 = vsel %vm9678_vm0, %v391_v3, 0  ;;  %v4648_v53 = vcombine.low %v1817_v55, %v1820_v37  ;;  %v4728_v22 = vcombine.low %v1913_v35, %v1916_v38  ;;  %v4416_v59 = vcombine.high %v1536_v46, %v1539_v60  ;;  %v9685_v24 = vld [vmem:[#allocation14_spill] sm:$0xff]  ;;  %v307_v55 = vld [vmem:[%s5299_s27 + $0x6c] sm:$0xff]  ;;  %v400_v38 = vld [vmem:[%s5299_s27 + $0x2d8] sm:$0xff] }
 0x104   : > { %v4496_v29 = vcombine.high %v1632_v33, %v1635_v27  ;;  %vm9680_vm7 = vnez %v9679_v39  ;;  %vm9682_vm0 = vnez %v9681_v6  ;;  %vm9684_vm12 = vnez %v9683_v41  ;;  %v403_v37 = vld [vmem:[%s5299_s27 + $0x2ec] sm:$0xff]  ;;  %v9692_v6 = vld [vmem:[#allocation18_spill] sm:$0xff] }
 0x105   : > { %3887 = vmatpush1.bf16.msra.mxu0 %v4643_v63  ;;  %3928 = vmatpush1.bf16.msra.mxu1 %v4723_v43  ;;  %v1542_v54 = vsel %vm9680_vm7, %v298_v47, 0  ;;  %v1545_v3 = vsel %vm9682_vm0, %v301_v4, 0  ;;  %v1638_v13 = vsel %vm9684_vm12, %v394_v18, 0  ;;  %vm9686_vm1 = vnez %v9685_v24  ;;  %v304_v63 = vld [vmem:[%s5299_s27 + $0x58] sm:$0xff]  ;;  %v9687_v47 = vld [vmem:[#allocation15_spill] sm:$0xff]  ;;  %v9689_v18 = vld [vmem:[#allocation16_spill] sm:$0xff] }
 0x106   : > { %3888 = vmatprep.subr.bf16.mxu0 %v4649_v42  ;;  %3929 = vmatprep.subr.bf16.mxu1 %v4729_v31  ;;  %v1641_v19 = vsel %vm9686_vm1, %v397_v44, 0  ;;  %v4415_v35 = vcombine.low %v1536_v46, %v1539_v60  ;;  %v4495_v43 = vcombine.low %v1632_v33, %v1635_v27  ;;  %v4421_v42 = vcombine.high %v1542_v54, %v1545_v3  ;;  %v313_v33 = vld [vmem:[%s5299_s27 + $0x94] sm:$0xff]  ;;  %v406_v60 = vld [vmem:[%s5299_s27 + $0x300] sm:$0xff] }
 0x107   : > { %v4501_v31 = vcombine.high %v1638_v13, %v1641_v19  ;;  %vm9688_vm12 = vnez %v9687_v47  ;;  %vm9690_vm1 = vnez %v9689_v18  ;;  %v1644_v41 = vsel %vm5514_vm10, %v400_v38, 0  ;;  %v9698_v24 = vld [vmem:[#allocation20_spill] sm:$0xff]  ;;  %v9700_v47 = vld [vmem:[#allocation21_spill] sm:$0xff]  ;;  %v9702_v46 = vld [vmem:[#allocation22_spill] sm:$0xff] }
 0x108   : > { %v1548_v4 = vsel %vm9688_vm12, %v304_v63, 0  ;;  %v1551_v44 = vsel %vm9690_vm1, %v307_v55, 0  ;;  %vm9693_vm0 = vnez %v9692_v6  ;;  %v4500_v63 = vcombine.low %v1638_v13, %v1641_v19  ;;  %v319_v19 = vld [vmem:[%s5299_s27 + $0xbc] sm:$0xff]  ;;  %v412_v13 = vld [vmem:[%s5299_s27 + $0x328] sm:$0xff] }
 0x109   : > { %3889 = vmatpush1.bf16.msra.mxu0 %v4648_v53  ;;  %3930 = vmatpush1.bf16.msra.mxu1 %v4728_v22  ;;  %v1647_v53 = vsel %vm9693_vm0, %v403_v37, 0  ;;  %v310_v22 = vld [vmem:[%s5299_s27 + $0x80] sm:$0xff]  ;;  %v4426_v55 = vcombine.high %v1548_v4, %v1551_v44  ;;  %v9696_v37 = vld [vmem:[#allocation19_spill] sm:$0xff]  ;;  %vm9699_vm10 = vnez %v9698_v24  ;;  %vm9701_vm1 = vnez %v9700_v47  ;;  %v9709_v47 = vld [vmem:[#allocation25_spill] sm:$0xff] }
 0x10a   : > { %3940 = vmatprep.subr.bf16.mxu0 %v4416_v59  ;;  %3981 = vmatprep.subr.bf16.mxu1 %v4496_v29  ;;  %v409_v59 = vld [vmem:[%s5299_s27 + $0x314] sm:$0xff]  ;;  %v4420_v29 = vcombine.low %v1542_v54, %v1545_v3  ;;  %v4506_v38 = vcombine.high %v1644_v41, %v1647_v53  ;;  %vm9697_vm0 = vnez %v9696_v37  ;;  %v1557_v18 = vsel %vm9699_vm10, %v313_v33, 0  ;;  %v415_v54 = vld [vmem:[%s5299_s27 + $0x33c] sm:$0xff]  ;;  %v9705_v33 = vld [vmem:[#allocation23_spill] sm:$0xff] }
 0x10b   : > { %v1554_v6 = vsel %vm9697_vm0, %v310_v22, 0  ;;  %v1650_v27 = vsel %vm9701_vm1, %v406_v60, 0  ;;  %vm9703_vm12 = vnez %v9702_v46  ;;  %v4425_v3 = vcombine.low %v1548_v4, %v1551_v44  ;;  %v9711_v37 = vld [vmem:[#allocation26_spill] sm:$0xff] }
 0x10c   : > { %4744 = vmatmul.mubr.msk.bf16.vlgmr.msra.gmra.mrb[12].mxu0 %vm5789_vm8, %v9225_v34  ;;  %4748 = vmatmul.mubr.msk.bf16.vlgmr.msra.gmra.mrb[12].mxu1 %vm5796_vm13, %v9225_v34  ;;  %vm9704_vm13 = vnez %v9053_v32  ;;  %vm9710_vm10 = vnez %v9709_v47  ;;  %vm9712_vm0 = vnez %v9711_v37  ;;  %v325_v4 = vld [vmem:[%s5299_s27 + $0xe4] sm:$0xff]  ;;  %v9717_v37 = vld [vmem:[#allocation29_spill] sm:$0xff] }
 0x10d   : > { %3941 = vmatpush1.bf16.msra.mxu0 %v4415_v35  ;;  %3982 = vmatpush1.bf16.msra.mxu1 %v4495_v43  ;;  %v1653_v35 = vsel %vm9703_vm12, %v409_v59, 0  ;;  %v316_v43 = vld [vmem:[%s5299_s27 + $0xa8] sm:$0xff]  ;;  %vm9706_vm12 = vnez %v9705_v33  ;;  %v9707_v59 = vld [vmem:[#allocation24_spill] sm:$0xff]  ;;  %v1656_v24 = vsel %vm9710_vm10, %v412_v13, 0  ;;  %v1659_v32 = vsel %vm9712_vm0, %v415_v54, 0  ;;  %v328_v33 = vld [vmem:[%s5299_s27 + $0xf8] sm:$0xff] }
 0x10e   : > { %3942 = vmatprep.subr.bf16.mxu0 %v4421_v42  ;;  %3983 = vmatprep.subr.bf16.mxu1 %v4501_v31  ;;  %v4505_v42 = vcombine.low %v1644_v41, %v1647_v53  ;;  %v4431_v31 = vcombine.high %v1554_v6, %v1557_v18  ;;  %v4511_v22 = vcombine.high %v1650_v27, %v1653_v35  ;;  %v1560_v60 = vsel %vm9706_vm12, %v316_v43, 0  ;;  %v418_v41 = vld [vmem:[%s5299_s27 + $0x350] sm:$0xff]  ;;  %v421_v44 = vld [vmem:[%s5299_s27 + $0x364] sm:$0xff] }
 0x10f   : > { %4750 = vmatprep.mubr.msk.bf16.mxu0 %vm5115_vm5, %v9225_v34  ;;  %4754 = vmatprep.mubr.msk.bf16.mxu1 %vm9704_vm13, %v9225_v34  ;;  %vm9708_vm1 = vnez %v9707_v59  ;;  %v4430_v53 = vcombine.low %v1554_v6, %v1557_v18  ;;  %v9713_v43 = vld [vmem:[#allocation27_spill] sm:$0xff]  ;;  %v9715_v13 = vld [vmem:[#allocation28_spill] sm:$0xff]  ;;  %v9719_v59 = vld [vmem:[#allocation30_spill] sm:$0xff]  ;;  %vm9022_vm13 = vcmask 7168   ;;  %vm9743_vm5 = vnez %v9234_v23 }
 0x110   : > { %v1563_v46 = vsel %vm9708_vm1, %v319_v19, 0  ;;  %vm9714_vm10 = vnez %v9713_v43  ;;  %vm9716_vm0 = vnez %v9715_v13  ;;  %vm9718_vm1 = vnez %v9717_v37  ;;  %v331_v6 = vld [vmem:[%s5299_s27 + $0x10c] sm:$0xff]  ;;  %v424_v18 = vld [vmem:[%s5299_s27 + $0x378] sm:$0xff]  ;;  %v334_v43 = vld [vmem:[%s5299_s27 + $0x120] sm:$0xff] }
 0x111   : > { %3943 = vmatpush1.bf16.msra.mxu0 %v4420_v29  ;;  %3984 = vmatpush1.bf16.msra.mxu1 %v4500_v63  ;;  %v322_v29 = vld [vmem:[%s5299_s27 + $0xd0] sm:$0xff]  ;;  %v4510_v63 = vcombine.low %v1650_v27, %v1653_v35  ;;  %v1569_v54 = vsel %vm9716_vm0, %v325_v4, 0  ;;  %v1662_v47 = vsel %vm9718_vm1, %v418_v41, 0  ;;  %vm9720_vm12 = vnez %v9719_v59  ;;  %v9723_v41 = vld [vmem:[#allocation34_spill] sm:$0xff]  ;;  %v9725_v59 = vld [vmem:[#allocation35_spill] sm:$0xff] }
 0x112   : > { %3944 = vmatprep.subr.bf16.mxu0 %v4426_v55  ;;  %3985 = vmatprep.subr.bf16.mxu1 %v4506_v38  ;;  %v4436_v55 = vcombine.high %v1560_v60, %v1563_v46  ;;  %v4516_v38 = vcombine.high %v1656_v24, %v1659_v32  ;;  %v1566_v19 = vsel %vm9714_vm10, %v322_v29, 0  ;;  %v427_v27 = vld [vmem:[%s5299_s27 + $0x38c] sm:$0xff]  ;;  %v4435_v35 = vcombine.low %v1560_v60, %v1563_v46  ;;  %v9721_v29 = vld [vmem:[#allocation33_spill] sm:$0xff]  ;;  %v9893_v58 = vld [vmem:[#allocation122_spill] sm:$0xff] }
 0x113   : > { %vm9724_vm1 = vnez %v9723_v41  ;;  %vm9726_vm0 = vnez %v9725_v59  ;;  %v9727_v13 = vld [vmem:[#allocation36_spill] sm:$0xff]  ;;  %v401_v23 = vld [vmem:[%s5299_s27 + $0x2e0] sm:$0xf] }
 0x114   : > { %v1668_v37 = vsel %vm9726_vm0, %v424_v18, 0  ;;  %vm9728_vm10 = vnez %v9727_v13  ;;  %v433_v46 = vld [vmem:[%s5299_s27 + $0x3b4] sm:$0xff]  ;;  %v9731_v18 = vld [vmem:[#allocation38_spill] sm:$0xff]  ;;  %v9733_v13 = vld [vmem:[#allocation39_spill] sm:$0xff] }
 0x115   : > { %3945 = vmatpush1.bf16.msra.mxu0 %v4425_v3  ;;  %3986 = vmatpush1.bf16.msra.mxu1 %v4505_v42  ;;  %v1665_v3 = vsel %vm9720_vm12, %v421_v44, 0  ;;  %v4515_v42 = vcombine.low %v1656_v24, %v1659_v32  ;;  %vm9722_vm12 = vnez %v9721_v29  ;;  %v1575_v44 = vsel %vm9724_vm1, %v331_v6, 0  ;;  %v337_v32 = vld [vmem:[%s5299_s27 + $0x134] sm:$0xff]  ;;  %v430_v24 = vld [vmem:[%s5299_s27 + $0x3a0] sm:$0xff]  ;;  %v340_v29 = vld [vmem:[%s5299_s27 + $0x148] sm:$0xff] }
 0x116   : > { %3946 = vmatprep.subr.bf16.mxu0 %v4431_v31  ;;  %3987 = vmatprep.subr.bf16.mxu1 %v4511_v22  ;;  %v4441_v31 = vcombine.high %v1566_v19, %v1569_v54  ;;  %v4521_v22 = vcombine.high %v1662_v47, %v1665_v3  ;;  %v1572_v4 = vsel %vm9722_vm12, %v328_v33, 0  ;;  %v4440_v33 = vcombine.low %v1566_v19, %v1569_v54  ;;  %v9735_v41 = vld [vmem:[#allocation40_spill] sm:$0xff]  ;;  %v343_v19 = vld [vmem:[%s5299_s27 + $0x15c] sm:$0xff] }
 0x117   : > { %v4520_v60 = vcombine.low %v1662_v47, %v1665_v3  ;;  %vm9732_vm0 = vnez %v9731_v18  ;;  %vm9734_vm1 = vnez %v9733_v13  ;;  %vm9736_vm12 = vnez %v9735_v41  ;;  %v436_v47 = vld [vmem:[%s5299_s27 + $0x3c8] sm:$0xff]  ;;  %v439_v54 = vld [vmem:[%s5299_s27 + $0x3dc] sm:$0xff] }
 0x118   : > { %v1674_v59 = vsel %vm9734_vm1, %v430_v24, 0  ;;  %v9744_v41 = vld [vmem:[#allocation43_spill] sm:$0xff]  ;;  %v9748_v18 = vld [vmem:[#allocation45_spill] sm:$0xff] }
 0x119   : > { %3947 = vmatpush1.bf16.msra.mxu0 %v4430_v53  ;;  %3988 = vmatpush1.bf16.msra.mxu1 %v4510_v63  ;;  %v1671_v53 = vsel %vm9728_vm10, %v427_v27, 0  ;;  %v4446_v63 = vcombine.high %v1572_v4, %v1575_v44  ;;  %v1581_v27 = vsel %vm9732_vm0, %v337_v32, 0  ;;  %v9738_v32 = vld [vmem:[#allocation41_spill] sm:$0xff]  ;;  %vm9740_vm0 = vnez %v9224_v14 }
 0x11a   : > { %3948 = vmatprep.subr.bf16.mxu0 %v4436_v55  ;;  %3989 = vmatprep.subr.bf16.mxu1 %v4516_v38  ;;  %v4526_v55 = vcombine.high %v1668_v37, %v1671_v53  ;;  %v9729_v38 = vld [vmem:[#allocation37_spill] sm:$0xff]  ;;  %v4525_v3 = vcombine.low %v1668_v37, %v1671_v53  ;;  %vm9739_vm1 = vnez %v9738_v32  ;;  %v9741_v37 = vld [vmem:[#allocation42_spill] sm:$0xff]  ;;  %v346_v53 = vld [vmem:[%s5299_s27 + $0x170] sm:$0xff]  ;;  %vm9745_vm8 = vnez %v9744_v41 }
 0x11b   : > { %vm9730_vm10 = vnez %v9729_v38  ;;  %v1587_v24 = vsel %vm9739_vm1, %v343_v19, 0  ;;  %v9898_v32 = vld [vmem:[#allocation7_spill] sm:$0xff] }
 0x11c   : > { %v1578_v6 = vsel %vm9730_vm10, %v334_v43, 0  ;;  %v4445_v43 = vcombine.low %v1572_v4, %v1575_v44  ;;  %v1680_v4 = vsel %vm9740_vm0, %v436_v47, 0  ;;  %vm9742_vm10 = vnez %v9741_v37 }
 0x11d   : > { %3949 = vmatpush1.bf16.msra.mxu0 %v4435_v35  ;;  %3990 = vmatpush1.bf16.msra.mxu1 %v4515_v42  ;;  %v1677_v35 = vsel %vm9736_vm12, %v433_v46, 0  ;;  %v4451_v42 = vcombine.high %v1578_v6, %v1581_v27  ;;  %vm9737_vm12 = vnez %v9215_v30  ;;  %v1683_v44 = vsel %vm9742_vm10, %v439_v54, 0  ;;  %v349_v46 = vld [vmem:[%s5299_s27 + $0x184] sm:$0xff]  ;;  %v395_v30 = vld [vmem:[%s5299_s27 + $0x2b8] sm:$0xf] }
 0x11e   : > { %3950 = vmatprep.subr.bf16.mxu0 %v4441_v31  ;;  %3991 = vmatprep.subr.bf16.mxu1 %v4521_v22  ;;  %v4531_v31 = vcombine.high %v1674_v59, %v1677_v35  ;;  %v1584_v22 = vsel %vm9737_vm12, %v340_v29, 0  ;;  %v4450_v29 = vcombine.low %v1578_v6, %v1581_v27  ;;  %v4536_v47 = vcombine.high %v1680_v4, %v1683_v44  ;;  %v352_v6 = vld [vmem:[%s5299_s27 + $0x198] sm:$0xff]  ;;  %v355_v27 = vld [vmem:[%s5299_s27 + $0x1ac] sm:$0xff] }
 0x11f   : > { %v4456_v19 = vcombine.high %v1584_v22, %v1587_v24  ;;  %v1590_v54 = vsel %vm9743_vm5, %v346_v53, 0  ;;  %v1593_v13 = vsel %vm9745_vm8, %v349_v46, 0  ;;  %vm9749_vm10 = vnez %v9748_v18 }
 0x120   : > { %v4535_v53 = vcombine.low %v1680_v4, %v1683_v44  ;;  %v4461_v46 = vcombine.high %v1590_v54, %v1593_v13  ;;  %vm9755_vm8 = vnez %v9271_v9  ;;  %v457_v4 = vld [vmem:[%s5299_s27 + $0x454] sm:$0xff]  ;;  %v4460_v44 = vcombine.low %v1590_v54, %v1593_v13  ;;  %v367_v13 = vld [vmem:[%s5299_s27 + $0x1fc] sm:$0xff]  ;;  %v460_v54 = vld [vmem:[%s5299_s27 + $0x468] sm:$0xff] }
 0x121   : > { %3951 = vmatpush1.bf16.msra.mxu0 %v4440_v33  ;;  %3992 = vmatpush1.bf16.msra.mxu1 %v4520_v60  ;;  %v442_v33 = vld [vmem:[%s5299_s27 + $0x3f0] sm:$0xff]  ;;  %v445_v60 = vld [vmem:[%s5299_s27 + $0x404] sm:$0xff] }
 0x122   : > { %3952 = vmatprep.subr.bf16.mxu0 %v4446_v63  ;;  %3993 = vmatprep.subr.bf16.mxu1 %v4526_v55  ;;  %v4530_v63 = vcombine.low %v1674_v59, %v1677_v35  ;;  %v9021_v55 = vmov 0.0   ;;  %v1689_v59 = vsel %vm9749_vm10, %v445_v60, 0  ;;  %v448_v35 = vld [vmem:[%s5299_s27 + $0x418] sm:$0xff]  ;;  %v9752_v60 = vld [vmem:[#allocation47_spill] sm:$0xff]  ;;  %v9760_v9 = vld [vmem:[#allocation52_spill] sm:$0xff] }
 0x123   : > { %288 = vst.msk [vmem:[%s7805_s4] sm:$0xff] %vm9022_vm13, %v9021_v55  ;;  %vm9753_vm10 = vnez %v9752_v60  ;;  %v9762_v60 = vld [vmem:[#allocation53_spill] sm:$0xff] }
 0x124   : > { %v1599_v25 = vsel %vm9753_vm10, %v355_v27, 0  ;;  %vm9761_vm10 = vnez %v9760_v9 }
 0x125   : > { %3953 = vmatpush1.bf16.msra.mxu0 %v4445_v43  ;;  %3994 = vmatpush1.bf16.msra.mxu1 %v4525_v3  ;;  %v9746_v43 = vld [vmem:[#allocation44_spill] sm:$0xff] }
 0x126   : > { %3954 = vmatprep.subr.bf16.mxu0 %v4451_v42  ;;  %3995 = vmatprep.subr.bf16.mxu1 %v4531_v31  ;;  %vm9747_vm7 = vnez %v9746_v43  ;;  %v451_v42 = vld [vmem:[%s5299_s27 + $0x42c] sm:$0xff]  ;;  %v4455_v31 = vcombine.low %v1584_v22, %v1587_v24  ;;  %v361_v22 = vld [vmem:[%s5299_s27 + $0x1d4] sm:$0xff]  ;;  %v454_v24 = vld [vmem:[%s5299_s27 + $0x440] sm:$0xff] }
 0x127   : > { %v1686_v3 = vsel %vm9747_vm7, %v442_v33, 0  ;;  %v9750_v33 = vld [vmem:[#allocation46_spill] sm:$0xff]  ;;  %vm9754_vm7 = vnez %v9265_v0  ;;  %v1695_v18 = vsel %vm9755_vm8, %v451_v42, 0  ;;  %v1698_v0 = vsel %vm9761_vm10, %v454_v24, 0  ;;  %v9766_v24 = vld [vmem:[#allocation55_spill] sm:$0xff] }
 0x128   : > { %v4541_v55 = vcombine.high %v1686_v3, %v1689_v59  ;;  %vm9751_vm13 = vnez %v9750_v33  ;;  %v1692_v39 = vsel %vm9754_vm7, %v448_v35, 0  ;;  %v9758_v35 = vld [vmem:[#allocation51_spill] sm:$0xff] }
 0x129   : > { %3955 = vmatpush1.bf16.msra.mxu0 %v4450_v29  ;;  %3996 = vmatpush1.bf16.msra.mxu1 %v4530_v63  ;;  %v1596_v38 = vsel %vm9751_vm13, %v352_v6, 0  ;;  %v358_v29 = vld [vmem:[%s5299_s27 + $0x1c0] sm:$0xff]  ;;  %v4540_v63 = vcombine.low %v1686_v3, %v1689_v59  ;;  %vm9759_vm8 = vnez %v9758_v35  ;;  %vm9763_vm13 = vnez %v9762_v60  ;;  %v9768_v60 = vld [vmem:[#allocation56_spill] sm:$0xff]  ;;  %v9770_v35 = vld [vmem:[#allocation57_spill] sm:$0xff] }
 0x12a   : > { %3956 = vmatprep.subr.bf16.mxu0 %v4456_v19  ;;  %3997 = vmatprep.subr.bf16.mxu1 %v4536_v47  ;;  %v4466_v19 = vcombine.high %v1596_v38, %v1599_v25  ;;  %v4546_v47 = vcombine.high %v1692_v39, %v1695_v18  ;;  %v9756_v6 = vld [vmem:[#allocation50_spill] sm:$0xff]  ;;  %v1605_v42 = vsel %vm9759_vm8, %v361_v22, 0  ;;  %v1701_v33 = vsel %vm9763_vm13, %v457_v4, 0 }
 0x12b   : > { %vm9757_vm7 = vnez %v9756_v6  ;;  %v4465_v3 = vcombine.low %v1596_v38, %v1599_v25  ;;  %v4545_v59 = vcombine.low %v1692_v39, %v1695_v18  ;;  %vm9767_vm13 = vnez %v9766_v24  ;;  %v373_v25 = vld [vmem:[%s5299_s27 + $0x224] sm:$0xff]  ;;  %v466_v39 = vld [vmem:[%s5299_s27 + $0x490] sm:$0xff] }
 0x12c   : > { %v1602_v27 = vsel %vm9757_vm7, %v358_v29, 0  ;;  %v9764_v29 = vld [vmem:[#allocation54_spill] sm:$0xff]  ;;  %v1611_v4 = vsel %vm9767_vm13, %v367_v13, 0  ;;  %vm9769_vm8 = vnez %v9768_v60  ;;  %vm9771_vm7 = vnez %v9770_v35  ;;  %v9777_v60 = vld [vmem:[#allocation61_spill] sm:$0xff] }
 0x12d   : > { %3957 = vmatpush1.bf16.msra.mxu0 %v4455_v31  ;;  %3998 = vmatpush1.bf16.msra.mxu1 %v4535_v53  ;;  %v364_v31 = vld [vmem:[%s5299_s27 + $0x1e8] sm:$0xff]  ;;  %v4471_v53 = vcombine.high %v1602_v27, %v1605_v42  ;;  %vm9765_vm10 = vnez %v9764_v29  ;;  %v1704_v9 = vsel %vm9769_vm8, %v460_v54, 0  ;;  %v4470_v18 = vcombine.low %v1602_v27, %v1605_v42 }
 0x12e   : > { %3958 = vmatprep.subr.bf16.mxu0 %v4461_v46  ;;  %3999 = vmatprep.subr.bf16.mxu1 %v4541_v55  ;;  %v463_v55 = vld [vmem:[%s5299_s27 + $0x47c] sm:$0xff]  ;;  %v4551_v46 = vcombine.high %v1698_v0, %v1701_v33  ;;  %v1608_v22 = vsel %vm9765_vm10, %v364_v31, 0  ;;  %v469_v38 = vld [vmem:[%s5299_s27 + $0x4a4] sm:$0xff]  ;;  %vm9778_vm10 = vnez %v9777_v60  ;;  %v379_v27 = vld [vmem:[%s5299_s27 + $0x24c] sm:$0xff] }
 0x12f   : > { %v1707_v6 = vsel %vm9771_vm7, %v463_v55, 0  ;;  %v9772_v31 = vld [vmem:[#allocation58_spill] sm:$0xff]  ;;  %vm9774_vm7 = vnez %v9319_v2  ;;  %v9775_v55 = vld [vmem:[#allocation60_spill] sm:$0xff]  ;;  %v1713_v24 = vsel %vm9778_vm10, %v469_v38, 0  ;;  %v4475_v42 = vcombine.low %v1608_v22, %v1611_v4  ;;  %v9783_v60 = vld [vmem:[#allocation65_spill] sm:$0xff] }
 0x130   : > { %vm9773_vm8 = vnez %v9772_v31  ;;  %v1617_v54 = vsel %vm9774_vm7, %v373_v25, 0  ;;  %vm9776_vm13 = vnez %v9775_v55  ;;  %vm9780_vm10 = vnez %v9339_v49  ;;  %v9787_v49 = vld [vmem:[#allocation67_spill] sm:$0xff]  ;;  %v583_v2 = vld [vmem:[%s5299_s27 + $0x79c] sm:$0xff] }
 0x131   : > { %3959 = vmatpush1.bf16.msra.mxu0 %v4460_v44  ;;  %4000 = vmatpush1.bf16.msra.mxu1 %v4540_v63  ;;  %v370_v44 = vld [vmem:[%s5299_s27 + $0x210] sm:$0xff]  ;;  %v4550_v63 = vcombine.low %v1698_v0, %v1701_v33  ;;  %v1710_v35 = vsel %vm9776_vm13, %v466_v39, 0  ;;  %v472_v0 = vld [vmem:[%s5299_s27 + $0x4b8] sm:$0xff]  ;;  %vm9779_vm13 = vnez %v9333_v40  ;;  %v1623_v25 = vsel %vm9780_vm10, %v379_v27, 0  ;;  %v484_v27 = vld [vmem:[%s5299_s27 + $0x508] sm:$0xff] }
 0x132   : > { %3960 = vmatprep.subr.bf16.mxu0 %v4466_v19  ;;  %4001 = vmatprep.subr.bf16.mxu1 %v4546_v47  ;;  %v4476_v19 = vcombine.high %v1608_v22, %v1611_v4  ;;  %v4556_v47 = vcombine.high %v1704_v9, %v1707_v6  ;;  %v1614_v13 = vsel %vm9773_vm8, %v370_v44, 0  ;;  %v475_v33 = vld [vmem:[%s5299_s27 + $0x4cc] sm:$0xff]  ;;  %vm9784_vm8 = vnez %v9783_v60  ;;  %v385_v22 = vld [vmem:[%s5299_s27 + $0x274] sm:$0xff]  ;;  %v9785_v60 = vld [vmem:[#allocation66_spill] sm:$0xff] }
 0x133   : > { %v9781_v39 = vld [vmem:[#allocation64_spill] sm:$0xff]  ;;  %v4480_v4 = vcombine.low %v1614_v13, %v1617_v54  ;;  %v580_v55 = vld [vmem:[%s5299_s27 + $0x788] sm:$0xff] }
 0x134   : > { %vm9782_vm7 = vnez %v9781_v39  ;;  %v4821_v39 = vpop.f32.mrb[0].mxu1 }
 0x135   : > { %3961 = vmatpush1.bf16.msra.mxu0 %v4465_v3  ;;  %4002 = vmatpush1.bf16.msra.mxu1 %v4545_v59  ;;  %v376_v3 = vld [vmem:[%s5299_s27 + $0x238] sm:$0xff]  ;;  %v4555_v59 = vcombine.low %v1704_v9, %v1707_v6  ;;  %v1716_v38 = vsel %vm9782_vm7, %v472_v0, 0  ;;  %v478_v9 = vld [vmem:[%s5299_s27 + $0x4e0] sm:$0xff]  ;;  %v4799_v0 = vpop.f32.mrb[0].mxu0  ;;  %vm9788_vm7 = vnez %v9787_v49 }
 0x136   : > { %3962 = vmatprep.subr.bf16.mxu0 %v4471_v53  ;;  %4003 = vmatprep.subr.bf16.mxu1 %v4551_v46  ;;  %v4481_v53 = vcombine.high %v1614_v13, %v1617_v54  ;;  %v4561_v46 = vcombine.high %v1710_v35, %v1713_v24  ;;  %v1620_v44 = vsel %vm9779_vm13, %v376_v3, 0  ;;  %v481_v6 = vld [vmem:[%s5299_s27 + $0x4f4] sm:$0xff]  ;;  %v1629_v40 = vsel %vm9788_vm7, %v385_v22, 0 }
 0x137   : > { %v9791_v54 = vld [vmem:[#allocation69_spill] sm:$0xff] }
 0x138   : > { %vm9792_vm13 = vnez %v9791_v54 }
 0x139   : > { %3963 = vmatpush1.bf16.msra.mxu0 %v4470_v18  ;;  %4004 = vmatpush1.bf16.msra.mxu1 %v4550_v63  ;;  %v1719_v18 = vsel %vm9784_vm8, %v475_v33, 0  ;;  %v382_v63 = vld [vmem:[%s5299_s27 + $0x260] sm:$0xff]  ;;  %vm9786_vm8 = vnez %v9785_v60 }
 0x13a   : > { %3964 = vmatprep.subr.bf16.mxu0 %v4476_v19  ;;  %4005 = vmatprep.subr.bf16.mxu1 %v4556_v47  ;;  %v4560_v19 = vcombine.low %v1710_v35, %v1713_v24  ;;  %v4486_v47 = vcombine.high %v1620_v44, %v1623_v25  ;;  %v4566_v3 = vcombine.high %v1716_v38, %v1719_v18  ;;  %v1626_v33 = vsel %vm9786_vm8, %v382_v63, 0  ;;  %v4800_v24 = vpop.f32.mrb[1].mxu0 }
 0x13b   : > { %v1725_v35 = vsel %vm9792_vm13, %v481_v6, 0  ;;  %v4801_v31 = vadd.f32 %v4800_v24, %v4799_v0  ;;  %v4802_v43 = vpop.f32.mrb[2].mxu0  ;;  %v4565_v22 = vcombine.low %v1716_v38, %v1719_v18  ;;  %v4491_v6 = vcombine.high %v1626_v33, %v1629_v40  ;;  %v490_v18 = vld [vmem:[%s5299_s27 + $0x530] sm:$0xff] }
 0x13c   : > { %vm9793_vm13 = vnez %v9375_v57 }
 0x13d   : > { %3965 = vmatpush1.bf16.msra.mxu0 %v4475_v42  ;;  %4006 = vmatpush1.bf16.msra.mxu1 %v4555_v59  ;;  %v9789_v42 = vld [vmem:[#allocation68_spill] sm:$0xff]  ;;  %v4822_v59 = vpop.f32.mrb[1].mxu1 }
 0x13e   : > { %3966 = vmatprep.subr.bf16.mxu0 %v4481_v53  ;;  %4007 = vmatprep.subr.bf16.mxu1 %v4561_v46  ;;  %vm9790_vm10 = vnez %v9789_v42  ;;  %v4485_v53 = vcombine.low %v1620_v44, %v1623_v25  ;;  %v487_v46 = vld [vmem:[%s5299_s27 + $0x51c] sm:$0xff]  ;;  %v4823_v29 = vadd.f32 %v4822_v59, %v4821_v39  ;;  %v4824_v63 = vpop.f32.mrb[2].mxu1  ;;  %v1728_v25 = vsel %vm9793_vm13, %v484_v27, 0 }
 0x13f   : > { %v1722_v13 = vsel %vm9790_vm10, %v478_v9, 0  ;;  %v4803_v9 = vpop.f32.mrb[3].mxu0  ;;  %v4825_v54 = vpop.f32.mrb[3].mxu1  ;;  %vm9794_vm10 = vnez %v9380_v61  ;;  %v9795_v39 = vld [vmem:[#allocation70_spill] sm:$0xff] }
 0x140   : > { %v4571_v44 = vcombine.high %v1722_v13, %v1725_v35  ;;  %v7908_v0 = vadd.f32 %v4823_v29, %v4801_v31  ;;  %v1731_v43 = vsel %vm9794_vm10, %v487_v46, 0  ;;  %vm9796_vm7 = vnez %v9795_v39  ;;  %v589_v54 = vld [vmem:[%s5299_s27 + $0x7c4] sm:$0xff] }
 0x141   : > { %3967 = vmatpush1.bf16.msra.mxu0 %v4480_v4  ;;  %4008 = vmatpush1.bf16.msra.mxu1 %v4560_v19  ;;  %v1824_v4 = vsel %vm9796_vm7, %v580_v55, 0  ;;  %v9797_v19 = vld [vmem:[#allocation71_spill] sm:$0xff]  ;;  %v4490_v29 = vcombine.low %v1626_v33, %v1629_v40  ;;  %v4570_v31 = vcombine.low %v1722_v13, %v1725_v35  ;;  %v4576_v27 = vcombine.high %v1728_v25, %v1731_v43  ;;  %v9799_v55 = vld [vmem:[#allocation72_spill] sm:$0xff]  ;;  %v9803_v63 = vld [vmem:[#allocation74_spill] sm:$0xff] }
 0x142   : > { %3968 = vmatprep.subr.bf16.mxu0 %v4486_v47  ;;  %4009 = vmatprep.subr.bf16.mxu1 %v4566_v3  ;;  %vm9798_vm8 = vnez %v9797_v19  ;;  %v493_v47 = vld [vmem:[%s5299_s27 + $0x544] sm:$0xff]  ;;  %v586_v3 = vld [vmem:[%s5299_s27 + $0x7b0] sm:$0xff]  ;;  %vm9800_vm7 = vnez %v9799_v55  ;;  %vm9804_vm10 = vnez %v9803_v63  ;;  %v592_v33 = vld [vmem:[%s5299_s27 + $0x7d8] sm:$0xff]  ;;  %v4575_v35 = vcombine.low %v1728_v25, %v1731_v43 }
 0x143   : > { %v1827_v38 = vsel %vm9798_vm8, %v583_v2, 0  ;;  %v1734_v59 = vsel %vm9800_vm7, %v490_v18, 0  ;;  %v9801_v2 = vld [vmem:[#allocation73_spill] sm:$0xff]  ;;  %v1830_v9 = vsel %vm9804_vm10, %v586_v3, 0  ;;  %v9805_v19 = vld [vmem:[#allocation75_spill] sm:$0xff]  ;;  %v9807_v18 = vld [vmem:[#allocation76_spill] sm:$0xff] }
 0x144   : > { %v4656_v24 = vcombine.high %v1824_v4, %v1827_v38  ;;  %vm9802_vm8 = vnez %v9801_v2  ;;  %vm9806_vm13 = vnez %v9805_v19  ;;  %v499_v40 = vld [vmem:[%s5299_s27 + $0x56c] sm:$0xff]  ;;  %vm9808_vm10 = vnez %v9807_v18  ;;  %v9809_v3 = vld [vmem:[#allocation77_spill] sm:$0xff]  ;;  %v9811_v19 = vld [vmem:[#allocation78_spill] sm:$0xff] }
 0x145   : > { %3969 = vmatpush1.bf16.msra.mxu0 %v4485_v53  ;;  %4010 = vmatpush1.bf16.msra.mxu1 %v4565_v22  ;;  %v1737_v46 = vsel %vm9802_vm8, %v493_v47, 0  ;;  %v1833_v39 = vsel %vm9806_vm13, %v589_v54, 0  ;;  %v496_v53 = vld [vmem:[%s5299_s27 + $0x558] sm:$0xff]  ;;  %v595_v13 = vld [vmem:[%s5299_s27 + $0x7ec] sm:$0xff]  ;;  %v4655_v22 = vcombine.low %v1824_v4, %v1827_v38  ;;  %vm9810_vm13 = vnez %v9809_v3  ;;  %v598_v43 = vld [vmem:[%s5299_s27 + $0x800] sm:$0xff] }
 0x146   : > { %3970 = vmatprep.subr.bf16.mxu0 %v4491_v6  ;;  %4011 = vmatprep.subr.bf16.mxu1 %v4571_v44  ;;  %v4581_v6 = vcombine.high %v1734_v59, %v1737_v46  ;;  %v4661_v44 = vcombine.high %v1830_v9, %v1833_v39  ;;  %v1740_v47 = vsel %vm9808_vm10, %v496_v53, 0  ;;  %v1743_v54 = vsel %vm9810_vm13, %v499_v40, 0  ;;  %v9813_v2 = vld [vmem:[#allocation79_spill] sm:$0xff]  ;;  %v505_v25 = vld [vmem:[%s5299_s27 + $0x594] sm:$0xff]  ;;  %v9863_v3 = vld [vmem:[#allocation106_spill] sm:$0xff] }
 0x147   : > { %vm9812_vm8 = vnez %v9811_v19  ;;  %vm9814_vm7 = vnez %v9813_v2  ;;  %v601_v4 = vld [vmem:[%s5299_s27 + $0x814] sm:$0xff]  ;;  %v4580_v38 = vcombine.low %v1734_v59, %v1737_v46  ;;  %vm9818_vm13 = vnez %v9447_v36  ;;  %v604_v59 = vld [vmem:[%s5299_s27 + $0x828] sm:$0xff]  ;;  %v607_v46 = vld [vmem:[%s5299_s27 + $0x83c] sm:$0xff] }
 0x148   : > { %v1836_v63 = vsel %vm9812_vm8, %v592_v33, 0  ;;  %v9815_v40 = vld [vmem:[#allocation80_spill] sm:$0xff]  ;;  %vm9817_vm8 = vnez %v9441_v45  ;;  %v1842_v2 = vsel %vm9818_vm13, %v598_v43, 0  ;;  %vm9819_vm10 = vnez %v9453_v50  ;;  %v9826_v36 = vld [vmem:[#allocation86_spill] sm:$0xff] }
 0x149   : > { %3971 = vmatpush1.bf16.msra.mxu0 %v4490_v29  ;;  %4012 = vmatpush1.bf16.msra.mxu1 %v4570_v31  ;;  %v1839_v29 = vsel %vm9814_vm7, %v595_v13, 0  ;;  %v502_v31 = vld [vmem:[%s5299_s27 + $0x580] sm:$0xff]  ;;  %vm9816_vm7 = vnez %v9815_v40  ;;  %v1749_v13 = vsel %vm9817_vm8, %v505_v25, 0  ;;  %v9822_v25 = vld [vmem:[#allocation84_spill] sm:$0xff]  ;;  %vm9827_vm8 = vnez %v9826_v36  ;;  %v9828_v40 = vld [vmem:[#allocation87_spill] sm:$0xff] }
 0x14a   : > { %4022 = vmatprep.subr.bf16.mxu0 %v4576_v27  ;;  %4063 = vmatprep.subr.bf16.mxu1 %v4656_v24  ;;  %v4660_v27 = vcombine.low %v1830_v9, %v1833_v39  ;;  %v4586_v24 = vcombine.high %v1740_v47, %v1743_v54  ;;  %v4666_v53 = vcombine.high %v1836_v63, %v1839_v29  ;;  %v1746_v33 = vsel %vm9816_vm7, %v502_v31, 0  ;;  %v511_v39 = vld [vmem:[%s5299_s27 + $0x5bc] sm:$0xff]  ;;  %v9878_v18 = vld [vmem:[#allocation112_spill] sm:$0xff] }
 0x14b   : > { %v4585_v9 = vcombine.low %v1740_v47, %v1743_v54  ;;  %v1848_v45 = vsel %vm9827_vm8, %v604_v59, 0  ;;  %vm9829_vm7 = vnez %v9828_v40  ;;  %v517_v47 = vld [vmem:[%s5299_s27 + $0x5e4] sm:$0xff]  ;;  %v9832_v59 = vld [vmem:[#allocation89_spill] sm:$0xff] }
 0x14c   : > { %4752 = vmatmul.mubr.msk.bf16.vlgmr.msra.gmra.mrb[16].mxu0 %vm5208_vm2, %v9225_v34  ;;  %4756 = vmatmul.mubr.msk.bf16.vlgmr.msra.gmra.mrb[16].mxu1 %vm5269_vm11, %v9225_v34  ;;  %vm9820_vm11 = vnez %v9069_v11  ;;  %vm9821_vm2 = vnez %v9072_v15  ;;  %v1851_v15 = vsel %vm9829_vm7, %v607_v46, 0  ;;  %v613_v54 = vld [vmem:[%s5299_s27 + $0x864] sm:$0xff]  ;;  %vm9833_vm7 = vnez %v9832_v59  ;;  %v631_v59 = vld [vmem:[%s5299_s27 + $0x8dc] sm:$0xff] }
 0x14d   : > { %4023 = vmatpush1.bf16.msra.mxu0 %v4575_v35  ;;  %4064 = vmatpush1.bf16.msra.mxu1 %v4655_v22  ;;  %v1845_v35 = vsel %vm9819_vm10, %v601_v4, 0  ;;  %v508_v22 = vld [vmem:[%s5299_s27 + $0x5a8] sm:$0xff]  ;;  %vm9823_vm10 = vnez %v9822_v25  ;;  %v9824_v4 = vld [vmem:[#allocation85_spill] sm:$0xff]  ;;  %v1761_v46 = vsel %vm9833_vm7, %v517_v47, 0  ;;  %v9834_v40 = vld [vmem:[#allocation90_spill] sm:$0xff] }
 0x14e   : > { %4024 = vmatprep.subr.bf16.mxu0 %v4581_v6  ;;  %4065 = vmatprep.subr.bf16.mxu1 %v4661_v44  ;;  %v4665_v6 = vcombine.low %v1836_v63, %v1839_v29  ;;  %v4591_v44 = vcombine.high %v1746_v33, %v1749_v13  ;;  %v4671_v31 = vcombine.high %v1842_v2, %v1845_v35  ;;  %v1752_v43 = vsel %vm9823_vm10, %v508_v22, 0  ;;  %v610_v63 = vld [vmem:[%s5299_s27 + $0x850] sm:$0xff] }
 0x14f   : > { %4758 = vmatprep.mubr.msk.bf16.mxu0 %vm9820_vm11, %v9225_v34  ;;  %4762 = vmatprep.mubr.msk.bf16.mxu1 %vm9821_vm2, %v9225_v34  ;;  %vm9825_vm13 = vnez %v9824_v4  ;;  %v4590_v29 = vcombine.low %v1746_v33, %v1749_v13  ;;  %v9830_v22 = vld [vmem:[#allocation88_spill] sm:$0xff]  ;;  %v9836_v4 = vld [vmem:[#allocation91_spill] sm:$0xff]  ;;  %vm9864_vm11 = vnez %v9863_v3 }
 0x150   : > { %v1755_v50 = vsel %vm9825_vm13, %v511_v39, 0  ;;  %vm9831_vm8 = vnez %v9830_v22  ;;  %vm9835_vm13 = vnez %v9834_v40  ;;  %vm9837_vm10 = vnez %v9836_v4  ;;  %v523_v33 = vld [vmem:[%s5299_s27 + $0x60c] sm:$0xff] }
 0x151   : > { %4025 = vmatpush1.bf16.msra.mxu0 %v4580_v38  ;;  %4066 = vmatpush1.bf16.msra.mxu1 %v4660_v27  ;;  %v514_v38 = vld [vmem:[%s5299_s27 + $0x5d0] sm:$0xff]  ;;  %v4670_v27 = vcombine.low %v1842_v2, %v1845_v35  ;;  %v1854_v36 = vsel %vm9835_vm13, %v610_v63, 0  ;;  %v1857_v25 = vsel %vm9837_vm10, %v613_v54, 0  ;;  %v616_v2 = vld [vmem:[%s5299_s27 + $0x878] sm:$0xff]  ;;  %v4595_v35 = vcombine.low %v1752_v43, %v1755_v50  ;;  %v9841_v4 = vld [vmem:[#allocation95_spill] sm:$0xff] }
 0x152   : > { %4026 = vmatprep.subr.bf16.mxu0 %v4586_v24  ;;  %4067 = vmatprep.subr.bf16.mxu1 %v4666_v53  ;;  %v4596_v24 = vcombine.high %v1752_v43, %v1755_v50  ;;  %v4676_v53 = vcombine.high %v1848_v45, %v1851_v15  ;;  %v1758_v39 = vsel %vm9831_vm8, %v514_v38, 0  ;;  %v619_v13 = vld [vmem:[%s5299_s27 + $0x88c] sm:$0xff]  ;;  %vm9839_vm10 = vnez %v9503_v62  ;;  %v529_v50 = vld [vmem:[%s5299_s27 + $0x634] sm:$0xff] }
 0x153   : > { %v1767_v63 = vsel %vm9839_vm10, %v523_v33, 0  ;;  %vm9840_vm13 = vnez %v9509_v20  ;;  %vm9842_vm7 = vnez %v9841_v4  ;;  %v4600_v43 = vcombine.low %v1758_v39, %v1761_v46  ;;  %v532_v33 = vld [vmem:[%s5299_s27 + $0x648] sm:$0xff]  ;;  %v4865_v20 = vpop.f32.mrb[4].mxu1  ;;  %v9843_v4 = vld [vmem:[#allocation96_spill] sm:$0xff]  ;;  %v9845_v62 = vld [vmem:[#allocation97_spill] sm:$0xff] }
 0x154   : > { %v1860_v54 = vsel %vm9840_vm13, %v616_v2, 0  ;;  %v4843_v2 = vpop.f32.mrb[4].mxu0  ;;  %vm9846_vm13 = vnez %v9845_v62  ;;  %v628_v40 = vld [vmem:[%s5299_s27 + $0x8c8] sm:$0xff]  ;;  %v9861_v62 = vld [vmem:[#allocation105_spill] sm:$0xff] }
 0x155   : > { %4027 = vmatpush1.bf16.msra.mxu0 %v4585_v9  ;;  %4068 = vmatpush1.bf16.msra.mxu1 %v4665_v6  ;;  %v520_v9 = vld [vmem:[%s5299_s27 + $0x5f8] sm:$0xff]  ;;  %v4675_v6 = vcombine.low %v1848_v45, %v1851_v15  ;;  %v622_v15 = vld [vmem:[%s5299_s27 + $0x8a0] sm:$0xff]  ;;  %v1773_v38 = vsel %vm9846_vm13, %v529_v50, 0  ;;  %vm9862_vm2 = vnez %v9861_v62 }
 0x156   : > { %4028 = vmatprep.subr.bf16.mxu0 %v4591_v44  ;;  %4069 = vmatprep.subr.bf16.mxu1 %v4671_v31  ;;  %v4601_v44 = vcombine.high %v1758_v39, %v1761_v46  ;;  %v4681_v31 = vcombine.high %v1854_v36, %v1857_v25  ;;  %v1764_v47 = vsel %vm7045_vm3, %v520_v9, 0  ;;  %v625_v45 = vld [vmem:[%s5299_s27 + $0x8b4] sm:$0xff]  ;;  %v9849_v46 = vld [vmem:[#allocation99_spill] sm:$0xff] }
 0x157   : > { %vm9850_vm3 = vnez %v9849_v46  ;;  %v9851_v46 = vld [vmem:[#allocation100_spill] sm:$0xff] }
 0x159   : > { %4029 = vmatpush1.bf16.msra.mxu0 %v4590_v29  ;;  %4070 = vmatpush1.bf16.msra.mxu1 %v4670_v27  ;;  %v1863_v29 = vsel %vm9842_vm7, %v619_v13, 0  ;;  %v526_v27 = vld [vmem:[%s5299_s27 + $0x620] sm:$0xff]  ;;  %vm9844_vm7 = vnez %v9843_v4 }
 0x15a   : > { %4030 = vmatprep.subr.bf16.mxu0 %v4596_v24  ;;  %4071 = vmatprep.subr.bf16.mxu1 %v4676_v53  ;;  %v4680_v24 = vcombine.low %v1854_v36, %v1857_v25  ;;  %v4606_v53 = vcombine.high %v1764_v47, %v1767_v63  ;;  %v4686_v9 = vcombine.high %v1860_v54, %v1863_v29  ;;  %v1770_v13 = vsel %vm9844_vm7, %v526_v27, 0  ;;  %v4844_v25 = vpop.f32.mrb[5].mxu0 }
 0x15b   : > { %v1869_v36 = vsel %vm9850_vm3, %v625_v45, 0  ;;  %v4845_v22 = vadd.f32 %v4844_v25, %v4843_v2  ;;  %v4846_v19 = vpop.f32.mrb[6].mxu0  ;;  %v4685_v50 = vcombine.low %v1860_v54, %v1863_v29  ;;  %vm9852_vm3 = vnez %v9851_v46  ;;  %v538_v29 = vld [vmem:[%s5299_s27 + $0x670] sm:$0xff]  ;;  %v587_v46 = vld [vmem:[%s5299_s27 + $0x7b8] sm:$0xf] }
 0x15c   : > { %v1776_v2 = vsel %vm9852_vm3, %v532_v33, 0  ;;  %v9853_v19 = vld [vmem:[#allocation101_spill] sm:$0xff] }
 0x15d   : > { %4031 = vmatpush1.bf16.msra.mxu0 %v4595_v35  ;;  %4072 = vmatpush1.bf16.msra.mxu1 %v4675_v6  ;;  %v9847_v35 = vld [vmem:[#allocation98_spill] sm:$0xff]  ;;  %v4866_v6 = vpop.f32.mrb[5].mxu1 }
 0x15e   : > { %4032 = vmatprep.subr.bf16.mxu0 %v4601_v44  ;;  %4073 = vmatprep.subr.bf16.mxu1 %v4681_v31  ;;  %vm9848_vm10 = vnez %v9847_v35  ;;  %v4605_v44 = vcombine.low %v1764_v47, %v1767_v63  ;;  %v535_v31 = vld [vmem:[%s5299_s27 + $0x65c] sm:$0xff]  ;;  %v4867_v11 = vadd.f32 %v4866_v6, %v4865_v20  ;;  %v4868_v27 = vpop.f32.mrb[6].mxu1  ;;  %v4611_v47 = vcombine.high %v1770_v13, %v1773_v38  ;;  %v9857_v6 = vld [vmem:[#allocation103_spill] sm:$0xff] }
 0x15f   : > { %v1866_v39 = vsel %vm9848_vm10, %v622_v15, 0  ;;  %v4847_v15 = vpop.f32.mrb[7].mxu0  ;;  %v4869_v45 = vpop.f32.mrb[7].mxu1  ;;  %v2059_v20 = vadd.f32 %v4845_v22, %v7908_v0  ;;  %vm9854_vm10 = vnez %v9853_v19  ;;  %vm9858_vm7 = vnez %v9857_v6  ;;  %v541_v27 = vld [vmem:[%s5299_s27 + $0x684] sm:$0xff] }
 0x160   : > { %v4691_v63 = vcombine.high %v1866_v39, %v1869_v36  ;;  %v1779_v25 = vsel %vm9854_vm10, %v535_v31, 0  ;;  %v1875_v54 = vsel %vm9858_vm7, %v631_v59, 0  ;;  %v637_v15 = vld [vmem:[%s5299_s27 + $0x904] sm:$0xff]  ;;  %v4610_v0 = vcombine.low %v1770_v13, %v1773_v38  ;;  %v9859_v59 = vld [vmem:[#allocation104_spill] sm:$0xff]  ;;  %v640_v13 = vld [vmem:[%s5299_s27 + $0x918] sm:$0xff] }
 0x161   : > { %4033 = vmatpush1.bf16.msra.mxu0 %v4600_v43  ;;  %4074 = vmatpush1.bf16.msra.mxu1 %v4680_v24  ;;  %v9855_v43 = vld [vmem:[#allocation102_spill] sm:$0xff]  ;;  %v2099_v45 = vadd.f32 %v4867_v11, %v2059_v20  ;;  %v4690_v22 = vcombine.low %v1866_v39, %v1869_v36  ;;  %vm9860_vm8 = vnez %v9859_v59  ;;  %v1785_v4 = vsel %vm9862_vm2, %v541_v27, 0  ;;  %v544_v20 = vld [vmem:[%s5299_s27 + $0x698] sm:$0xff]  ;;  %v547_v38 = vld [vmem:[%s5299_s27 + $0x6ac] sm:$0xff] }
 0x162   : > { %4034 = vmatprep.subr.bf16.mxu0 %v4606_v53  ;;  %4075 = vmatprep.subr.bf16.mxu1 %v4686_v9  ;;  %vm9856_vm13 = vnez %v9855_v43  ;;  %v1943_v53 = vld [vmem:[%s7805_s4] sm:$0xff]  ;;  %v634_v9 = vld [vmem:[%s5299_s27 + $0x8f0] sm:$0xff]  ;;  %v1782_v31 = vsel %vm9860_vm8, %v538_v29, 0  ;;  %v4615_v36 = vcombine.low %v1776_v2, %v1779_v25  ;;  %vm9870_vm2 = vnez %v9585_v1 }
 0x163   : > { %v1872_v24 = vsel %vm9856_vm13, %v628_v40, 0  ;;  %v4616_v40 = vcombine.high %v1776_v2, %v1779_v25  ;;  %v2104_v35 = vadd.f32 %v2099_v45, %v1943_v53  ;;  %v1878_v11 = vsel %vm9864_vm11, %v634_v9, 0  ;;  %v643_v39 = vld [vmem:[%s5299_s27 + $0x92c] sm:$0xff]  ;;  %v550_v45 = vld [vmem:[%s5299_s27 + $0x6c0] sm:$0xff]  ;;  %v553_v2 = vld [vmem:[%s5299_s27 + $0x6d4] sm:$0xff] }
 0x164   : > { %v4696_v33 = vcombine.high %v1872_v24, %v1875_v54  ;;  %vm9867_vm13 = vcmask 7168   ;;  %vm9869_vm11 = vnez %v9583_v28  ;;  %v1884_v9 = vsel %vm9870_vm2, %v640_v13, 0  ;;  %v646_v25 = vld [vmem:[%s5299_s27 + $0x940] sm:$0xff] }
 0x165   : > { %4035 = vmatpush1.bf16.msra.mxu0 %v4605_v44  ;;  %4076 = vmatpush1.bf16.msra.mxu1 %v4685_v50  ;;  %v9865_v44 = vld [vmem:[#allocation107_spill] sm:$0xff]  ;;  %2106 = vst.msk [vmem:[%s7805_s4] sm:$0xff] %vm9867_vm13, %v2104_v35  ;;  %v1791_v53 = vsel %vm9869_vm11, %v547_v38, 0  ;;  %v9875_v38 = vld [vmem:[#allocation110_spill] sm:$0xff]  ;;  %vm9877_vm11 = vnez %v9605_v21 }
 0x166   : > { %4036 = vmatprep.subr.bf16.mxu0 %v4611_v47  ;;  %4077 = vmatprep.subr.bf16.mxu1 %v4691_v63  ;;  %vm9866_vm7 = vnez %v9865_v44  ;;  %v4695_v47 = vcombine.low %v1872_v24, %v1875_v54  ;;  %v4621_v63 = vcombine.high %v1782_v31, %v1785_v4  ;;  %v649_v24 = vld [vmem:[%s5299_s27 + $0x954] sm:$0xff]  ;;  %v4620_v54 = vcombine.low %v1782_v31, %v1785_v4  ;;  %v559_v4 = vld [vmem:[%s5299_s27 + $0x6fc] sm:$0xff]  ;;  %v652_v31 = vld [vmem:[%s5299_s27 + $0x968] sm:$0xff] }
 0x167   : > { %v1881_v50 = vsel %vm9866_vm7, %v637_v15, 0  ;;  %vm9868_vm7 = vnez %v9579_v8  ;;  %v9871_v15 = vld [vmem:[#allocation108_spill] sm:$0xff]  ;;  %v593_v59 = vld [vmem:[%s5299_s27 + $0x7e0] sm:$0xf] }
 0x168   : > { %v4701_v29 = vcombine.high %v1878_v11, %v1881_v50  ;;  %v1788_v27 = vsel %vm9868_vm7, %v544_v20, 0  ;;  %vm9872_vm13 = vnez %v9871_v15  ;;  %vm9879_vm7 = vnez %v9878_v18 }
 0x169   : > { %4037 = vmatpush1.bf16.msra.mxu0 %v4610_v0  ;;  %4078 = vmatpush1.bf16.msra.mxu1 %v4690_v22  ;;  %v1887_v35 = vsel %vm9872_vm13, %v643_v39, 0  ;;  %v4700_v0 = vcombine.low %v1878_v11, %v1881_v50  ;;  %v4626_v22 = vcombine.high %v1788_v27, %v1791_v53  ;;  %vm9876_vm13 = vnez %v9875_v38  ;;  %v655_v11 = vld [vmem:[%s5299_s27 + $0x97c] sm:$0xff] }
 0x16a   : > { %4038 = vmatprep.subr.bf16.mxu0 %v4616_v40  ;;  %4079 = vmatprep.subr.bf16.mxu1 %v4696_v33  ;;  %v4706_v40 = vcombine.high %v1884_v9, %v1887_v35  ;;  %v9873_v33 = vld [vmem:[#allocation109_spill] sm:$0xff]  ;;  %v1797_v13 = vsel %vm9876_vm13, %v553_v2, 0  ;;  %v1890_v39 = vsel %vm9877_vm11, %v646_v25, 0  ;;  %v1893_v7 = vsel %vm9879_vm7, %v649_v24, 0  ;;  %v9882_v25 = vld [vmem:[#allocation114_spill] sm:$0xff] }
 0x16b   : > { %vm9874_vm2 = vnez %v9873_v33  ;;  %v4625_v50 = vcombine.low %v1788_v27, %v1791_v53  ;;  %vm9883_vm7 = vnez %v9882_v25  ;;  %vm9884_vm13 = vnez %v9622_v10  ;;  %v565_v27 = vld [vmem:[%s5299_s27 + $0x724] sm:$0xff]  ;;  %v658_v53 = vld [vmem:[%s5299_s27 + $0x990] sm:$0xff] }
 0x16c   : > { %v1794_v20 = vsel %vm9874_vm2, %v550_v45, 0  ;;  %v9880_v45 = vld [vmem:[#allocation113_spill] sm:$0xff]  ;;  %v1803_v24 = vsel %vm9883_vm7, %v559_v4, 0  ;;  %v1896_v18 = vsel %vm9884_vm13, %v652_v31, 0  ;;  %vm9885_vm2 = vnez %v9625_v52 }
 0x16d   : > { %4039 = vmatpush1.bf16.msra.mxu0 %v4615_v36  ;;  %4080 = vmatpush1.bf16.msra.mxu1 %v4695_v47  ;;  %v556_v36 = vld [vmem:[%s5299_s27 + $0x6e8] sm:$0xff]  ;;  %v4705_v47 = vcombine.low %v1884_v9, %v1887_v35  ;;  %vm9881_vm11 = vnez %v9880_v45  ;;  %v1899_v21 = vsel %vm9885_vm2, %v655_v11, 0  ;;  %v4630_v35 = vcombine.low %v1794_v20, %v1797_v13 }
 0x16e   : > { %4040 = vmatprep.subr.bf16.mxu0 %v4621_v63  ;;  %4081 = vmatprep.subr.bf16.mxu1 %v4701_v29  ;;  %v4631_v63 = vcombine.high %v1794_v20, %v1797_v13  ;;  %v4711_v29 = vcombine.high %v1890_v39, %v1893_v7  ;;  %v1800_v2 = vsel %vm9881_vm11, %v556_v36, 0  ;;  %v661_v9 = vld [vmem:[%s5299_s27 + $0x9a4] sm:$0xff]  ;;  %vm9886_vm13 = vnez %v9629_v48  ;;  %v571_v20 = vld [vmem:[%s5299_s27 + $0x74c] sm:$0xff] }
 0x16f   : > { %vm9887_vm2 = vnez %v9632_v12  ;;  %vm9888_vm7 = vnez %v9635_v17  ;;  %vm9889_vm11 = vnez %v9638_v16  ;;  %v667_v13 = vld [vmem:[%s5299_s27 + $0x9cc] sm:$0xff]  ;;  %v524_v12 = vld [vmem:[%s5299_s27 + $0x614] sm:$0xf]  ;;  %v10089_v17 = vld [vmem:[#allocation90_spill] sm:$0xff] }
 0x170   : > { %v1809_v4 = vsel %vm9887_vm2, %v565_v27, 0  ;;  %v1902_v31 = vsel %vm9888_vm7, %v658_v53, 0  ;;  %v1905_v11 = vsel %vm9889_vm11, %v661_v9, 0  ;;  %vm9890_vm11 = vnez %v9647_v56  ;;  %v443_v56 = vld [vmem:[%s5299_s27 + $0x3f8] sm:$0xf] }
 0x171   : > { %4041 = vmatpush1.bf16.msra.mxu0 %v4620_v54  ;;  %4082 = vmatpush1.bf16.msra.mxu1 %v4700_v0  ;;  %v562_v54 = vld [vmem:[%s5299_s27 + $0x710] sm:$0xff]  ;;  %v4710_v0 = vcombine.low %v1890_v39, %v1893_v7  ;;  %v664_v7 = vld [vmem:[%s5299_s27 + $0x9b8] sm:$0xff]  ;;  %v4635_v39 = vcombine.low %v1800_v2, %v1803_v24  ;;  %v1815_v27 = vsel %vm9890_vm11, %v571_v20, 0 }
 0x172   : > { %4042 = vmatprep.subr.bf16.mxu0 %v4626_v22  ;;  %4083 = vmatprep.subr.bf16.mxu1 %v4706_v40  ;;  %v4636_v22 = vcombine.high %v1800_v2, %v1803_v24  ;;  %v4716_v40 = vcombine.high %v1896_v18, %v1899_v21  ;;  %v1806_v36 = vsel %vm9886_vm13, %v562_v54, 0  ;;  %v1908_v53 = vsel %vm7626_vm4, %v664_v7, 0  ;;  %v577_v2 = vld [vmem:[%s5299_s27 + $0x774] sm:$0xff]  ;;  %v341_v20 = vld [vmem:[%s5299_s27 + $0x150] sm:$0xf] }
 0x173   : > { %v4640_v24 = vcombine.low %v1806_v36, %v1809_v4  ;;  %v1821_v9 = vsel %vm7649_vm9, %v577_v2, 0  ;;  %v389_v2 = vld [vmem:[%s5299_s27 + $0x290] sm:$0xf] }
 0x174   : > { %v581_v16 = vld [vmem:[%s5299_s27 + $0x790] sm:$0xf] }
 0x175   : > { %4043 = vmatpush1.bf16.msra.mxu0 %v4625_v50  ;;  %4084 = vmatpush1.bf16.msra.mxu1 %v4705_v47  ;;  %v568_v50 = vld [vmem:[%s5299_s27 + $0x738] sm:$0xff]  ;;  %v4715_v47 = vcombine.low %v1896_v18, %v1899_v21  ;;  %v670_v21 = vld [vmem:[%s5299_s27 + $0x9e0] sm:$0xff] }
 0x176   : > { %4044 = vmatprep.subr.bf16.mxu0 %v4631_v63  ;;  %4085 = vmatprep.subr.bf16.mxu1 %v4711_v29  ;;  %v4641_v63 = vcombine.high %v1806_v36, %v1809_v4  ;;  %v4721_v29 = vcombine.high %v1902_v31, %v1905_v11  ;;  %v1812_v54 = vsel %vm7602_vm6, %v568_v50, 0  ;;  %v673_v18 = vld [vmem:[%s5299_s27 + $0x9f4] sm:$0xff]  ;;  %v344_v4 = vld [vmem:[%s5299_s27 + $0x164] sm:$0xf] }
 0x179   : > { %4045 = vmatpush1.bf16.msra.mxu0 %v4630_v35  ;;  %4086 = vmatpush1.bf16.msra.mxu1 %v4710_v0  ;;  %v1911_v35 = vsel %vm7635_vm15, %v667_v13, 0  ;;  %v574_v0 = vld [vmem:[%s5299_s27 + $0x760] sm:$0xff]  ;;  %vm9894_vm15 = vnez %v9893_v58 }
 0x17a   : > { %4046 = vmatprep.subr.bf16.mxu0 %v4636_v22  ;;  %4087 = vmatprep.subr.bf16.mxu1 %v4716_v40  ;;  %v4720_v22 = vcombine.low %v1902_v31, %v1905_v11  ;;  %v4646_v40 = vcombine.high %v1812_v54, %v1815_v27  ;;  %v4726_v50 = vcombine.high %v1908_v53, %v1911_v35  ;;  %v1818_v7 = vsel %vm7643_vm14, %v574_v0, 0  ;;  %v437_v31 = vld [vmem:[%s5299_s27 + $0x3d0] sm:$0xf]  ;;  %v440_v11 = vld [vmem:[%s5299_s27 + $0x3e4] sm:$0xf] }
 0x17b   : > { %v4725_v0 = vcombine.low %v1908_v53, %v1911_v35  ;;  %v296_v13 = vld [vmem:[%s5299_s27 + $0x24] sm:$0xf]  ;;  %v446_v35 = vld [vmem:[%s5299_s27 + $0x40c] sm:$0xf] }
 0x17c   : > { %v392_v58 = vld [vmem:[%s5299_s27 + $0x2a4] sm:$0xf] }
 0x17d   : > { %4047 = vmatpush1.bf16.msra.mxu0 %v4635_v39  ;;  %4088 = vmatpush1.bf16.msra.mxu1 %v4715_v47  ;;  %v1914_v39 = vsel %vm9894_vm15, %v670_v21, 0  ;;  %v9895_v47 = vld [vmem:[#allocation123_spill] sm:$0xff]  ;;  %v4651_v21 = vcombine.high %v1818_v7, %v1821_v9 }
 0x17e   : > { %4048 = vmatprep.subr.bf16.mxu0 %v4641_v63  ;;  %4089 = vmatprep.subr.bf16.mxu1 %v4721_v29  ;;  %vm9896_vm4 = vnez %v9895_v47  ;;  %v293_v63 = vld [vmem:[%s5299_s27 + $0x10] sm:$0xf]  ;;  %v4645_v29 = vcombine.low %v1812_v54, %v1815_v27  ;;  %v347_v47 = vld [vmem:[%s5299_s27 + $0x178] sm:$0xf]  ;;  %v1588_v54 = vsel %vm9739_vm1, %v344_v4, 0  ;;  %v1681_v27 = vsel %vm9740_vm0, %v437_v31, 0 }
 0x17f   : > { %v1917_v36 = vsel %vm9896_vm4, %v673_v18, 0  ;;  %vm9897_vm4 = vnez %v9741_v37  ;;  %v9900_v4 = vld [vmem:[#allocation8_spill] sm:$0xff]  ;;  %v9902_v37 = vld [vmem:[#allocation9_spill] sm:$0xff] }
 0x180   : > { %v4731_v18 = vcombine.high %v1914_v39, %v1917_v36  ;;  %v1684_v53 = vsel %vm9897_vm4, %v440_v11, 0  ;;  %vm9901_vm1 = vnez %v9900_v4  ;;  %vm9903_vm4 = vnez %v9902_v37  ;;  %v9909_v4 = vld [vmem:[#allocation45_spill] sm:$0xff]  ;;  %v452_v37 = vld [vmem:[%s5299_s27 + $0x434] sm:$0xf] }
 0x181   : > { %4049 = vmatpush1.bf16.msra.mxu0 %v4640_v24  ;;  %4090 = vmatpush1.bf16.msra.mxu1 %v4720_v22  ;;  %v1585_v24 = vsel %vm9737_vm12, %v341_v20, 0  ;;  %v4650_v22 = vcombine.low %v1818_v7, %v1821_v9  ;;  %vm9899_vm12 = vnez %v9898_v32  ;;  %v1540_v14 = vsel %vm9901_vm1, %v296_v13, 0  ;;  %v9904_v9 = vld [vmem:[#allocation10_spill] sm:$0xff]  ;;  %v9907_v32 = vld [vmem:[#allocation44_spill] sm:$0xff] }
 0x182   : > { %4050 = vmatprep.subr.bf16.mxu0 %v4646_v40  ;;  %4091 = vmatprep.subr.bf16.mxu1 %v4726_v50  ;;  %v4730_v40 = vcombine.low %v1914_v39, %v1917_v36  ;;  %v299_v50 = vld [vmem:[%s5299_s27 + $0x38] sm:$0xf]  ;;  %v1537_v20 = vsel %vm9899_vm12, %v293_v63, 0  ;;  %v1633_v31 = vsel %vm9903_vm4, %v389_v2, 0  ;;  %vm9905_vm0 = vnez %v9904_v9  ;;  %v398_v39 = vld [vmem:[%s5299_s27 + $0x2cc] sm:$0xf] }
 0x183   : > { %v1636_v7 = vsel %vm9905_vm0, %v392_v58, 0  ;;  %v4457_v36 = vcombine.low %v1585_v24, %v1588_v54  ;;  %v4537_v11 = vcombine.low %v1681_v27, %v1684_v53  ;;  %v356_v63 = vld [vmem:[%s5299_s27 + $0x1b4] sm:$0xf]  ;;  %v1591_v13 = vsel %vm9743_vm5, %v347_v47, 0  ;;  %v305_v54 = vld [vmem:[%s5299_s27 + $0x60] sm:$0xf] }
 0x184   : > { %vm9906_vm12 = vnez %v9744_v41  ;;  %vm9908_vm1 = vnez %v9907_v32  ;;  %vm9910_vm4 = vnez %v9909_v4  ;;  %v4497_v24 = vcombine.low %v1633_v31, %v1636_v7  ;;  %v308_v27 = vld [vmem:[%s5299_s27 + $0x74] sm:$0xf]  ;;  %v9911_v41 = vld [vmem:[#allocation11_spill] sm:$0xff]  ;;  %v9915_v53 = vld [vmem:[#allocation13_spill] sm:$0xff] }
 0x185   : > { %4051 = vmatpush1.bf16.msra.mxu0 %v4645_v29  ;;  %4092 = vmatpush1.bf16.msra.mxu1 %v4725_v0  ;;  %v353_v29 = vld [vmem:[%s5299_s27 + $0x1a0] sm:$0xf]  ;;  %v1594_v2 = vsel %vm9906_vm12, %v350_v5, 0  ;;  %v1687_v58 = vsel %vm9908_vm1, %v443_v56, 0  ;;  %vm9912_vm5 = vnez %v9911_v41  ;;  %v9913_v47 = vld [vmem:[#allocation12_spill] sm:$0xff]  ;;  %vm9916_vm12 = vnez %v9915_v53  ;;  %v9921_v4 = vld [vmem:[#allocation47_spill] sm:$0xff] }
 0x186   : > { %4052 = vmatprep.subr.bf16.mxu0 %v4651_v21  ;;  %4093 = vmatprep.subr.bf16.mxu1 %v4731_v18  ;;  %v449_v0 = vld [vmem:[%s5299_s27 + $0x420] sm:$0xf]  ;;  %v1690_v21 = vsel %vm9910_vm4, %v446_v35, 0  ;;  %v4417_v18 = vcombine.low %v1537_v20, %v1540_v14  ;;  %v1543_v5 = vsel %vm9912_vm5, %v299_v50, 0  ;;  %vm9914_vm0 = vnez %v9913_v47  ;;  %v404_v31 = vld [vmem:[%s5299_s27 + $0x2f4] sm:$0xf] }
 0x187   : > { %v1546_v56 = vsel %vm9914_vm0, %v302_v26, 0  ;;  %v1639_v35 = vsel %vm9916_vm12, %v395_v30, 0  ;;  %v9917_v20 = vld [vmem:[#allocation14_spill] sm:$0xff]  ;;  %v359_v9 = vld [vmem:[%s5299_s27 + $0x1c8] sm:$0xf]  ;;  %vm9922_vm5 = vnez %v9921_v4  ;;  %v9923_v41 = vld [vmem:[#allocation48_spill] sm:$0xff] }
 0x188   : > { %vm9918_vm1 = vnez %v9917_v20  ;;  %v362_v50 = vld [vmem:[%s5299_s27 + $0x1dc] sm:$0xf]  ;;  %v455_v7 = vld [vmem:[%s5299_s27 + $0x448] sm:$0xf]  ;;  %v9919_v32 = vld [vmem:[#allocation46_spill] sm:$0xff]  ;;  %v1600_v30 = vsel %vm9922_vm5, %v356_v63, 0  ;;  %vm9924_vm0 = vnez %v9923_v41 }
 0x189   : > { %4053 = vmatpush1.bf16.msra.mxu0 %v4650_v22  ;;  %4094 = vmatpush1.bf16.msra.mxu1 %v4730_v40  ;;  %v1642_v14 = vsel %vm9918_vm1, %v398_v39, 0  ;;  %v4462_v22 = vcombine.low %v1591_v13, %v1594_v2  ;;  %v4542_v40 = vcombine.low %v1687_v58, %v1690_v21  ;;  %vm9920_vm4 = vnez %v9919_v32  ;;  %v9925_v47 = vld [vmem:[#allocation49_spill] sm:$0xff]  ;;  %v9927_v13 = vld [vmem:[#allocation31_spill] sm:$0xff]  ;;  %v9929_v2 = vld [vmem:[#allocation32_spill] sm:$0xff] }
 0x18a   : > { %4871 = vmatprep.subr.bf16.mxu0 %v4457_v36  ;;  %4893 = vmatprep.subr.bf16.mxu1 %v4537_v11  ;;  %v1597_v26 = vsel %vm9920_vm4, %v353_v29, 0  ;;  %v1693_v39 = vsel %vm9924_vm0, %v449_v0, 0  ;;  %vm9926_vm12 = vnez %v9925_v47  ;;  %v458_v11 = vld [vmem:[%s5299_s27 + $0x45c] sm:$0xf]  ;;  %vm9928_vm1 = vnez %v9927_v13  ;;  %v311_v63 = vld [vmem:[%s5299_s27 + $0x88] sm:$0xf] }
 0x18b   : > { %v1696_v36 = vsel %vm9926_vm12, %v452_v37, 0  ;;  %vm9930_vm15 = vnez %v9929_v2  ;;  %v4422_v29 = vcombine.low %v1543_v5, %v1546_v56  ;;  %v4502_v58 = vcombine.low %v1639_v35, %v1642_v14  ;;  %v314_v0 = vld [vmem:[%s5299_s27 + $0x9c] sm:$0xf]  ;;  %v407_v21 = vld [vmem:[%s5299_s27 + $0x308] sm:$0xf]  ;;  %v9933_v20 = vld [vmem:[#allocation16_spill] sm:$0xff] }
 0x18c   : > { %4760 = vmatmul.mubr.msk.bf16.vlgmr.msra.gmra.mrb[20].mxu0 %vm9928_vm1, %v9225_v34  ;;  %4764 = vmatmul.mubr.msk.bf16.vlgmr.msra.gmra.mrb[20].mxu1 %vm9930_vm15, %v9225_v34  ;;  %v9931_v37 = vld [vmem:[#allocation15_spill] sm:$0xff]  ;;  %vm9934_vm5 = vnez %v9933_v20  ;;  %v9935_v4 = vld [vmem:[#allocation17_spill] sm:$0xff]  ;;  %v9937_v5 = vld [vmem:[#allocation18_spill] sm:$0xff] }
 0x18d   : > { %4872 = vmatpush3.bf16.msra.mxu0 %v4417_v18  ;;  %4894 = vmatpush3.bf16.msra.mxu1 %v4497_v24  ;;  %vm9932_vm4 = vnez %v9931_v37  ;;  %v1552_v32 = vsel %vm9934_vm5, %v308_v27, 0  ;;  %vm9936_vm0 = vnez %v9935_v4  ;;  %vm9938_vm12 = vnez %v9937_v5  ;;  %v410_v35 = vld [vmem:[%s5299_s27 + $0x31c] sm:$0xf]  ;;  %v365_v14 = vld [vmem:[%s5299_s27 + $0x1f0] sm:$0xf]  ;;  %v9939_v37 = vld [vmem:[#allocation50_spill] sm:$0xff] }
 0x18e   : > { %v1549_v53 = vsel %vm9932_vm4, %v305_v54, 0  ;;  %v1645_v41 = vsel %vm9936_vm0, %v401_v23, 0  ;;  %v1648_v56 = vsel %vm9938_vm12, %v404_v31, 0  ;;  %4873 = vmatprep.subr.bf16.mxu0 %v4462_v22  ;;  %4895 = vmatprep.subr.bf16.mxu1 %v4542_v40  ;;  %v4467_v18 = vcombine.low %v1597_v26, %v1600_v30  ;;  %v368_v54 = vld [vmem:[%s5299_s27 + $0x204] sm:$0xf]  ;;  %v9941_v20 = vld [vmem:[#allocation51_spill] sm:$0xff] }
 0x18f   : > { %v4547_v24 = vcombine.low %v1693_v39, %v1696_v36  ;;  %v461_v47 = vld [vmem:[%s5299_s27 + $0x470] sm:$0xf]  ;;  %vm9940_vm4 = vnez %v9939_v37  ;;  %vm9942_vm5 = vnez %v9941_v20  ;;  %v9945_v5 = vld [vmem:[#allocation53_spill] sm:$0xff]  ;;  %v464_v40 = vld [vmem:[%s5299_s27 + $0x484] sm:$0xf]  ;;  %v4507_v39 = vcombine.low %v1645_v41, %v1648_v56 }
 0x190   : > { %v1603_v27 = vsel %vm9940_vm4, %v359_v9, 0  ;;  %v1606_v23 = vsel %vm9942_vm5, %v362_v50, 0  ;;  %v9943_v4 = vld [vmem:[#allocation52_spill] sm:$0xff]  ;;  %vm9946_vm12 = vnez %v9945_v5  ;;  %v9947_v26 = vld [vmem:[#allocation2_spill] sm:$0xff]  ;;  %v9949_v30 = vld [vmem:[#allocation3_spill] sm:$0xff]  ;;  %v4427_v9 = vcombine.low %v1549_v53, %v1552_v32 }
 0x191   : > { %vm9944_vm0 = vnez %v9943_v4  ;;  %v1702_v22 = vsel %vm9946_vm12, %v458_v11, 0  ;;  %vm9948_vm15 = vnez %v9947_v26  ;;  %vm9950_vm1 = vnez %v9949_v30  ;;  %v317_v50 = vld [vmem:[%s5299_s27 + $0xb0] sm:$0xf]  ;;  %4874 = vmatpush3.bf16.msra.mxu0 %v4422_v29  ;;  %4896 = vmatpush3.bf16.msra.mxu1 %v4502_v58  ;;  %v9951_v11 = vld [vmem:[#allocation19_spill] sm:$0xff]  ;;  %v9955_v5 = vld [vmem:[#allocation21_spill] sm:$0xff] }
 0x192   : > { %v1699_v31 = vsel %vm9944_vm0, %v455_v7, 0  ;;  %4766 = vmatprep.mubr.msk.bf16.mxu0 %vm9948_vm15, %v9225_v34  ;;  %4770 = vmatprep.mubr.msk.bf16.mxu1 %vm9950_vm1, %v9225_v34  ;;  %v320_v7 = vld [vmem:[%s5299_s27 + $0xc4] sm:$0xf]  ;;  %v413_v36 = vld [vmem:[%s5299_s27 + $0x330] sm:$0xf]  ;;  %vm9952_vm4 = vnez %v9951_v11  ;;  %vm9956_vm15 = vnez %v9955_v5  ;;  %v4472_v29 = vcombine.low %v1603_v27, %v1606_v23 }
 0x193   : > { %v1555_v37 = vsel %vm9952_vm4, %v311_v63, 0  ;;  %v9953_v20 = vld [vmem:[#allocation20_spill] sm:$0xff]  ;;  %v1651_v26 = vsel %vm9956_vm15, %v407_v21, 0  ;;  %v9957_v53 = vld [vmem:[#allocation22_spill] sm:$0xff]  ;;  %4875 = vmatprep.subr.bf16.mxu0 %v4467_v18  ;;  %4897 = vmatprep.subr.bf16.mxu1 %v4547_v24  ;;  %v4552_v58 = vcombine.low %v1699_v31, %v1702_v22  ;;  %v371_v56 = vld [vmem:[%s5299_s27 + $0x218] sm:$0xf] }
 0x194   : > { %vm9954_vm5 = vnez %v9953_v20  ;;  %vm9958_vm1 = vnez %v9957_v53  ;;  %v416_v41 = vld [vmem:[%s5299_s27 + $0x344] sm:$0xf]  ;;  %v374_v63 = vld [vmem:[%s5299_s27 + $0x22c] sm:$0xf]  ;;  %v467_v30 = vld [vmem:[%s5299_s27 + $0x498] sm:$0xf] }
 0x195   : > { %v1558_v4 = vsel %vm9954_vm5, %v314_v0, 0  ;;  %v1654_v32 = vsel %vm9958_vm1, %v410_v35, 0  ;;  %v9959_v11 = vld [vmem:[#allocation54_spill] sm:$0xff]  ;;  %v9961_v20 = vld [vmem:[#allocation55_spill] sm:$0xff]  ;;  %v9963_v5 = vld [vmem:[#allocation56_spill] sm:$0xff]  ;;  %4876 = vmatpush3.bf16.msra.mxu0 %v4427_v9  ;;  %4898 = vmatpush3.bf16.msra.mxu1 %v4507_v39 }
 0x196   : > { %vm9960_vm0 = vnez %v9959_v11  ;;  %vm9962_vm12 = vnez %v9961_v20  ;;  %vm9964_vm4 = vnez %v9963_v5  ;;  %v9965_v53 = vld [vmem:[#allocation57_spill] sm:$0xff]  ;;  %v470_v2 = vld [vmem:[%s5299_s27 + $0x4ac] sm:$0xf]  ;;  %v4432_v24 = vcombine.low %v1555_v37, %v1558_v4  ;;  %v9969_v11 = vld [vmem:[#allocation24_spill] sm:$0xff]  ;;  %4877 = vmatprep.subr.bf16.mxu0 %v4472_v29  ;;  %4899 = vmatprep.subr.bf16.mxu1 %v4552_v58 }
 0x197   : > { %v1609_v0 = vsel %vm9960_vm0, %v365_v14, 0  ;;  %v1612_v21 = vsel %vm9962_vm12, %v368_v54, 0  ;;  %v1705_v35 = vsel %vm9964_vm4, %v461_v47, 0  ;;  %vm9966_vm5 = vnez %v9965_v53  ;;  %v323_v23 = vld [vmem:[%s5299_s27 + $0xd8] sm:$0xf]  ;;  %v9967_v14 = vld [vmem:[#allocation23_spill] sm:$0xff] }
 0x198   : > { %v1708_v18 = vsel %vm9966_vm5, %v464_v40, 0  ;;  %v4512_v27 = vcombine.low %v1651_v26, %v1654_v32  ;;  %v326_v31 = vld [vmem:[%s5299_s27 + $0xec] sm:$0xf]  ;;  %v419_v22 = vld [vmem:[%s5299_s27 + $0x358] sm:$0xf]  ;;  %vm9968_vm15 = vnez %v9967_v14  ;;  %vm9970_vm1 = vnez %v9969_v11  ;;  %v9973_v37 = vld [vmem:[#allocation26_spill] sm:$0xff] }
 0x199   : > { %v1561_v54 = vsel %vm9968_vm15, %v317_v50, 0  ;;  %v1564_v47 = vsel %vm9970_vm1, %v320_v7, 0  ;;  %v9971_v20 = vld [vmem:[#allocation25_spill] sm:$0xff]  ;;  %vm9974_vm12 = vnez %v9973_v37  ;;  %v422_v26 = vld [vmem:[%s5299_s27 + $0x36c] sm:$0xf]  ;;  %v4477_v9 = vcombine.low %v1609_v0, %v1612_v21  ;;  %v9975_v53 = vld [vmem:[#allocation58_spill] sm:$0xff]  ;;  %4878 = vmatpush3.bf16.msra.mxu0 %v4432_v24 }
 0x19a   : > { %vm9972_vm0 = vnez %v9971_v20  ;;  %v1660_v4 = vsel %vm9974_vm12, %v416_v41, 0  ;;  %v4557_v39 = vcombine.low %v1705_v35, %v1708_v18  ;;  %v377_v32 = vld [vmem:[%s5299_s27 + $0x240] sm:$0xf]  ;;  %v380_v50 = vld [vmem:[%s5299_s27 + $0x254] sm:$0xf]  ;;  %vm9976_vm4 = vnez %v9975_v53  ;;  %v9977_v14 = vld [vmem:[#allocation59_spill] sm:$0xff]  ;;  %4900 = vmatpush3.bf16.msra.mxu1 %v4512_v27 }
 0x19b   : > { %v1657_v40 = vsel %vm9972_vm0, %v413_v36, 0  ;;  %v473_v5 = vld [vmem:[%s5299_s27 + $0x4c0] sm:$0xf]  ;;  %v1615_v7 = vsel %vm9976_vm4, %v371_v56, 0  ;;  %vm9978_vm5 = vnez %v9977_v14  ;;  %v9979_v11 = vld [vmem:[#allocation60_spill] sm:$0xff]  ;;  %v9981_v20 = vld [vmem:[#allocation61_spill] sm:$0xff]  ;;  %v4437_v58 = vcombine.low %v1561_v54, %v1564_v47  ;;  %4879 = vmatprep.subr.bf16.mxu0 %v4477_v9 }
 0x19c   : > { %v1618_v36 = vsel %vm9978_vm5, %v374_v63, 0  ;;  %vm9980_vm15 = vnez %v9979_v11  ;;  %vm9982_vm1 = vnez %v9981_v20  ;;  %v476_v37 = vld [vmem:[%s5299_s27 + $0x4d4] sm:$0xf]  ;;  %v4517_v0 = vcombine.low %v1657_v40, %v1660_v4  ;;  %v329_v21 = vld [vmem:[%s5299_s27 + $0x100] sm:$0xf]  ;;  %v9983_v56 = vld [vmem:[#allocation27_spill] sm:$0xff]  ;;  %4901 = vmatprep.subr.bf16.mxu1 %v4557_v39 }
 0x19d   : > { %v1711_v41 = vsel %vm9980_vm15, %v467_v30, 0  ;;  %v1714_v29 = vsel %vm9982_vm1, %v470_v2, 0  ;;  %v332_v35 = vld [vmem:[%s5299_s27 + $0x114] sm:$0xf]  ;;  %v425_v18 = vld [vmem:[%s5299_s27 + $0x380] sm:$0xf]  ;;  %vm9984_vm0 = vnez %v9983_v56  ;;  %v4482_v24 = vcombine.low %v1615_v7, %v1618_v36  ;;  %4880 = vmatpush3.bf16.msra.mxu0 %v4437_v58 }
 0x19e   : > { %v1567_v63 = vsel %vm9984_vm0, %v323_v23, 0  ;;  %v9985_v53 = vld [vmem:[#allocation28_spill] sm:$0xff]  ;;  %v9987_v14 = vld [vmem:[#allocation29_spill] sm:$0xff]  ;;  %v9989_v54 = vld [vmem:[#allocation30_spill] sm:$0xff]  ;;  %v4562_v27 = vcombine.low %v1711_v41, %v1714_v29  ;;  %4902 = vmatpush3.bf16.msra.mxu1 %v4517_v0 }
 0x19f   : > { %vm9986_vm12 = vnez %v9985_v53  ;;  %vm9988_vm4 = vnez %v9987_v14  ;;  %vm9990_vm5 = vnez %v9989_v54  ;;  %v428_v40 = vld [vmem:[%s5299_s27 + $0x394] sm:$0xf]  ;;  %v383_v4 = vld [vmem:[%s5299_s27 + $0x268] sm:$0xf]  ;;  %v386_v23 = vld [vmem:[%s5299_s27 + $0x27c] sm:$0xf]  ;;  %4881 = vmatprep.subr.bf16.mxu0 %v4482_v24 }
 0x1a0   : > { %v1570_v30 = vsel %vm9986_vm12, %v326_v31, 0  ;;  %v1663_v2 = vsel %vm9988_vm4, %v419_v22, 0  ;;  %v1666_v47 = vsel %vm9990_vm5, %v422_v26, 0  ;;  %v479_v11 = vld [vmem:[%s5299_s27 + $0x4e8] sm:$0xf]  ;;  %v9991_v20 = vld [vmem:[#allocation62_spill] sm:$0xff]  ;;  %4903 = vmatprep.subr.bf16.mxu1 %v4562_v27 }
 0x1a1   : > { %vm9992_vm15 = vnez %v9991_v20  ;;  %v9993_v56 = vld [vmem:[#allocation63_spill] sm:$0xff]  ;;  %v9995_v53 = vld [vmem:[#allocation64_spill] sm:$0xff]  ;;  %v9997_v14 = vld [vmem:[#allocation65_spill] sm:$0xff]  ;;  %v4442_v39 = vcombine.low %v1567_v63, %v1570_v30  ;;  %v4522_v7 = vcombine.low %v1663_v2, %v1666_v47 }
 0x1a2   : > { %v1621_v31 = vsel %vm9992_vm15, %v377_v32, 0  ;;  %vm9994_vm1 = vnez %v9993_v56  ;;  %vm9996_vm0 = vnez %v9995_v53  ;;  %vm9998_vm12 = vnez %v9997_v14  ;;  %v482_v54 = vld [vmem:[%s5299_s27 + $0x4fc] sm:$0xf]  ;;  %v335_v36 = vld [vmem:[%s5299_s27 + $0x128] sm:$0xf]  ;;  %v10001_v20 = vld [vmem:[#allocation34_spill] sm:$0xff] }
 0x1a3   : > { %v1624_v22 = vsel %vm9994_vm1, %v380_v50, 0  ;;  %v1717_v26 = vsel %vm9996_vm0, %v473_v5, 0  ;;  %v1720_v9 = vsel %vm9998_vm12, %v476_v37, 0  ;;  %v338_v41 = vld [vmem:[%s5299_s27 + $0x13c] sm:$0xf]  ;;  %vm10002_vm5 = vnez %v10001_v20  ;;  %v10003_v56 = vld [vmem:[#allocation35_spill] sm:$0xff]  ;;  %4882 = vmatpush3.bf16.msra.mxu0 %v4442_v39  ;;  %4904 = vmatpush3.bf16.msra.mxu1 %v4522_v7 }
 0x1a4   : > { %v431_v32 = vld [vmem:[%s5299_s27 + $0x3a8] sm:$0xf]  ;;  %v9999_v29 = vld [vmem:[#allocation33_spill] sm:$0xff]  ;;  %v1576_v5 = vsel %vm10002_vm5, %v332_v35, 0  ;;  %vm10004_vm15 = vnez %v10003_v56  ;;  %v10005_v63 = vld [vmem:[#allocation36_spill] sm:$0xff]  ;;  %v4487_v47 = vcombine.low %v1621_v31, %v1624_v22  ;;  %v4567_v53 = vcombine.low %v1717_v26, %v1720_v9  ;;  %v3810_v35 = vpop.f32.mrb[8].mxu0 }
 0x1a5   : > { %vm10000_vm4 = vnez %v9999_v29  ;;  %v1669_v37 = vsel %vm10004_vm15, %v425_v18, 0  ;;  %vm10006_vm1 = vnez %v10005_v63  ;;  %v434_v2 = vld [vmem:[%s5299_s27 + $0x3bc] sm:$0xf]  ;;  %v533_v14 = vld [vmem:[%s5299_s27 + $0x650] sm:$0xf]  ;;  %v3851_v29 = vpop.f32.mrb[8].mxu1  ;;  %vm10007_vm0 = vnez %v9785_v60 }
 0x1a6   : > { %v1573_v50 = vsel %vm10000_vm4, %v329_v21, 0  ;;  %v1672_v30 = vsel %vm10006_vm1, %v428_v40, 0  ;;  %v536_v58 = vld [vmem:[%s5299_s27 + $0x664] sm:$0xf]  ;;  %v629_v0 = vld [vmem:[%s5299_s27 + $0x8d0] sm:$0xf]  ;;  %vm10008_vm12 = vnez %v9787_v49  ;;  %vm10009_vm4 = vnez %v9789_v42  ;;  %4883 = vmatprep.subr.bf16.mxu0 %v4487_v47  ;;  %4905 = vmatprep.subr.bf16.mxu1 %v4567_v53 }
 0x1a7   : > { %v632_v21 = vld [vmem:[%s5299_s27 + $0x8e4] sm:$0xf]  ;;  %v1627_v18 = vsel %vm10007_vm0, %v383_v4, 0  ;;  %v1630_v40 = vsel %vm10008_vm12, %v386_v23, 0  ;;  %v1723_v24 = vsel %vm10009_vm4, %v479_v11, 0  ;;  %v10010_v27 = vld [vmem:[#allocation69_spill] sm:$0xff]  ;;  %v8312_v22 = vadd.f32 %v3851_v29, %v3810_v35 }
 0x1a8   : > { %vm10011_vm5 = vnez %v10010_v27  ;;  %v3812_v26 = vpop.f32.mrb[9].mxu0  ;;  %v3853_v9 = vpop.f32.mrb[9].mxu1  ;;  %v4447_v20 = vcombine.low %v1573_v50, %v1576_v5  ;;  %v4527_v56 = vcombine.low %v1669_v37, %v1672_v30  ;;  %v10012_v63 = vld [vmem:[#allocation37_spill] sm:$0xff]  ;;  %v485_v60 = vld [vmem:[%s5299_s27 + $0x510] sm:$0xf]  ;;  %v10016_v5 = vld [vmem:[#allocation39_spill] sm:$0xff]  ;;  %v4492_v27 = vcombine.low %v1627_v18, %v1630_v40 }
 0x1a9   : > { %v1726_v31 = vsel %vm10011_vm5, %v482_v54, 0  ;;  %vm10013_vm15 = vnez %v10012_v63  ;;  %v488_v4 = vld [vmem:[%s5299_s27 + $0x524] sm:$0xf]  ;;  %v8320_v42 = vadd.f32 %v3853_v9, %v3812_v26  ;;  %v3814_v23 = vpop.f32.mrb[10].mxu0  ;;  %v3855_v11 = vpop.f32.mrb[10].mxu1  ;;  %vm10017_vm0 = vnez %v10016_v5  ;;  %v10018_v37 = vld [vmem:[#allocation40_spill] sm:$0xff] }
 0x1aa   : > { %v1579_v13 = vsel %vm10013_vm15, %v335_v36, 0  ;;  %v584_v49 = vld [vmem:[%s5299_s27 + $0x7a4] sm:$0xf]  ;;  %v1675_v36 = vsel %vm10017_vm0, %v431_v32, 0  ;;  %vm10019_vm12 = vnez %v10018_v37  ;;  %v3815_v35 = vpop.f32.mrb[11].mxu0  ;;  %v3856_v29 = vpop.f32.mrb[11].mxu1  ;;  %v4572_v39 = vcombine.low %v1723_v24, %v1726_v31  ;;  %4884 = vmatpush3.bf16.msra.mxu0 %v4447_v20  ;;  %4906 = vmatpush3.bf16.msra.mxu1 %v4527_v56 }
 0x1ab   : > { %v10014_v54 = vld [vmem:[#allocation38_spill] sm:$0xff]  ;;  %v1678_v30 = vsel %vm10019_vm12, %v434_v2, 0  ;;  %v539_v7 = vld [vmem:[%s5299_s27 + $0x678] sm:$0xf]  ;;  %v542_v26 = vld [vmem:[%s5299_s27 + $0x68c] sm:$0xf]  ;;  %vm10020_vm4 = vnez %v9855_v43  ;;  %vm10021_vm5 = vnez %v9857_v6  ;;  %4885 = vmatprep.subr.bf16.mxu0 %v4492_v27  ;;  %vm10028_vm0 = vnez %v9861_v62 }
 0x1ac   : > { %vm10015_vm1 = vnez %v10014_v54  ;;  %v635_v9 = vld [vmem:[%s5299_s27 + $0x8f8] sm:$0xf]  ;;  %v1780_v32 = vsel %vm9854_vm10, %v536_v58, 0  ;;  %v1873_v2 = vsel %vm10020_vm4, %v629_v0, 0  ;;  %v1876_v47 = vsel %vm10021_vm5, %v632_v21, 0  ;;  %v10024_v6 = vld [vmem:[#allocation70_spill] sm:$0xff]  ;;  %4907 = vmatprep.subr.bf16.mxu1 %v4572_v39 }
 0x1ad   : > { %v1582_v50 = vsel %vm10015_vm1, %v338_v41, 0  ;;  %v1777_v41 = vsel %vm9852_vm3, %v533_v14, 0  ;;  %v638_v63 = vld [vmem:[%s5299_s27 + $0x90c] sm:$0xf]  ;;  %v4532_v18 = vcombine.low %v1675_v36, %v1678_v30  ;;  %v491_v40 = vld [vmem:[%s5299_s27 + $0x538] sm:$0xf]  ;;  %vm10022_vm3 = vnez %v9375_v57 }
 0x1ae   : > { %v4452_v53 = vcombine.low %v1579_v13, %v1582_v50  ;;  %v494_v24 = vld [vmem:[%s5299_s27 + $0x54c] sm:$0xf]  ;;  %v1729_v19 = vsel %vm10022_vm3, %v485_v60, 0  ;;  %vm10023_vm10 = vnez %v9380_v61  ;;  %vm10025_vm15 = vnez %v10024_v6  ;;  %v545_v57 = vld [vmem:[%s5299_s27 + $0x6a0] sm:$0xf]  ;;  %v10032_v5 = vld [vmem:[#allocation73_spill] sm:$0xff] }
 0x1af   : > { %v1732_v43 = vsel %vm10023_vm10, %v488_v4, 0  ;;  %v1825_v14 = vsel %vm10025_vm15, %v581_v16, 0  ;;  %v10026_v13 = vld [vmem:[#allocation71_spill] sm:$0xff]  ;;  %v4617_v21 = vcombine.low %v1777_v41, %v1780_v32  ;;  %v4697_v31 = vcombine.low %v1873_v2, %v1876_v47  ;;  %v548_v20 = vld [vmem:[%s5299_s27 + $0x6b4] sm:$0xf]  ;;  %4908 = vmatpush3.bf16.msra.mxu1 %v4532_v18 }
 0x1b0   : > { %vm10027_vm1 = vnez %v10026_v13  ;;  %v590_v0 = vld [vmem:[%s5299_s27 + $0x7cc] sm:$0xf]  ;;  %v641_v56 = vld [vmem:[%s5299_s27 + $0x920] sm:$0xf]  ;;  %v1783_v61 = vsel %vm9860_vm8, %v539_v7, 0  ;;  %v1786_v16 = vsel %vm10028_vm0, %v542_v26, 0  ;;  %vm10029_vm12 = vnez %v9863_v3  ;;  %4886 = vmatpush3.bf16.msra.mxu0 %v4452_v53 }
 0x1b1   : > { %v1828_v58 = vsel %vm10027_vm1, %v584_v49, 0  ;;  %v1879_v60 = vsel %vm10029_vm12, %v635_v9, 0  ;;  %vm10030_vm4 = vnez %v9865_v44  ;;  %v644_v49 = vld [vmem:[%s5299_s27 + $0x934] sm:$0xf]  ;;  %v4577_v23 = vcombine.low %v1729_v19, %v1732_v43  ;;  %v497_v54 = vld [vmem:[%s5299_s27 + $0x560] sm:$0xf]  ;;  %4915 = vmatprep.subr.bf16.mxu0 %v4617_v21  ;;  %4937 = vmatprep.subr.bf16.mxu1 %v4697_v31 }
 0x1b2   : > { %v1882_v4 = vsel %vm10030_vm4, %v638_v63, 0  ;;  %v4657_v11 = vcombine.low %v1825_v14, %v1828_v58  ;;  %v500_v50 = vld [vmem:[%s5299_s27 + $0x574] sm:$0xf]  ;;  %vm10031_vm8 = vnez %v9799_v55  ;;  %vm10033_vm5 = vnez %v10032_v5  ;;  %v10034_v44 = vld [vmem:[#allocation74_spill] sm:$0xff]  ;;  %v10036_v37 = vld [vmem:[#allocation75_spill] sm:$0xff] }
 0x1b3   : > { %v1735_v62 = vsel %vm10031_vm8, %v491_v40, 0  ;;  %v1738_v3 = vsel %vm10033_vm5, %v494_v24, 0  ;;  %vm10035_vm3 = vnez %v10034_v44  ;;  %vm10037_vm10 = vnez %v10036_v37  ;;  %v596_v35 = vld [vmem:[%s5299_s27 + $0x7f4] sm:$0xf]  ;;  %v551_v55 = vld [vmem:[%s5299_s27 + $0x6c8] sm:$0xf] }
 0x1b4   : > { %v1831_v36 = vsel %vm10035_vm3, %v587_v46, 0  ;;  %v1834_v30 = vsel %vm10037_vm10, %v590_v0, 0  ;;  %v4622_v29 = vcombine.low %v1783_v61, %v1786_v16  ;;  %v4702_v27 = vcombine.low %v1879_v60, %v1882_v4  ;;  %v554_v39 = vld [vmem:[%s5299_s27 + $0x6dc] sm:$0xf]  ;;  %v647_v7 = vld [vmem:[%s5299_s27 + $0x948] sm:$0xf] }
 0x1b5   : > { %vm10038_vm15 = vnez %v9579_v8  ;;  %vm10039_vm1 = vnez %v9583_v28  ;;  %vm10040_vm0 = vnez %v9585_v1  ;;  %vm10041_vm12 = vnez %v9871_v15  ;;  %v650_v2 = vld [vmem:[%s5299_s27 + $0x95c] sm:$0xf]  ;;  %v10043_v47 = vld [vmem:[#allocation4_spill] sm:$0xff]  ;;  %v503_v63 = vld [vmem:[%s5299_s27 + $0x588] sm:$0xf] }
 0x1b6   : > { %v1789_v26 = vsel %vm10038_vm15, %v545_v57, 0  ;;  %v1792_v9 = vsel %vm10039_vm1, %v548_v20, 0  ;;  %v1885_v41 = vsel %vm10040_vm0, %v641_v56, 0  ;;  %v1888_v32 = vsel %vm10041_vm12, %v644_v49, 0  ;;  %v506_v1 = vld [vmem:[%s5299_s27 + $0x59c] sm:$0xf] }
 0x1b7   : > { %vm10042_vm4 = vnez %v9058_v51  ;;  %vm10044_vm8 = vnez %v10043_v47  ;;  %v4582_v8 = vcombine.low %v1735_v62, %v1738_v3  ;;  %v4662_v28 = vcombine.low %v1831_v36, %v1834_v30  ;;  %v599_v53 = vld [vmem:[%s5299_s27 + $0x808] sm:$0xf]  ;;  %v10045_v15 = vld [vmem:[#allocation76_spill] sm:$0xff]  ;;  %v10047_v40 = vld [vmem:[#allocation77_spill] sm:$0xff] }
 0x1b8   : > { %4768 = vmatmul.mubr.msk.bf16.vlgmr.msra.gmra.mrb[24].mxu0 %vm10042_vm4, %v9225_v34  ;;  %4772 = vmatmul.mubr.msk.bf16.vlgmr.msra.gmra.mrb[24].mxu1 %vm10044_vm8, %v9225_v34  ;;  %vm10046_vm5 = vnez %v10045_v15  ;;  %vm10048_vm3 = vnez %v10047_v40  ;;  %v10049_v24 = vld [vmem:[#allocation78_spill] sm:$0xff]  ;;  %v10051_v19 = vld [vmem:[#allocation79_spill] sm:$0xff]  ;;  %v602_v6 = vld [vmem:[%s5299_s27 + $0x81c] sm:$0xf]  ;;  %v4627_v14 = vcombine.low %v1789_v26, %v1792_v9  ;;  %v4707_v13 = vcombine.low %v1885_v41, %v1888_v32 }
 0x1b9   : > { %4916 = vmatpush3.bf16.msra.mxu0 %v4577_v23  ;;  %4938 = vmatpush3.bf16.msra.mxu1 %v4657_v11  ;;  %v1741_v18 = vsel %vm10046_vm5, %v497_v54, 0  ;;  %v1744_v51 = vsel %vm10048_vm3, %v500_v50, 0  ;;  %vm10050_vm10 = vnez %v10049_v24  ;;  %vm10052_vm15 = vnez %v10051_v19  ;;  %v557_v58 = vld [vmem:[%s5299_s27 + $0x6f0] sm:$0xf]  ;;  %v560_v0 = vld [vmem:[%s5299_s27 + $0x704] sm:$0xf] }
 0x1ba   : > { %v1837_v46 = vsel %vm10050_vm10, %v593_v59, 0  ;;  %v1840_v43 = vsel %vm10052_vm15, %v596_v35, 0  ;;  %4917 = vmatprep.subr.bf16.mxu0 %v4622_v29  ;;  %4939 = vmatprep.subr.bf16.mxu1 %v4702_v27  ;;  %v653_v21 = vld [vmem:[%s5299_s27 + $0x970] sm:$0xf]  ;;  %vm10053_vm1 = vnez %v9873_v33  ;;  %vm10054_vm0 = vnez %v9875_v38  ;;  %v10055_v20 = vld [vmem:[#allocation111_spill] sm:$0xff]  ;;  %v10059_v4 = vld [vmem:[#allocation5_spill] sm:$0xff] }
 0x1bb   : > { %v1795_v31 = vsel %vm10053_vm1, %v551_v55, 0  ;;  %v1798_v57 = vsel %vm10054_vm0, %v554_v39, 0  ;;  %vm10056_vm12 = vnez %v10055_v20  ;;  %v10057_v61 = vld [vmem:[#allocation112_spill] sm:$0xff]  ;;  %v656_v60 = vld [vmem:[%s5299_s27 + $0x984] sm:$0xf]  ;;  %vm10060_vm8 = vnez %v10059_v4  ;;  %v10065_v62 = vld [vmem:[#allocation81_spill] sm:$0xff] }
 0x1bc   : > { %v1891_v56 = vsel %vm10056_vm12, %v647_v7, 0  ;;  %vm10058_vm4 = vnez %v10057_v61  ;;  %4774 = vmatprep.mubr.msk.bf16.mxu0 %vm10060_vm8, %v9225_v34  ;;  %v10061_v49 = vld [vmem:[#allocation6_spill] sm:$0xff]  ;;  %v4587_v33 = vcombine.low %v1741_v18, %v1744_v51  ;;  %v4667_v38 = vcombine.low %v1837_v46, %v1840_v43  ;;  %v509_v23 = vld [vmem:[%s5299_s27 + $0x5b0] sm:$0xf]  ;;  %v10069_v36 = vld [vmem:[#allocation83_spill] sm:$0xff] }
 0x1bd   : > { %v1894_v16 = vsel %vm10058_vm4, %v650_v2, 0  ;;  %vm10062_vm5 = vnez %v10061_v49  ;;  %v512_v11 = vld [vmem:[%s5299_s27 + $0x5c4] sm:$0xf]  ;;  %v605_v54 = vld [vmem:[%s5299_s27 + $0x830] sm:$0xf]  ;;  %4918 = vmatpush3.bf16.msra.mxu0 %v4582_v8  ;;  %4940 = vmatpush3.bf16.msra.mxu1 %v4662_v28  ;;  %vm10066_vm10 = vnez %v10065_v62  ;;  %vm10070_vm1 = vnez %v10069_v36  ;;  %v10081_v15 = vld [vmem:[#allocation87_spill] sm:$0xff] }
 0x1be   : > { %4778 = vmatprep.mubr.msk.bf16.mxu1 %vm10062_vm5, %v9225_v34  ;;  %v10063_v50 = vld [vmem:[#allocation80_spill] sm:$0xff]  ;;  %v1750_v5 = vsel %vm10066_vm10, %v506_v1, 0  ;;  %v10067_v3 = vld [vmem:[#allocation82_spill] sm:$0xff]  ;;  %v1846_v37 = vsel %vm10070_vm1, %v602_v6, 0  ;;  %4919 = vmatprep.subr.bf16.mxu0 %v4627_v14  ;;  %v4632_v35 = vcombine.low %v1795_v31, %v1798_v57  ;;  %v4712_v29 = vcombine.low %v1891_v56, %v1894_v16  ;;  %v563_v27 = vld [vmem:[%s5299_s27 + $0x718] sm:$0xf] }
 0x1bf   : > { %vm10064_vm3 = vnez %v10063_v50  ;;  %vm10068_vm15 = vnez %v10067_v3  ;;  %v608_v30 = vld [vmem:[%s5299_s27 + $0x844] sm:$0xf]  ;;  %4941 = vmatprep.subr.bf16.mxu1 %v4707_v13  ;;  %v566_v55 = vld [vmem:[%s5299_s27 + $0x72c] sm:$0xf]  ;;  %v659_v39 = vld [vmem:[%s5299_s27 + $0x998] sm:$0xf]  ;;  %vm10071_vm0 = vnez %v9880_v45  ;;  %vm10072_vm12 = vnez %v9882_v25 }
 0x1c0   : > { %v1747_v59 = vsel %vm10064_vm3, %v503_v63, 0  ;;  %v1843_v44 = vsel %vm10068_vm15, %v599_v53, 0  ;;  %v1801_v7 = vsel %vm10071_vm0, %v557_v58, 0  ;;  %v1804_v26 = vsel %vm10072_vm12, %v560_v0, 0  ;;  %v662_v32 = vld [vmem:[%s5299_s27 + $0x9ac] sm:$0xf] }
 0x1c1   : > { %vm10073_vm4 = vnez %v9622_v10  ;;  %vm10074_vm8 = vnez %v9625_v52  ;;  %v4592_v2 = vcombine.low %v1747_v59, %v1750_v5  ;;  %v4672_v47 = vcombine.low %v1843_v44, %v1846_v37  ;;  %v515_v8 = vld [vmem:[%s5299_s27 + $0x5d8] sm:$0xf]  ;;  %v518_v28 = vld [vmem:[%s5299_s27 + $0x5ec] sm:$0xf]  ;;  %4920 = vmatpush3.bf16.msra.mxu0 %v4587_v33  ;;  %4942 = vmatpush3.bf16.msra.mxu1 %v4667_v38  ;;  %v10075_v25 = vld [vmem:[#allocation84_spill] sm:$0xff] }
 0x1c2   : > { %v1897_v9 = vsel %vm10073_vm4, %v653_v21, 0  ;;  %v1900_v41 = vsel %vm10074_vm8, %v656_v60, 0  ;;  %v611_v45 = vld [vmem:[%s5299_s27 + $0x858] sm:$0xf]  ;;  %vm10076_vm5 = vnez %v10075_v25  ;;  %v10079_v52 = vld [vmem:[#allocation86_spill] sm:$0xff]  ;;  %vm10082_vm15 = vnez %v10081_v15  ;;  %4921 = vmatprep.subr.bf16.mxu0 %v4632_v35  ;;  %4943 = vmatprep.subr.bf16.mxu1 %v4712_v29  ;;  %v10083_v58 = vld [vmem:[#allocation115_spill] sm:$0xff] }
 0x1c3   : > { %v1753_v63 = vsel %vm10076_vm5, %v509_v23, 0  ;;  %v10077_v1 = vld [vmem:[#allocation85_spill] sm:$0xff]  ;;  %vm10080_vm10 = vnez %v10079_v52  ;;  %v1852_v18 = vsel %vm10082_vm15, %v608_v30, 0  ;;  %v614_v40 = vld [vmem:[%s5299_s27 + $0x86c] sm:$0xf]  ;;  %v4637_v51 = vcombine.low %v1801_v7, %v1804_v26  ;;  %v10085_v20 = vld [vmem:[#allocation88_spill] sm:$0xff] }
 0x1c4   : > { %vm10078_vm3 = vnez %v10077_v1  ;;  %v1849_v53 = vsel %vm10080_vm10, %v605_v54, 0  ;;  %v4717_v24 = vcombine.low %v1897_v9, %v1900_v41  ;;  %v569_v46 = vld [vmem:[%s5299_s27 + $0x740] sm:$0xf]  ;;  %v572_v19 = vld [vmem:[%s5299_s27 + $0x754] sm:$0xf]  ;;  %v1807_v6 = vsel %vm9886_vm13, %v563_v27, 0 }
 0x1c5   : > { %v1756_v10 = vsel %vm10078_vm3, %v512_v11, 0  ;;  %v665_v43 = vld [vmem:[%s5299_s27 + $0x9c0] sm:$0xf]  ;;  %v1810_v14 = vsel %vm9887_vm2, %v566_v55, 0  ;;  %v1903_v13 = vsel %vm9888_vm7, %v659_v39, 0  ;;  %vm10084_vm1 = vnez %v10083_v58  ;;  %v10087_v61 = vld [vmem:[#allocation89_spill] sm:$0xff]  ;;  %4922 = vmatpush3.bf16.msra.mxu0 %v4592_v2  ;;  %4944 = vmatpush3.bf16.msra.mxu1 %v4672_v47 }
 0x1c6   : > { %v1906_v0 = vsel %vm10084_vm1, %v662_v32, 0  ;;  %v668_v21 = vld [vmem:[%s5299_s27 + $0x9d4] sm:$0xf]  ;;  %v4597_v31 = vcombine.low %v1753_v63, %v1756_v10  ;;  %v4677_v57 = vcombine.low %v1849_v53, %v1852_v18  ;;  %vm10086_vm0 = vnez %v10085_v20  ;;  %v521_v16 = vld [vmem:[%s5299_s27 + $0x600] sm:$0xf]  ;;  %v10091_v4 = vld [vmem:[#allocation91_spill] sm:$0xff]  ;;  %4923 = vmatprep.subr.bf16.mxu0 %v4637_v51  ;;  %4945 = vmatprep.subr.bf16.mxu1 %v4717_v24 }
 0x1c7   : > { %v1759_v56 = vsel %vm10086_vm0, %v515_v8, 0  ;;  %vm10088_vm12 = vnez %v10087_v61  ;;  %vm10090_vm2 = vnez %v10089_v17  ;;  %vm10092_vm7 = vnez %v10091_v4  ;;  %v617_v54 = vld [vmem:[%s5299_s27 + $0x880] sm:$0xf]  ;;  %v10097_v3 = vld [vmem:[#allocation119_spill] sm:$0xff]  ;;  %v620_v36 = vld [vmem:[%s5299_s27 + $0x894] sm:$0xf] }
 0x1c8   : > { %v1762_v48 = vsel %vm10088_vm12, %v518_v28, 0  ;;  %v1855_v60 = vsel %vm10090_vm2, %v611_v45, 0  ;;  %v1858_v49 = vsel %vm10092_vm7, %v614_v40, 0  ;;  %v1813_v38 = vsel %vm7602_vm6, %v569_v46, 0  ;;  %v10095_v62 = vld [vmem:[#allocation118_spill] sm:$0xff]  ;;  %v10099_v7 = vld [vmem:[#allocation92_spill] sm:$0xff] }
 0x1c9   : > { %v1816_v11 = vsel %vm9890_vm11, %v572_v19, 0  ;;  %v4642_v50 = vcombine.low %v1807_v6, %v1810_v14  ;;  %v4722_v59 = vcombine.low %v1903_v13, %v1906_v0  ;;  %vm10096_vm13 = vnez %v10095_v62  ;;  %v575_v37 = vld [vmem:[%s5299_s27 + $0x768] sm:$0xf]  ;;  %v578_v30 = vld [vmem:[%s5299_s27 + $0x77c] sm:$0xf]  ;;  %4924 = vmatpush3.bf16.msra.mxu0 %v4597_v31  ;;  %4946 = vmatpush3.bf16.msra.mxu1 %v4677_v57  ;;  %v10103_v2 = vld [vmem:[#allocation94_spill] sm:$0xff] }
 0x1ca   : > { %v1909_v5 = vsel %vm10096_vm13, %v665_v43, 0  ;;  %vm10098_vm4 = vnez %v10097_v3  ;;  %v671_v35 = vld [vmem:[%s5299_s27 + $0x9e8] sm:$0xf]  ;;  %v674_v29 = vld [vmem:[%s5299_s27 + $0x9fc] sm:$0xf]  ;;  %v4602_v27 = vcombine.low %v1759_v56, %v1762_v48  ;;  %v4682_v55 = vcombine.low %v1855_v60, %v1858_v49  ;;  %v10109_v10 = vld [vmem:[#allocation122_spill] sm:$0xff] }
 0x1cb   : > { %v1912_v44 = vsel %vm10098_vm4, %v668_v21, 0  ;;  %v4647_v39 = vcombine.low %v1813_v38, %v1816_v11  ;;  %vm10100_vm11 = vnez %v10099_v7  ;;  %v10101_v41 = vld [vmem:[#allocation93_spill] sm:$0xff]  ;;  %vm10104_vm8 = vnez %v10103_v2  ;;  %v10105_v8 = vld [vmem:[#allocation95_spill] sm:$0xff]  ;;  %4925 = vmatprep.subr.bf16.mxu0 %v4642_v50  ;;  %4947 = vmatprep.subr.bf16.mxu1 %v4722_v59  ;;  %v10113_v14 = vld [vmem:[#allocation96_spill] sm:$0xff] }
 0x1cc   : > { %v1765_v26 = vsel %vm10100_vm11, %v521_v16, 0  ;;  %v4727_v9 = vcombine.low %v1909_v5, %v1912_v44  ;;  %vm10102_vm6 = vnez %v10101_v41  ;;  %v1861_v47 = vsel %vm10104_vm8, %v617_v54, 0  ;;  %v10111_v53 = vld [vmem:[#allocation123_spill] sm:$0xff]  ;;  %v530_v40 = vld [vmem:[%s5299_s27 + $0x63c] sm:$0xf]  ;;  %v10117_v21 = vld [vmem:[#allocation98_spill] sm:$0xff] }
 0x1cd   : > { %v1768_v32 = vsel %vm10102_vm6, %v524_v12, 0  ;;  %vm10106_vm5 = vnez %v10105_v8  ;;  %v1819_v25 = vsel %vm7643_vm14, %v575_v37, 0  ;;  %v1822_v1 = vsel %vm7649_vm9, %v578_v30, 0  ;;  %v527_v18 = vld [vmem:[%s5299_s27 + $0x628] sm:$0xf]  ;;  %4926 = vmatpush3.bf16.msra.mxu0 %v4602_v27  ;;  %4948 = vmatpush3.bf16.msra.mxu1 %v4682_v55  ;;  %v10115_v58 = vld [vmem:[#allocation97_spill] sm:$0xff] }
 0x1ce   : > { %v1864_v28 = vsel %vm10106_vm5, %v620_v36, 0  ;;  %vm10110_vm3 = vnez %v10109_v10  ;;  %vm10112_vm10 = vnez %v10111_v53  ;;  %v623_v51 = vld [vmem:[%s5299_s27 + $0x8a8] sm:$0xf]  ;;  %v626_v24 = vld [vmem:[%s5299_s27 + $0x8bc] sm:$0xf]  ;;  %v4607_v46 = vcombine.low %v1765_v26, %v1768_v32  ;;  %4927 = vmatprep.subr.bf16.mxu0 %v4647_v39  ;;  %4949 = vmatprep.subr.bf16.mxu1 %v4727_v9  ;;  %v10123_v16 = vld [vmem:[#allocation32_spill] sm:$0xff] }
 0x1cf   : > { %v1915_v52 = vsel %vm10110_vm3, %v671_v35, 0  ;;  %v1918_v15 = vsel %vm10112_vm10, %v674_v29, 0  ;;  %v4687_v19 = vcombine.low %v1861_v47, %v1864_v28  ;;  %v4652_v43 = vcombine.low %v1819_v25, %v1822_v1  ;;  %v10119_v57 = vld [vmem:[#allocation99_spill] sm:$0xff] }
 0x1d0   : > { %v4732_v6 = vcombine.low %v1915_v52, %v1918_v15  ;;  %vm10114_vm14 = vnez %v10113_v14  ;;  %vm10116_vm9 = vnez %v10115_v58  ;;  %vm10118_vm15 = vnez %v10117_v21  ;;  %v10121_v48 = vld [vmem:[#allocation31_spill] sm:$0xff] }
 0x1d1   : > { %v1771_v13 = vsel %vm10114_vm14, %v527_v18, 0  ;;  %v1774_v0 = vsel %vm10116_vm9, %v530_v40, 0  ;;  %v1867_v31 = vsel %vm10118_vm15, %v623_v51, 0  ;;  %vm10120_vm1 = vnez %v10119_v57  ;;  %4928 = vmatpush3.bf16.msra.mxu0 %v4607_v46  ;;  %4950 = vmatpush3.bf16.msra.mxu1 %v4687_v19 }
 0x1d2   : > { %v1870_v20 = vsel %vm10120_vm1, %v626_v24, 0  ;;  %v4612_v56 = vcombine.low %v1771_v13, %v1774_v0  ;;  %4929 = vmatprep.subr.bf16.mxu0 %v4652_v43  ;;  %4951 = vmatprep.subr.bf16.mxu1 %v4732_v6  ;;  %vm10122_vm0 = vnez %v10121_v48  ;;  %vm10124_vm12 = vnez %v10123_v16 }
 0x1d3   : > { %v4692_v61 = vcombine.low %v1867_v31, %v1870_v20  ;;  %vm285_vm2 = vcmask 719872  }
 0x1d5   : > { %4930 = vmatpush3.bf16.msra.mxu0 %v4612_v56  ;;  %4952 = vmatpush3.bf16.msra.mxu1 %v4692_v61 }
 0x1d8   : > { %4776 = vmatmul.mubr.msk.bf16.vlgmr.msra.gmra.mrb[28].mxu0 %vm10122_vm0, %v9225_v34  ;;  %4780 = vmatmul.mubr.msk.bf16.vlgmr.msra.gmra.mrb[28].mxu1 %vm10124_vm12, %v9225_v34 }
 0x1df   : > { %v3892_v12 = vpop.f32.mrb[12].mxu0  ;;  %v3933_v17 = vpop.f32.mrb[12].mxu1 }
 0x1e0   : > { %v3893_v60 = vadd.f32 %v3892_v12, %v8312_v22  ;;  %v3894_v4 = vpop.f32.mrb[13].mxu0  ;;  %v3935_v49 = vpop.f32.mrb[13].mxu1 }
 0x1e1   : > { %v3895_v33 = vadd.f32 %v3894_v4, %v8320_v42  ;;  %v3896_v38 = vpop.f32.mrb[14].mxu0  ;;  %v3937_v23 = vpop.f32.mrb[14].mxu1  ;;  %v10125_v42 = vmov 0.0  }
 0x1e2   : > { %v3934_v11 = vadd.f32 %v3933_v17, %v3893_v60  ;;  %v3897_v54 = vpop.f32.mrb[15].mxu0  ;;  %v3938_v50 = vpop.f32.mrb[15].mxu1  ;;  %286 = vst.msk [vmem:[%s8536_s8 + $0x20] sm:$0xff] %vm285_vm2, %v10125_v42 }
 0x1e3   : > { %v3936_v34 = vadd.f32 %v3935_v49, %v3895_v33 }
 0x1e4   : > { %4269 = vst [vmem:[%s8536_s8] sm:$0xff] %v3934_v11 }
 0x1e5   : > { %4270 = vst [vmem:[%s8536_s8 + $0x8] sm:$0xff] %v3936_v34 }
 0x1e9   : > { %v2111_v31 = vld [vmem:[%s8536_s8 + $0x20] sm:$0xff] }
 0x21f   : > { %v3974_v22 = vpop.f32.mrb[16].mxu0  ;;  %v4015_v59 = vpop.f32.mrb[16].mxu1 }
 0x220   : > { %v4016_v62 = vadd.f32 %v4015_v59, %v3974_v22  ;;  %v3976_v5 = vpop.f32.mrb[17].mxu0  ;;  %v4017_v3 = vpop.f32.mrb[17].mxu1 }
 0x221   : > { %v4018_v44 = vadd.f32 %v4017_v3, %v3976_v5  ;;  %v3978_v36 = vpop.f32.mrb[18].mxu0  ;;  %v4019_v37 = vpop.f32.mrb[18].mxu1 }
 0x222   : > { %v3979_v30 = vpop.f32.mrb[19].mxu0  ;;  %v4020_v35 = vpop.f32.mrb[19].mxu1 }
 0x25f   : > { %v4056_v29 = vpop.f32.mrb[20].mxu0  ;;  %v4097_v27 = vpop.f32.mrb[20].mxu1 }
 0x260   : > { %v4057_v55 = vadd.f32 %v4056_v29, %v4016_v62  ;;  %v4058_v39 = vpop.f32.mrb[21].mxu0  ;;  %v4099_v7 = vpop.f32.mrb[21].mxu1 }
 0x261   : > { %v4059_v26 = vadd.f32 %v4058_v39, %v4018_v44  ;;  %v4060_v9 = vpop.f32.mrb[22].mxu0  ;;  %v4101_v41 = vpop.f32.mrb[22].mxu1 }
 0x262   : > { %v4098_v32 = vadd.f32 %v4097_v27, %v4057_v55  ;;  %v4061_v2 = vpop.f32.mrb[23].mxu0  ;;  %v4102_v47 = vpop.f32.mrb[23].mxu1 }
 0x263   : > { %v4100_v8 = vadd.f32 %v4099_v7, %v4059_v26 }
 0x264   : > { %4271 = vst [vmem:[%s8536_s8 + $0x10] sm:$0xff] %v4098_v32 }
 0x265   : > { %4272 = vst [vmem:[%s8536_s8 + $0x18] sm:$0xff] %v4100_v8 }
 0x28b   : > { %v4887_v28 = vpop.f32.mrb[24].mxu0  ;;  %v4909_v45 = vpop.f32.mrb[24].mxu1 }
 0x28c   : > { %v4888_v25 = vpop.f32.mrb[25].mxu0  ;;  %v4910_v63 = vpop.f32.mrb[25].mxu1 }
 0x28d   : > { %v4889_v1 = vadd.f32 %v4888_v25, %v4887_v28  ;;  %v4911_v10 = vadd.f32 %v4910_v63, %v4909_v45  ;;  %v4890_v52 = vpop.f32.mrb[26].mxu0  ;;  %v4912_v53 = vpop.f32.mrb[26].mxu1 }
 0x28e   : > { %v4891_v15 = vpop.f32.mrb[27].mxu0  ;;  %v4913_v18 = vpop.f32.mrb[27].mxu1 }
 0x28f   : > { %v4179_v40 = vadd.f32 %v4911_v10, %v4889_v1 }
 0x2ab   : > { %v4931_v51 = vpop.f32.mrb[28].mxu0  ;;  %v4953_v24 = vpop.f32.mrb[28].mxu1 }
 0x2ac   : > { %v4932_v46 = vpop.f32.mrb[29].mxu0  ;;  %v4954_v19 = vpop.f32.mrb[29].mxu1 }
 0x2ad   : > { %v4933_v43 = vadd.f32 %v4932_v46, %v4931_v51  ;;  %v4955_v6 = vadd.f32 %v4954_v19, %v4953_v24  ;;  %v4934_v14 = vpop.f32.mrb[30].mxu0  ;;  %v4956_v13 = vpop.f32.mrb[30].mxu1 }
 0x2ae   : > { %v4935_v58 = vpop.f32.mrb[31].mxu0  ;;  %v4957_v0 = vpop.f32.mrb[31].mxu1 }
 0x2af   : > { %v4219_v21 = vadd.f32 %v4933_v43, %v4179_v40 }
 0x2b1   : > { %v4259_v57 = vadd.f32 %v4955_v6, %v4219_v21 }
 0x2b3   : > { %v4268_v20 = vadd.f32 %v4259_v57, %v2111_v31 }
 0x2b5   : > { %4274 = vst.msk [vmem:[%s8536_s8 + $0x20] sm:$0xff] %vm285_vm2, %v4268_v20 }
 0x2b6 PF: > { %s14_s14 = sadd.s32 1, %s5010_s14   ;;  %s10126_s12 = smov %s5006_s13 }
 0x2b7   : > { %p11_p8 = scmp.ge.s32.totalorder %s14_s14, 4   ;;  %s10127_s13 = smov %s10129_s15 }
 0x2b9   :  { %13 = sbr.rel (!%p11_p8) target bundleno = 2 (0x2), region = 77 }

</bundles_post_ra>
